<compile_context>
chip_gen: v6e
topology: v6e:2x2x1
jax: 0.10.0
libtpu: 0.0.40
codegen_flags: <defaults>
</compile_context>

<pallas_src>
import numpy as np
import jax
import jax.numpy as jnp
from jax.experimental import pallas as pl
from jax.experimental.pallas import tpu as pltpu


# ------------------------- static architecture geometry -------------------------
_NDF = 8
_IN_HW = 64
_TAIL = 8          # zero tail so shifted tap slices stay in-bounds
_RH = (0, 1, 1, 2)  # bordered-plane row/col offset for kernel tap index kh/kw = 0..3
_AB = (1, 0, 1, 0)  # parity-plane index (row/col) for kernel tap index kh/kw = 0..3


def _geom(l):
    """Layer-l geometry.
    Ho,Wo : output spatial;  Wp = Wo+2 : accumulator / plane row pitch;
    La = Ho*Wp : flat accumulator length;
    Lpp = (Ho+2)*Wp + TAIL : flat (bordered + tail) input-plane length."""
    H = _IN_HW >> l
    Ho = H // 2
    Wo = Ho
    Wp = Wo + 2
    return Ho, Wo, Wp, Ho * Wp, (Ho + 2) * Wp + _TAIL


def _make_boundary_matrix(l):
    """(K, Lpp_{l+1}) 0/1 scatter shared by all 4 parity planes of the l->l+1
    boundary.  plane(a,b) = Y[:, d : d+K] @ g  with  d = a*Wp_l + b, so the 4
    planes only differ by a lane shift of the LHS (Kronecker structure)."""
    Ho, Wo, Wp, La, _ = _geom(l)
    Ho1, Wo1, Wp1, _, Lpp1 = _geom(l + 1)
    K = La - Wp - 2
    g = np.zeros((K, Lpp1), np.float32)
    for i in range(Ho1):
        for j in range(Wo1):
            g[2 * i * Wp + 2 * j, (1 + i) * Wp1 + (1 + j)] = 1.0
    return g


def _make_output_matrix():
    """(La_3, 16) 0/1 matrix extracting the valid 4x4 outputs from the layer-4
    flat accumulator (dropping the 2 junk columns per row)."""
    Ho, Wo, Wp, La, _ = _geom(3)
    g = np.zeros((La, Ho * Wo), np.float32)
    for i in range(Ho):
        for j in range(Wo):
            g[i * Wp + j, i * Wo + j] = 1.0
    return g


def _tap_offsets(Wp):
    return [(_AB[kh] * 2 + _AB[kw], _RH[kh] * Wp + _RH[kw])
            for kh in range(4) for kw in range(4)]


# --------------------------------- the fused kernel ---------------------------------
def _localization64_kernel(xpl_ref, w1_ref, w234_ref, sh_ref,
                           g0_ref, g1_ref, g2_ref, gout_ref, o_ref):
    f32 = jnp.float32

    def lrelu(v):
        return jnp.where(v > 0, v, 0.2 * v)

    def repack(y, Wp, g):
        """y: (8, La) flat post-activation; g: (K, Lpp_next).
        Returns (32, Lpp_next) = the 4 parity planes stacked on sublanes."""
        K = g.shape[0]
        lhs = jnp.concatenate([y[:, d:d + K] for d in (0, 1, Wp, Wp + 1)],
                              axis=0)                                  # (32, K)
        return jnp.dot(lhs, g, preferred_element_type=f32)             # (32, Lpp)

    def conv(planes, cin, Wp, La, w, shift):
        """planes: (4*cin, Lpp) stacked parity planes; w: (8, 16*cin).
        One tap-stacked MXU matmul per layer."""
        rows = [planes[ab * cin:(ab + 1) * cin, s:s + La]
                for (ab, s) in _tap_offsets(Wp)]
        stacked = jnp.concatenate(rows, axis=0)                        # (16*cin, La)
        acc = jnp.dot(w, stacked, preferred_element_type=f32)          # (8, La)
        if shift is not None:
            acc = acc + shift
        return lrelu(acc)

    # ---------------- layer 1 (Cin = 1, no BatchNorm) ----------------
    _, _, Wp0, La0, _ = _geom(0)
    planes = xpl_ref[0]                                                # (4, Lpp0)
    y = conv(planes, 1, Wp0, La0, w1_ref[...], None)                   # (8, 1088)

    # ---------------- layers 2..4 (Cin = 8, folded BN scale + shift) ----------------
    g_refs = (g0_ref, g1_ref, g2_ref)
    for li in range(3):
        _, _, Wp_prev, _, _ = _geom(li)
        _, _, Wp, La, _ = _geom(li + 1)
        planes = repack(y, Wp_prev, g_refs[li][...])                   # (32, Lpp)
        y = conv(planes, _NDF, Wp, La, w234_ref[li], sh_ref[li])       # (8, La)

    # ---------------- extract the valid 4x4 outputs -> (8, 16) ----------------
    o_ref[0] = jnp.dot(y, gout_ref[...], preferred_element_type=f32)


# --------------------------------- host-side wrappers ---------------------------------
def _make_input_planes(x):
    """x: (N, 1, 64, 64) -> (N, 4, Lpp_0) parity-split, bordered, flattened planes."""
    N = x.shape[0]
    Ho, Wo, Wp, _, _ = _geom(0)
    Hp = Ho + 2
    xp = jnp.pad(x[:, 0], ((0, 0), (2, 2), (2, 2)))                    # (N, 68, 68)
    planes = [xp[:, a::2, b::2].reshape(N, Hp * Wp)
              for a in (0, 1) for b in (0, 1)]
    xpl = jnp.stack(planes, axis=1)                                    # (N, 4, 1156)
    return jnp.pad(xpl, ((0, 0), (0, 0), (0, _TAIL)))                  # (N, 4, 1164)


def pack_params(params):
    """Fold BN scale into conv weights, stack the 16 taps along K, and build
    the shared 0/1 boundary scatter matrices.  Done once, outside the hot path."""
    w1 = None
    w234, shifts = [], []
    for l, (w, scale, shift) in enumerate(params):
        wf = w * scale[:, None, None, None]                            # (8, Cin, 4, 4)
        taps = [wf[:, :, kh, kw] for kh in range(4) for kw in range(4)]
        wmat = jnp.concatenate(taps, axis=1)                           # (8, 16*Cin)
        if l == 0:
            w1 = wmat.astype(jnp.float32)                              # (8, 16)
        else:
            w234.append(wmat)
            shifts.append(shift.reshape(_NDF, 1))
    w234 = jnp.stack(w234, axis=0).astype(jnp.float32)                 # (3, 8, 128)
    shifts = jnp.stack(shifts, axis=0).astype(jnp.float32)             # (3, 8, 1)
    g0 = jnp.asarray(_make_boundary_matrix(0))                         # (1052, 332) f32
    g1 = jnp.asarray(_make_boundary_matrix(1))                         # (268, 108)
    g2 = jnp.asarray(_make_boundary_matrix(2))                         # (68, 44)
    gout = jnp.asarray(_make_output_matrix())                          # (24, 16)
    return (w1, w234, shifts, g0, g1, g2, gout)


@jax.jit
def localization64_forward(x, packed):
    w1, w234, shifts, g0, g1, g2, gout = packed
    N = x.shape[0]
    xpl = _make_input_planes(x.astype(jnp.float32))
    Lpp0 = xpl.shape[-1]

    out = pl.pallas_call(
        _localization64_kernel,
        out_shape=jax.ShapeDtypeStruct((N, _NDF, 16), jnp.float32),
        grid=(N,),
        in_specs=[
            pl.BlockSpec((1, 4, Lpp0), lambda n: (n, 0, 0)),           # per-sample planes
            pl.BlockSpec(w1.shape, lambda n: (0, 0)),                  # resident weights
            pl.BlockSpec(w234.shape, lambda n: (0, 0, 0)),
            pl.BlockSpec(shifts.shape, lambda n: (0, 0, 0)),
            pl.BlockSpec(g0.shape, lambda n: (0, 0)),                  # resident scatters
            pl.BlockSpec(g1.shape, lambda n: (0, 0)),
            pl.BlockSpec(g2.shape, lambda n: (0, 0)),
            pl.BlockSpec(gout.shape, lambda n: (0, 0)),
        ],
        out_specs=pl.BlockSpec((1, _NDF, 16), lambda n: (n, 0, 0)),
        compiler_params=pltpu.CompilerParams(
            dimension_semantics=("parallel",),
            vmem_limit_bytes=16 << 20),
    )(xpl, w1, w234, shifts, g0, g1, g2, gout)

    return out.reshape(N, _NDF, 4, 4)


# --------------------------------- parameters & reference ---------------------------------
def init_params(key):
    nc, ndf, k = 1, _NDF, 4
    eps = 1e-5
    cins = [nc, ndf, ndf, ndf]
    params = []
    keys = jax.random.split(key, 5 * 4)
    for li in range(4):
        kw_, kg, kb, km, kv = keys[5 * li:5 * li + 5]
        w = 0.05 * jax.random.normal(kw_, (ndf, cins[li], k, k), dtype=jnp.float32)
        if li == 0:
            scale = jnp.ones((ndf,), jnp.float32)
            shift = jnp.zeros((ndf,), jnp.float32)
        else:
            gamma = 1.0 + 0.1 * jax.random.normal(kg, (ndf,), dtype=jnp.float32)
            beta = 0.1 * jax.random.normal(kb, (ndf,), dtype=jnp.float32)
            rmean = 0.1 * jax.random.normal(km, (ndf,), dtype=jnp.float32)
            rvar = jnp.abs(1.0 + 0.1 * jax.random.normal(kv, (ndf,), dtype=jnp.float32))
            # TODO(synk): PyTorch default train() mode would use batch statistics;
            # inference-mode (running-stats) BatchNorm is folded into scale/shift here.
            scale = gamma / jnp.sqrt(rvar + eps)
            shift = beta - rmean * scale
        params.append((w, scale, shift))
    return params


def _reference_forward(x, params):
    """Plain-JAX reference (lax.conv) for correctness checking."""
    for (w, scale, shift) in params:
        y = jax.lax.conv_general_dilated(
            x, w, window_strides=(2, 2), padding=[(1, 1), (1, 1)],
            dimension_numbers=('NCHW', 'OIHW', 'NCHW'),
            precision=jax.lax.Precision.HIGHEST)
        y = y * scale.reshape(1, -1, 1, 1) + shift.reshape(1, -1, 1, 1)
        x = jnp.where(y > 0, y, 0.2 * y)
    return x


if __name__ == "__main__":
    key = jax.random.PRNGKey(0)
    k_param, k_x = jax.random.split(key)
    params = init_params(k_param)
    packed = pack_params(params)

    # "Localization64" implies a 64x64 single-channel input; small batch of 2.
    x = jax.random.normal(k_x, (2, 1, 64, 64), dtype=jnp.float32)

    out = jax.block_until_ready(localization64_forward(x, packed))
    assert out.shape == (2, 8, 4, 4), out.shape

    ref = jax.block_until_ready(_reference_forward(x, params))
    assert np.allclose(np.asarray(out), np.asarray(ref), rtol=1e-3, atol=1e-3), \
        float(np.max(np.abs(np.asarray(out) - np.asarray(ref))))

    print("KERNEL_OK")
</pallas_src>

<mosaic_0001>
module attributes {stable_mosaic.version = 11 : i64} {
  func.func @_localization64_kernel(%arg0: i32, %arg1: memref<1x4x1164xf32, #tpu.memory_space<vmem>>, %arg2: memref<8x16xf32, #tpu.memory_space<vmem>>, %arg3: memref<3x8x128xf32, #tpu.memory_space<vmem>>, %arg4: memref<3x8x1xf32, #tpu.memory_space<vmem>>, %arg5: memref<1052x332xf32, #tpu.memory_space<vmem>>, %arg6: memref<268x108xf32, #tpu.memory_space<vmem>>, %arg7: memref<68x44xf32, #tpu.memory_space<vmem>>, %arg8: memref<24x16xf32, #tpu.memory_space<vmem>>, %arg9: memref<1x8x16xf32, #tpu.memory_space<vmem>>) attributes {dimension_semantics = [#tpu.dimension_semantics<parallel>], iteration_bounds = array<i64: 2>, scalar_prefetch = 0 : i64, scratch_operands = 0 : i64, tpu.core_type = #tpu.core_type<tc>, window_params = [{transform_indices = @transform_0, window_bounds = array<i64: 1, 4, 1164>}, {pipeline_mode = #tpu.pipeline_mode<synchronous>, transform_indices = @transform_1, window_bounds = array<i64: 8, 16>}, {pipeline_mode = #tpu.pipeline_mode<synchronous>, transform_indices = @transform_2, window_bounds = array<i64: 3, 8, 128>}, {pipeline_mode = #tpu.pipeline_mode<synchronous>, transform_indices = @transform_3, window_bounds = array<i64: 3, 8, 1>}, {pipeline_mode = #tpu.pipeline_mode<synchronous>, transform_indices = @transform_4, window_bounds = array<i64: 1052, 332>}, {pipeline_mode = #tpu.pipeline_mode<synchronous>, transform_indices = @transform_5, window_bounds = array<i64: 268, 108>}, {pipeline_mode = #tpu.pipeline_mode<synchronous>, transform_indices = @transform_6, window_bounds = array<i64: 68, 44>}, {pipeline_mode = #tpu.pipeline_mode<synchronous>, transform_indices = @transform_7, window_bounds = array<i64: 24, 16>}, {transform_indices = @transform_8, window_bounds = array<i64: 1, 8, 16>}]} {
    %c0 = arith.constant 0 : index
    %c0_0 = arith.constant 0 : index
    %c0_1 = arith.constant 0 : index
    %0 = vector.load %arg1[%c0, %c0_0, %c0_1] : memref<1x4x1164xf32, #tpu.memory_space<vmem>>, vector<1x4x1164xf32>
    %1 = vector.shape_cast %0 : vector<1x4x1164xf32> to vector<4x1164xf32>
    %c0_2 = arith.constant 0 : index
    %c0_3 = arith.constant 0 : index
    %2 = vector.load %arg2[%c0_2, %c0_3] : memref<8x16xf32, #tpu.memory_space<vmem>>, vector<8x16xf32>
    %3 = vector.extract_strided_slice %1 {offsets = [3, 0], sizes = [1, 1088], strides = [1, 1]} : vector<4x1164xf32> to vector<1x1088xf32>
    %4 = vector.extract_strided_slice %1 {offsets = [2, 1], sizes = [1, 1088], strides = [1, 1]} : vector<4x1164xf32> to vector<1x1088xf32>
    %5 = vector.extract_strided_slice %1 {offsets = [3, 1], sizes = [1, 1088], strides = [1, 1]} : vector<4x1164xf32> to vector<1x1088xf32>
    %6 = vector.extract_strided_slice %1 {offsets = [2, 2], sizes = [1, 1088], strides = [1, 1]} : vector<4x1164xf32> to vector<1x1088xf32>
    %7 = vector.extract_strided_slice %1 {offsets = [1, 34], sizes = [1, 1088], strides = [1, 1]} : vector<4x1164xf32> to vector<1x1088xf32>
    %8 = vector.extract_strided_slice %1 {offsets = [0, 35], sizes = [1, 1088], strides = [1, 1]} : vector<4x1164xf32> to vector<1x1088xf32>
    %9 = vector.extract_strided_slice %1 {offsets = [1, 35], sizes = [1, 1088], strides = [1, 1]} : vector<4x1164xf32> to vector<1x1088xf32>
    %10 = vector.extract_strided_slice %1 {offsets = [0, 36], sizes = [1, 1088], strides = [1, 1]} : vector<4x1164xf32> to vector<1x1088xf32>
    %11 = vector.extract_strided_slice %1 {offsets = [3, 34], sizes = [1, 1088], strides = [1, 1]} : vector<4x1164xf32> to vector<1x1088xf32>
    %12 = vector.extract_strided_slice %1 {offsets = [2, 35], sizes = [1, 1088], strides = [1, 1]} : vector<4x1164xf32> to vector<1x1088xf32>
    %13 = vector.extract_strided_slice %1 {offsets = [3, 35], sizes = [1, 1088], strides = [1, 1]} : vector<4x1164xf32> to vector<1x1088xf32>
    %14 = vector.extract_strided_slice %1 {offsets = [2, 36], sizes = [1, 1088], strides = [1, 1]} : vector<4x1164xf32> to vector<1x1088xf32>
    %15 = vector.extract_strided_slice %1 {offsets = [1, 68], sizes = [1, 1088], strides = [1, 1]} : vector<4x1164xf32> to vector<1x1088xf32>
    %16 = vector.extract_strided_slice %1 {offsets = [0, 69], sizes = [1, 1088], strides = [1, 1]} : vector<4x1164xf32> to vector<1x1088xf32>
    %17 = vector.extract_strided_slice %1 {offsets = [1, 69], sizes = [1, 1088], strides = [1, 1]} : vector<4x1164xf32> to vector<1x1088xf32>
    %18 = vector.extract_strided_slice %1 {offsets = [0, 70], sizes = [1, 1088], strides = [1, 1]} : vector<4x1164xf32> to vector<1x1088xf32>
    %19 = tpu.concatenate %3, %4, %5, %6, %7, %8, %9, %10, %11, %12, %13, %14, %15, %16, %17, %18 in 0 : vector<1x1088xf32>, vector<1x1088xf32>, vector<1x1088xf32>, vector<1x1088xf32>, vector<1x1088xf32>, vector<1x1088xf32>, vector<1x1088xf32>, vector<1x1088xf32>, vector<1x1088xf32>, vector<1x1088xf32>, vector<1x1088xf32>, vector<1x1088xf32>, vector<1x1088xf32>, vector<1x1088xf32>, vector<1x1088xf32>, vector<1x1088xf32> -> vector<16x1088xf32>
    %cst = arith.constant dense<0.000000e+00> : vector<8x1088xf32>
    %20 = tpu.matmul %2, %19, %cst {dimension_numbers = #tpu.dot_dimension_numbers<[1], [0], [0], [1], [0, 0, 1, 1], [], []>} : vector<8x16xf32>, vector<16x1088xf32>, vector<8x1088xf32> -> vector<8x1088xf32>
    %cst_4 = arith.constant 0.000000e+00 : f32
    %21 = vector.broadcast %cst_4 : f32 to vector<8x1088xf32>
    %22 = arith.cmpf ogt, %20, %21 : vector<8x1088xf32>
    %cst_5 = arith.constant 2.000000e-01 : f32
    %23 = vector.broadcast %cst_5 : f32 to vector<8x1088xf32>
    %24 = arith.mulf %23, %20 : vector<8x1088xf32>
    %25 = arith.select %22, %20, %24 : vector<8x1088xi1>, vector<8x1088xf32>
    %c0_6 = arith.constant 0 : index
    %c0_7 = arith.constant 0 : index
    %26 = vector.load %arg5[%c0_6, %c0_7] : memref<1052x332xf32, #tpu.memory_space<vmem>>, vector<1052x332xf32>
    %27 = vector.extract_strided_slice %25 {offsets = [0, 0], sizes = [8, 1052], strides = [1, 1]} : vector<8x1088xf32> to vector<8x1052xf32>
    %28 = vector.extract_strided_slice %25 {offsets = [0, 1], sizes = [8, 1052], strides = [1, 1]} : vector<8x1088xf32> to vector<8x1052xf32>
    %29 = vector.extract_strided_slice %25 {offsets = [0, 34], sizes = [8, 1052], strides = [1, 1]} : vector<8x1088xf32> to vector<8x1052xf32>
    %30 = vector.extract_strided_slice %25 {offsets = [0, 35], sizes = [8, 1052], strides = [1, 1]} : vector<8x1088xf32> to vector<8x1052xf32>
    %31 = tpu.concatenate %27, %28, %29, %30 in 0 : vector<8x1052xf32>, vector<8x1052xf32>, vector<8x1052xf32>, vector<8x1052xf32> -> vector<32x1052xf32>
    %cst_8 = arith.constant dense<0.000000e+00> : vector<32x332xf32>
    %32 = tpu.matmul %31, %26, %cst_8 {dimension_numbers = #tpu.dot_dimension_numbers<[1], [0], [0], [1], [0, 0, 1, 1], [], []>} : vector<32x1052xf32>, vector<1052x332xf32>, vector<32x332xf32> -> vector<32x332xf32>
    %c0_9 = arith.constant 0 : index
    %c0_10 = arith.constant 0 : index
    %c0_11 = arith.constant 0 : index
    %33 = vector.load %arg3[%c0_9, %c0_10, %c0_11] : memref<3x8x128xf32, #tpu.memory_space<vmem>>, vector<1x8x128xf32>
    %34 = vector.shape_cast %33 : vector<1x8x128xf32> to vector<8x128xf32>
    %c0_12 = arith.constant 0 : index
    %c0_13 = arith.constant 0 : index
    %c0_14 = arith.constant 0 : index
    %35 = vector.load %arg4[%c0_12, %c0_13, %c0_14] : memref<3x8x1xf32, #tpu.memory_space<vmem>>, vector<1x8x1xf32>
    %36 = vector.shape_cast %35 : vector<1x8x1xf32> to vector<8x1xf32>
    %37 = vector.extract_strided_slice %32 {offsets = [24, 0], sizes = [8, 288], strides = [1, 1]} : vector<32x332xf32> to vector<8x288xf32>
    %38 = vector.extract_strided_slice %32 {offsets = [16, 1], sizes = [8, 288], strides = [1, 1]} : vector<32x332xf32> to vector<8x288xf32>
    %39 = vector.extract_strided_slice %32 {offsets = [24, 1], sizes = [8, 288], strides = [1, 1]} : vector<32x332xf32> to vector<8x288xf32>
    %40 = vector.extract_strided_slice %32 {offsets = [16, 2], sizes = [8, 288], strides = [1, 1]} : vector<32x332xf32> to vector<8x288xf32>
    %41 = vector.extract_strided_slice %32 {offsets = [8, 18], sizes = [8, 288], strides = [1, 1]} : vector<32x332xf32> to vector<8x288xf32>
    %42 = vector.extract_strided_slice %32 {offsets = [0, 19], sizes = [8, 288], strides = [1, 1]} : vector<32x332xf32> to vector<8x288xf32>
    %43 = vector.extract_strided_slice %32 {offsets = [8, 19], sizes = [8, 288], strides = [1, 1]} : vector<32x332xf32> to vector<8x288xf32>
    %44 = vector.extract_strided_slice %32 {offsets = [0, 20], sizes = [8, 288], strides = [1, 1]} : vector<32x332xf32> to vector<8x288xf32>
    %45 = vector.extract_strided_slice %32 {offsets = [24, 18], sizes = [8, 288], strides = [1, 1]} : vector<32x332xf32> to vector<8x288xf32>
    %46 = vector.extract_strided_slice %32 {offsets = [16, 19], sizes = [8, 288], strides = [1, 1]} : vector<32x332xf32> to vector<8x288xf32>
    %47 = vector.extract_strided_slice %32 {offsets = [24, 19], sizes = [8, 288], strides = [1, 1]} : vector<32x332xf32> to vector<8x288xf32>
    %48 = vector.extract_strided_slice %32 {offsets = [16, 20], sizes = [8, 288], strides = [1, 1]} : vector<32x332xf32> to vector<8x288xf32>
    %49 = vector.extract_strided_slice %32 {offsets = [8, 36], sizes = [8, 288], strides = [1, 1]} : vector<32x332xf32> to vector<8x288xf32>
    %50 = vector.extract_strided_slice %32 {offsets = [0, 37], sizes = [8, 288], strides = [1, 1]} : vector<32x332xf32> to vector<8x288xf32>
    %51 = vector.extract_strided_slice %32 {offsets = [8, 37], sizes = [8, 288], strides = [1, 1]} : vector<32x332xf32> to vector<8x288xf32>
    %52 = vector.extract_strided_slice %32 {offsets = [0, 38], sizes = [8, 288], strides = [1, 1]} : vector<32x332xf32> to vector<8x288xf32>
    %53 = tpu.concatenate %37, %38, %39, %40, %41, %42, %43, %44, %45, %46, %47, %48, %49, %50, %51, %52 in 0 : vector<8x288xf32>, vector<8x288xf32>, vector<8x288xf32>, vector<8x288xf32>, vector<8x288xf32>, vector<8x288xf32>, vector<8x288xf32>, vector<8x288xf32>, vector<8x288xf32>, vector<8x288xf32>, vector<8x288xf32>, vector<8x288xf32>, vector<8x288xf32>, vector<8x288xf32>, vector<8x288xf32>, vector<8x288xf32> -> vector<128x288xf32>
    %cst_15 = arith.constant dense<0.000000e+00> : vector<8x288xf32>
    %54 = tpu.matmul %34, %53, %cst_15 {dimension_numbers = #tpu.dot_dimension_numbers<[1], [0], [0], [1], [0, 0, 1, 1], [], []>} : vector<8x128xf32>, vector<128x288xf32>, vector<8x288xf32> -> vector<8x288xf32>
    %55 = vector.broadcast %36 : vector<8x1xf32> to vector<8x288xf32>
    %56 = arith.addf %54, %55 : vector<8x288xf32>
    %cst_16 = arith.constant 0.000000e+00 : f32
    %57 = vector.broadcast %cst_16 : f32 to vector<8x288xf32>
    %58 = arith.cmpf ogt, %56, %57 : vector<8x288xf32>
    %cst_17 = arith.constant 2.000000e-01 : f32
    %59 = vector.broadcast %cst_17 : f32 to vector<8x288xf32>
    %60 = arith.mulf %59, %56 : vector<8x288xf32>
    %61 = arith.select %58, %56, %60 : vector<8x288xi1>, vector<8x288xf32>
    %c0_18 = arith.constant 0 : index
    %c0_19 = arith.constant 0 : index
    %62 = vector.load %arg6[%c0_18, %c0_19] : memref<268x108xf32, #tpu.memory_space<vmem>>, vector<268x108xf32>
    %63 = vector.extract_strided_slice %61 {offsets = [0, 0], sizes = [8, 268], strides = [1, 1]} : vector<8x288xf32> to vector<8x268xf32>
    %64 = vector.extract_strided_slice %61 {offsets = [0, 1], sizes = [8, 268], strides = [1, 1]} : vector<8x288xf32> to vector<8x268xf32>
    %65 = vector.extract_strided_slice %61 {offsets = [0, 18], sizes = [8, 268], strides = [1, 1]} : vector<8x288xf32> to vector<8x268xf32>
    %66 = vector.extract_strided_slice %61 {offsets = [0, 19], sizes = [8, 268], strides = [1, 1]} : vector<8x288xf32> to vector<8x268xf32>
    %67 = tpu.concatenate %63, %64, %65, %66 in 0 : vector<8x268xf32>, vector<8x268xf32>, vector<8x268xf32>, vector<8x268xf32> -> vector<32x268xf32>
    %cst_20 = arith.constant dense<0.000000e+00> : vector<32x108xf32>
    %68 = tpu.matmul %67, %62, %cst_20 {dimension_numbers = #tpu.dot_dimension_numbers<[1], [0], [0], [1], [0, 0, 1, 1], [], []>} : vector<32x268xf32>, vector<268x108xf32>, vector<32x108xf32> -> vector<32x108xf32>
    %c1 = arith.constant 1 : index
    %c0_21 = arith.constant 0 : index
    %c0_22 = arith.constant 0 : index
    %69 = vector.load %arg3[%c1, %c0_21, %c0_22] : memref<3x8x128xf32, #tpu.memory_space<vmem>>, vector<1x8x128xf32>
    %70 = vector.shape_cast %69 : vector<1x8x128xf32> to vector<8x128xf32>
    %c1_23 = arith.constant 1 : index
    %c0_24 = arith.constant 0 : index
    %c0_25 = arith.constant 0 : index
    %71 = vector.load %arg4[%c1_23, %c0_24, %c0_25] : memref<3x8x1xf32, #tpu.memory_space<vmem>>, vector<1x8x1xf32>
    %72 = vector.shape_cast %71 : vector<1x8x1xf32> to vector<8x1xf32>
    %73 = vector.extract_strided_slice %68 {offsets = [24, 0], sizes = [8, 80], strides = [1, 1]} : vector<32x108xf32> to vector<8x80xf32>
    %74 = vector.extract_strided_slice %68 {offsets = [16, 1], sizes = [8, 80], strides = [1, 1]} : vector<32x108xf32> to vector<8x80xf32>
    %75 = vector.extract_strided_slice %68 {offsets = [24, 1], sizes = [8, 80], strides = [1, 1]} : vector<32x108xf32> to vector<8x80xf32>
    %76 = vector.extract_strided_slice %68 {offsets = [16, 2], sizes = [8, 80], strides = [1, 1]} : vector<32x108xf32> to vector<8x80xf32>
    %77 = vector.extract_strided_slice %68 {offsets = [8, 10], sizes = [8, 80], strides = [1, 1]} : vector<32x108xf32> to vector<8x80xf32>
    %78 = vector.extract_strided_slice %68 {offsets = [0, 11], sizes = [8, 80], strides = [1, 1]} : vector<32x108xf32> to vector<8x80xf32>
    %79 = vector.extract_strided_slice %68 {offsets = [8, 11], sizes = [8, 80], strides = [1, 1]} : vector<32x108xf32> to vector<8x80xf32>
    %80 = vector.extract_strided_slice %68 {offsets = [0, 12], sizes = [8, 80], strides = [1, 1]} : vector<32x108xf32> to vector<8x80xf32>
    %81 = vector.extract_strided_slice %68 {offsets = [24, 10], sizes = [8, 80], strides = [1, 1]} : vector<32x108xf32> to vector<8x80xf32>
    %82 = vector.extract_strided_slice %68 {offsets = [16, 11], sizes = [8, 80], strides = [1, 1]} : vector<32x108xf32> to vector<8x80xf32>
    %83 = vector.extract_strided_slice %68 {offsets = [24, 11], sizes = [8, 80], strides = [1, 1]} : vector<32x108xf32> to vector<8x80xf32>
    %84 = vector.extract_strided_slice %68 {offsets = [16, 12], sizes = [8, 80], strides = [1, 1]} : vector<32x108xf32> to vector<8x80xf32>
    %85 = vector.extract_strided_slice %68 {offsets = [8, 20], sizes = [8, 80], strides = [1, 1]} : vector<32x108xf32> to vector<8x80xf32>
    %86 = vector.extract_strided_slice %68 {offsets = [0, 21], sizes = [8, 80], strides = [1, 1]} : vector<32x108xf32> to vector<8x80xf32>
    %87 = vector.extract_strided_slice %68 {offsets = [8, 21], sizes = [8, 80], strides = [1, 1]} : vector<32x108xf32> to vector<8x80xf32>
    %88 = vector.extract_strided_slice %68 {offsets = [0, 22], sizes = [8, 80], strides = [1, 1]} : vector<32x108xf32> to vector<8x80xf32>
    %89 = tpu.concatenate %73, %74, %75, %76, %77, %78, %79, %80, %81, %82, %83, %84, %85, %86, %87, %88 in 0 : vector<8x80xf32>, vector<8x80xf32>, vector<8x80xf32>, vector<8x80xf32>, vector<8x80xf32>, vector<8x80xf32>, vector<8x80xf32>, vector<8x80xf32>, vector<8x80xf32>, vector<8x80xf32>, vector<8x80xf32>, vector<8x80xf32>, vector<8x80xf32>, vector<8x80xf32>, vector<8x80xf32>, vector<8x80xf32> -> vector<128x80xf32>
    %cst_26 = arith.constant dense<0.000000e+00> : vector<8x80xf32>
    %90 = tpu.matmul %70, %89, %cst_26 {dimension_numbers = #tpu.dot_dimension_numbers<[1], [0], [0], [1], [0, 0, 1, 1], [], []>} : vector<8x128xf32>, vector<128x80xf32>, vector<8x80xf32> -> vector<8x80xf32>
    %91 = vector.broadcast %72 : vector<8x1xf32> to vector<8x80xf32>
    %92 = arith.addf %90, %91 : vector<8x80xf32>
    %cst_27 = arith.constant 0.000000e+00 : f32
    %93 = vector.broadcast %cst_27 : f32 to vector<8x80xf32>
    %94 = arith.cmpf ogt, %92, %93 : vector<8x80xf32>
    %cst_28 = arith.constant 2.000000e-01 : f32
    %95 = vector.broadcast %cst_28 : f32 to vector<8x80xf32>
    %96 = arith.mulf %95, %92 : vector<8x80xf32>
    %97 = arith.select %94, %92, %96 : vector<8x80xi1>, vector<8x80xf32>
    %c0_29 = arith.constant 0 : index
    %c0_30 = arith.constant 0 : index
    %98 = vector.load %arg7[%c0_29, %c0_30] : memref<68x44xf32, #tpu.memory_space<vmem>>, vector<68x44xf32>
    %99 = vector.extract_strided_slice %97 {offsets = [0, 0], sizes = [8, 68], strides = [1, 1]} : vector<8x80xf32> to vector<8x68xf32>
    %100 = vector.extract_strided_slice %97 {offsets = [0, 1], sizes = [8, 68], strides = [1, 1]} : vector<8x80xf32> to vector<8x68xf32>
    %101 = vector.extract_strided_slice %97 {offsets = [0, 10], sizes = [8, 68], strides = [1, 1]} : vector<8x80xf32> to vector<8x68xf32>
    %102 = vector.extract_strided_slice %97 {offsets = [0, 11], sizes = [8, 68], strides = [1, 1]} : vector<8x80xf32> to vector<8x68xf32>
    %103 = tpu.concatenate %99, %100, %101, %102 in 0 : vector<8x68xf32>, vector<8x68xf32>, vector<8x68xf32>, vector<8x68xf32> -> vector<32x68xf32>
    %cst_31 = arith.constant dense<0.000000e+00> : vector<32x44xf32>
    %104 = tpu.matmul %103, %98, %cst_31 {dimension_numbers = #tpu.dot_dimension_numbers<[1], [0], [0], [1], [0, 0, 1, 1], [], []>} : vector<32x68xf32>, vector<68x44xf32>, vector<32x44xf32> -> vector<32x44xf32>
    %c2 = arith.constant 2 : index
    %c0_32 = arith.constant 0 : index
    %c0_33 = arith.constant 0 : index
    %105 = vector.load %arg3[%c2, %c0_32, %c0_33] : memref<3x8x128xf32, #tpu.memory_space<vmem>>, vector<1x8x128xf32>
    %106 = vector.shape_cast %105 : vector<1x8x128xf32> to vector<8x128xf32>
    %c2_34 = arith.constant 2 : index
    %c0_35 = arith.constant 0 : index
    %c0_36 = arith.constant 0 : index
    %107 = vector.load %arg4[%c2_34, %c0_35, %c0_36] : memref<3x8x1xf32, #tpu.memory_space<vmem>>, vector<1x8x1xf32>
    %108 = vector.shape_cast %107 : vector<1x8x1xf32> to vector<8x1xf32>
    %109 = vector.extract_strided_slice %104 {offsets = [24, 0], sizes = [8, 24], strides = [1, 1]} : vector<32x44xf32> to vector<8x24xf32>
    %110 = vector.extract_strided_slice %104 {offsets = [16, 1], sizes = [8, 24], strides = [1, 1]} : vector<32x44xf32> to vector<8x24xf32>
    %111 = vector.extract_strided_slice %104 {offsets = [24, 1], sizes = [8, 24], strides = [1, 1]} : vector<32x44xf32> to vector<8x24xf32>
    %112 = vector.extract_strided_slice %104 {offsets = [16, 2], sizes = [8, 24], strides = [1, 1]} : vector<32x44xf32> to vector<8x24xf32>
    %113 = vector.extract_strided_slice %104 {offsets = [8, 6], sizes = [8, 24], strides = [1, 1]} : vector<32x44xf32> to vector<8x24xf32>
    %114 = vector.extract_strided_slice %104 {offsets = [0, 7], sizes = [8, 24], strides = [1, 1]} : vector<32x44xf32> to vector<8x24xf32>
    %115 = vector.extract_strided_slice %104 {offsets = [8, 7], sizes = [8, 24], strides = [1, 1]} : vector<32x44xf32> to vector<8x24xf32>
    %116 = vector.extract_strided_slice %104 {offsets = [0, 8], sizes = [8, 24], strides = [1, 1]} : vector<32x44xf32> to vector<8x24xf32>
    %117 = vector.extract_strided_slice %104 {offsets = [24, 6], sizes = [8, 24], strides = [1, 1]} : vector<32x44xf32> to vector<8x24xf32>
    %118 = vector.extract_strided_slice %104 {offsets = [16, 7], sizes = [8, 24], strides = [1, 1]} : vector<32x44xf32> to vector<8x24xf32>
    %119 = vector.extract_strided_slice %104 {offsets = [24, 7], sizes = [8, 24], strides = [1, 1]} : vector<32x44xf32> to vector<8x24xf32>
    %120 = vector.extract_strided_slice %104 {offsets = [16, 8], sizes = [8, 24], strides = [1, 1]} : vector<32x44xf32> to vector<8x24xf32>
    %121 = vector.extract_strided_slice %104 {offsets = [8, 12], sizes = [8, 24], strides = [1, 1]} : vector<32x44xf32> to vector<8x24xf32>
    %122 = vector.extract_strided_slice %104 {offsets = [0, 13], sizes = [8, 24], strides = [1, 1]} : vector<32x44xf32> to vector<8x24xf32>
    %123 = vector.extract_strided_slice %104 {offsets = [8, 13], sizes = [8, 24], strides = [1, 1]} : vector<32x44xf32> to vector<8x24xf32>
    %124 = vector.extract_strided_slice %104 {offsets = [0, 14], sizes = [8, 24], strides = [1, 1]} : vector<32x44xf32> to vector<8x24xf32>
    %125 = tpu.concatenate %109, %110, %111, %112, %113, %114, %115, %116, %117, %118, %119, %120, %121, %122, %123, %124 in 0 : vector<8x24xf32>, vector<8x24xf32>, vector<8x24xf32>, vector<8x24xf32>, vector<8x24xf32>, vector<8x24xf32>, vector<8x24xf32>, vector<8x24xf32>, vector<8x24xf32>, vector<8x24xf32>, vector<8x24xf32>, vector<8x24xf32>, vector<8x24xf32>, vector<8x24xf32>, vector<8x24xf32>, vector<8x24xf32> -> vector<128x24xf32>
    %cst_37 = arith.constant dense<0.000000e+00> : vector<8x24xf32>
    %126 = tpu.matmul %106, %125, %cst_37 {dimension_numbers = #tpu.dot_dimension_numbers<[1], [0], [0], [1], [0, 0, 1, 1], [], []>} : vector<8x128xf32>, vector<128x24xf32>, vector<8x24xf32> -> vector<8x24xf32>
    %127 = vector.broadcast %108 : vector<8x1xf32> to vector<8x24xf32>
    %128 = arith.addf %126, %127 : vector<8x24xf32>
    %cst_38 = arith.constant 0.000000e+00 : f32
    %129 = vector.broadcast %cst_38 : f32 to vector<8x24xf32>
    %130 = arith.cmpf ogt, %128, %129 : vector<8x24xf32>
    %cst_39 = arith.constant 2.000000e-01 : f32
    %131 = vector.broadcast %cst_39 : f32 to vector<8x24xf32>
    %132 = arith.mulf %131, %128 : vector<8x24xf32>
    %133 = arith.select %130, %128, %132 : vector<8x24xi1>, vector<8x24xf32>
    %c0_40 = arith.constant 0 : index
    %c0_41 = arith.constant 0 : index
    %134 = vector.load %arg8[%c0_40, %c0_41] : memref<24x16xf32, #tpu.memory_space<vmem>>, vector<24x16xf32>
    %cst_42 = arith.constant dense<0.000000e+00> : vector<8x16xf32>
    %135 = tpu.matmul %133, %134, %cst_42 {dimension_numbers = #tpu.dot_dimension_numbers<[1], [0], [0], [1], [0, 0, 1, 1], [], []>} : vector<8x24xf32>, vector<24x16xf32>, vector<8x16xf32> -> vector<8x16xf32>
    %c0_43 = arith.constant 0 : index
    %c0_44 = arith.constant 0 : index
    %c0_45 = arith.constant 0 : index
    %136 = vector.load %arg9[%c0_43, %c0_44, %c0_45] : memref<1x8x16xf32, #tpu.memory_space<vmem>>, vector<1x8x16xf32>
    %137 = vector.shape_cast %136 : vector<1x8x16xf32> to vector<8x16xf32>
    %138 = vector.shape_cast %135 : vector<8x16xf32> to vector<1x8x16xf32>
    tpu.vector_store %arg9[%c0_43, %c0_44, %c0_45], %138 {strides = array<i32>} : memref<1x8x16xf32, #tpu.memory_space<vmem>>, vector<1x8x16xf32>,
    return
  }
  func.func @transform_0(%arg0: i32) -> (i32, i32, i32) {
    %c0_i32 = arith.constant 0 : i32
    %c0_i32_0 = arith.constant 0 : i32
    %c0_i32_1 = arith.constant 0 : i32
    return %arg0, %c0_i32, %c0_i32_0 : i32, i32, i32
  }
  func.func @transform_1(%arg0: i32) -> (i32, i32) {
    %c0_i32 = arith.constant 0 : i32
    %c0_i32_0 = arith.constant 0 : i32
    %c0_i32_1 = arith.constant 0 : i32
    return %c0_i32, %c0_i32_0 : i32, i32
  }
  func.func @transform_2(%arg0: i32) -> (i32, i32, i32) {
    %c0_i32 = arith.constant 0 : i32
    %c0_i32_0 = arith.constant 0 : i32
    %c0_i32_1 = arith.constant 0 : i32
    %c0_i32_2 = arith.constant 0 : i32
    return %c0_i32, %c0_i32_0, %c0_i32_1 : i32, i32, i32
  }
  func.func @transform_3(%arg0: i32) -> (i32, i32, i32) {
    %c0_i32 = arith.constant 0 : i32
    %c0_i32_0 = arith.constant 0 : i32
    %c0_i32_1 = arith.constant 0 : i32
    %c0_i32_2 = arith.constant 0 : i32
    return %c0_i32, %c0_i32_0, %c0_i32_1 : i32, i32, i32
  }
  func.func @transform_4(%arg0: i32) -> (i32, i32) {
    %c0_i32 = arith.constant 0 : i32
    %c0_i32_0 = arith.constant 0 : i32
    %c0_i32_1 = arith.constant 0 : i32
    return %c0_i32, %c0_i32_0 : i32, i32
  }
  func.func @transform_5(%arg0: i32) -> (i32, i32) {
    %c0_i32 = arith.constant 0 : i32
    %c0_i32_0 = arith.constant 0 : i32
    %c0_i32_1 = arith.constant 0 : i32
    return %c0_i32, %c0_i32_0 : i32, i32
  }
  func.func @transform_6(%arg0: i32) -> (i32, i32) {
    %c0_i32 = arith.constant 0 : i32
    %c0_i32_0 = arith.constant 0 : i32
    %c0_i32_1 = arith.constant 0 : i32
    return %c0_i32, %c0_i32_0 : i32, i32
  }
  func.func @transform_7(%arg0: i32) -> (i32, i32) {
    %c0_i32 = arith.constant 0 : i32
    %c0_i32_0 = arith.constant 0 : i32
    %c0_i32_1 = arith.constant 0 : i32
    return %c0_i32, %c0_i32_0 : i32, i32
  }
  func.func @transform_8(%arg0: i32) -> (i32, i32, i32) {
    %c0_i32 = arith.constant 0 : i32
    %c0_i32_0 = arith.constant 0 : i32
    %c0_i32_1 = arith.constant 0 : i32
    return %arg0, %c0_i32, %c0_i32_0 : i32, i32, i32
  }
}

</mosaic_0001>

<bundles_post_ra>
// kernel: localization64_forward.1
= control target key start
LH: loop header
LB: loop body
LE: loop exit
PB: predicated region body
PF: predicated region fallthrough
CT: control target
= control target key end

     0   :  { %s4718_s27 = smov 0   ;;  %s7597_s0 = inlined_call_operand.vmem [shape: f32[2,4,1164], index: 0, kind: input, shape index: {}]   ;;  %s7598_s1 = inlined_call_operand.vmem [shape: f32[8,16], index: 1, kind: input, shape index: {}]   ;;  %s7599_s2 = inlined_call_operand.vmem [shape: f32[3,8,128], index: 2, kind: input, shape index: {}]   ;;  %s7600_s3 = inlined_call_operand.vmem [shape: f32[3,8,1], index: 3, kind: input, shape index: {}]   ;;  %s7601_s4 = inlined_call_operand.vmem [shape: f32[1052,332], index: 4, kind: input, shape index: {}]   ;;  %s7602_s5 = inlined_call_operand.vmem [shape: f32[268,108], index: 5, kind: input, shape index: {}]   ;;  %s7603_s6 = inlined_call_operand.vmem [shape: f32[68,44], index: 6, kind: input, shape index: {}]   ;;  %s7604_s7 = inlined_call_operand.vmem [shape: f32[24,16], index: 7, kind: input, shape index: {}]   ;;  %s7605_s8 = inlined_call_operand.vmem [shape: f32[2,8,16], index: 8, kind: output, shape index: {}]  }
   0x1 LB: > { %s4028_s28 = sadd.s32 4294967295, %s4645_s27   ;;  %p4032_p0 = scmp.ge.s32.totalorder %s4645_s27, 1  ;;  %s4645_s27 = sphi %s4718_s27, %s18_s27  }
   0x2   : > { %p262_p1 = scmp.lt.s32.totalorder %s4645_s27, 3 }
   0x4   : > { %p263_p2 = pnand %p4032_p0, %p262_p1 }
   0x6   : > { %266 = sbr.rel (%p263_p2) target bundleno = 2881 (0xb41), region = 52 }
   0xb   : > { %p295_p3 = scmp.lt.s32.totalorder %s4028_s28, 1  ;;  %v315_v0 = vlaneseq  ;;  %s4647_s11 = smov 93   ;;  %v7606_v49 = vmov 0.0   ;;  %vm629_vm0 = vcmask 760832   ;;  %vm557_vm1 = vcmask 769024  }
   0xc   : > { %s4648_s12 = smov 94   ;;  %s4649_s13 = smov 127   ;;  %1222 = vmatprep.mubr.f32.mxu1 %v7606_v49  ;;  %4373 = vmatprep.subr.mxu0 %v7606_v49  ;;  %vm700_vm2 = vcmask 752640   ;;  %vm1021_vm3 = vcmask 1040384   ;;  %vm7622_vm4 = vcmask 490496   ;;  %vm1031_vm5 = vcmask 1041408  }
   0xd   : > { %s7656_s28 = smov (!%p295_p3, %s4028_s28), 1  ;;  %v316_v1 = vshrl.u32 %v315_v0, 7  ;;  %s4650_s14 = smov 92   ;;  %vm925_vm6 = vcmask 482304   ;;  %vm1041_vm7 = vcmask 1042432   ;;  %vm1051_vm8 = vcmask 1043456  }
   0xe   : > { %s4542_s29 = smul.u32 40, %s7656_s28  ;;  %s4651_s15 = smov 60   ;;  %vm1061_vm9 = vcmask 1044480   ;;  %vm1071_vm10 = vcmask 1045504   ;;  %vm7619_vm11 = vcmask 474112   ;;  %vm1081_vm12 = vcmask 1046528  }
   0xf   : > { %v4729_v2 = vsub.s32 6, %v316_v1  ;;  %v4731_v3 = vsub.s32 7, %v316_v1  ;;  %v4738_v4 = vsub.s32 2, %v316_v1  ;;  %v4740_v5 = vsub.s32 3, %v316_v1  ;;  %s4652_s16 = smov 126   ;;  %s4653_s17 = smov 59  }
  0x10   : > { %s4736_s10 = scalar_lea.vmem %s7597_s0, %s4542_s29  ;;  %v4786_v14 = vsub.s32 5, %v316_v1  ;;  %v4794_v16 = vsub.s32 1, %v316_v1  ;;  %v4824_v23 = vsub.s32 4, %v316_v1  ;;  %v4832_v26 = vsub.s32 0, %v316_v1  ;;  %s4654_s18 = smov 58  }
  0x11   : > { %v4743_v6 = vld [vmem:[%s4736_s10] sm:$0xff]  ;;  %v4746_v7 = vld [vmem:[%s4736_s10 + $0x8] sm:$0xff]  ;;  %v4804_v18 = vld [vmem:[%s4736_s10 + $0x10] sm:$0xff]  ;;  %vm414_vm13 = vcmask 1039360   ;;  %vm485_vm14 = vcmask 1031168   ;;  %vm1154_vm15 = vcmask 130048  }
  0x12   : > { %v367_v8 = vrot.slane %v4743_v6, %v4729_v2  ;;  %v4752_v9 = vrot.slane %v4743_v6, %v4731_v3  ;;  %v371_v10 = vrot.slane %v4746_v7, %v4738_v4  ;;  %v4761_v11 = vrot.slane %v4746_v7, %v4740_v5  ;;  %v4917_v44 = vld [vmem:[%s4736_s10 + $0x18] sm:$0xff]  ;;  %s4657_s9 = smov 90   ;;  %s4665_s30 = smov 116  }
  0x13   : > { %v363_v12 = vrot.slane %v4743_v6, %v4738_v4  ;;  %v4770_v13 = vrot.slane %v4743_v6, %v4740_v5  ;;  %v510_v15 = vrot.slane %v4743_v6, %v4786_v14  ;;  %v514_v17 = vrot.slane %v4746_v7, %v4794_v16  ;;  %s4668_s24 = smov 115   ;;  %s4669_s25 = smov 114  }
  0x14   : > { %755 = vrot.lane.b32.xlu1 %v367_v8, %s4647_s11  ;;  %720 = vrot.lane.b32.xlu0 %v4752_v9, %s4648_s12  ;;  %7623 = vst [vmem:[#allocation2_spill] sm:$0xff] %v4761_v11  ;;  %v4810_v19 = vrot.slane %v4804_v18, %v4740_v5  ;;  %v4814_v20 = vrot.slane %v4746_v7, %v4731_v3  ;;  %s4672_s26 = smov 122   ;;  %s4034_s19 = sshll.u32 %s7656_s28, 3 }
  0x15   : > { %v379_v21 = vrot.slane %v4804_v18, %v4738_v4  ;;  %v375_v22 = vrot.slane %v4746_v7, %v4729_v2  ;;  %v582_v24 = vrot.slane %v4743_v6, %v4824_v23  ;;  %v506_v25 = vrot.slane %v4743_v6, %v4794_v16  ;;  %s303_s22 = scalar_lea.vmem %s7605_s8, %s4034_s19 }
  0x16   : > { %7624 = vst [vmem:[#allocation3_spill] sm:$0xff] %v4810_v19  ;;  %7625 = vst [vmem:[#allocation4_spill] sm:$0xff] %v4814_v20  ;;  %v586_v27 = vrot.slane %v4746_v7, %v4832_v26  ;;  %v578_v28 = vrot.slane %v4743_v6, %v4832_v26  ;;  %v522_v29 = vrot.slane %v4804_v18, %v4794_v16 }
  0x17   : > { %v518_v30 = vrot.slane %v4746_v7, %v4786_v14  ;;  %v594_v33 = vrot.slane %v4804_v18, %v4832_v26  ;;  %v590_v34 = vrot.slane %v4746_v7, %v4824_v23  ;;  %v4914_v43 = vrot.slane %v4804_v18, %v4731_v3 }
  0x18   : > { %757 = vrot.lane.b32.xlu1 %v371_v10, %s4647_s11  ;;  %722 = vrot.lane.b32.xlu0 %v4761_v11, %s4648_s12  ;;  %v383_v47 = vrot.slane %v4804_v18, %v4729_v2  ;;  %v4930_v48 = vrot.slane %v4917_v44, %v4740_v5  ;;  %v387_v52 = vrot.slane %v4917_v44, %v4738_v4 }
  0x19   : > { %7626 = vst [vmem:[#allocation5_spill] sm:$0xff] %v4914_v43  ;;  %v526_v7 = vrot.slane %v4804_v18, %v4786_v14 }
  0x1a   : > { %7627 = vst [vmem:[#allocation6_spill] sm:$0xff] %v4930_v48 }
  0x1c   : > { %753 = vrot.lane.b32.xlu1 %v363_v12, %s4647_s11  ;;  %718 = vrot.lane.b32.xlu0 %v4770_v13, %s4648_s12 }
  0x20   : > { %792 = vrot.lane.b32.xlu1 %v4761_v11, %s4647_s11  ;;  %790 = vrot.lane.b32.xlu0 %v4752_v9, %s4647_s11 }
  0x24   : > { %400 = vrot.lane.b32.xlu1 %v371_v10, %s4649_s13  ;;  %398 = vrot.lane.b32.xlu0 %v367_v8, %s4649_s13 }
  0x28   : > { %825 = vrot.lane.b32.xlu1 %v367_v8, %s4650_s14  ;;  %788 = vrot.lane.b32.xlu0 %v4770_v13, %s4647_s11 }
  0x2c   : > { %396 = vrot.lane.b32.xlu1 %v363_v12, %s4649_s13  ;;  %827 = vrot.lane.b32.xlu0 %v371_v10, %s4650_s14 }
  0x30   : > { %436 = vrot.lane.b32.xlu1 %v4761_v11, %s4649_s13  ;;  %434 = vrot.lane.b32.xlu0 %v4752_v9, %s4649_s13 }
  0x34   : > { %864 = vrot.lane.b32.xlu1 %v510_v15, %s4651_s15  ;;  %823 = vrot.lane.b32.xlu0 %v363_v12, %s4650_s14 }
  0x38   : > { %432 = vrot.lane.b32.xlu1 %v4770_v13, %s4649_s13  ;;  %866 = vrot.lane.b32.xlu0 %v514_v17, %s4651_s15 }
  0x3c   : > { %471 = vrot.lane.b32.xlu1 %v371_v10, %s4652_s16  ;;  %469 = vrot.lane.b32.xlu0 %v367_v8, %s4652_s16 }
  0x40   : > { %726 = vrot.lane.b32.xlu1 %v4810_v19, %s4648_s12  ;;  %724 = vrot.lane.b32.xlu0 %v4814_v20, %s4648_s12 }
  0x44   : > { %761 = vrot.lane.b32.xlu1 %v379_v21, %s4647_s11  ;;  %759 = vrot.lane.b32.xlu0 %v375_v22, %s4647_s11 }
  0x48   : > { %907 = vrot.lane.b32.xlu1 %v582_v24, %s4653_s17  ;;  %862 = vrot.lane.b32.xlu0 %v506_v25, %s4651_s15 }
  0x4c   : > { %467 = vrot.lane.b32.xlu1 %v363_v12, %s4652_s16  ;;  %909 = vrot.lane.b32.xlu0 %v586_v27, %s4653_s17  ;;  %v530_v12 = vrot.slane %v4917_v44, %v4794_v16 }
  0x50   : > { %543 = vrot.lane.b32.xlu1 %v514_v17, %s4648_s12  ;;  %541 = vrot.lane.b32.xlu0 %v510_v15, %s4648_s12 }
  0x54   : > { %796 = vrot.lane.b32.xlu1 %v4810_v19, %s4647_s11  ;;  %794 = vrot.lane.b32.xlu0 %v4814_v20, %s4647_s11 }
  0x58   : > { %946 = vrot.lane.b32.xlu1 %v510_v15, %s4653_s17  ;;  %905 = vrot.lane.b32.xlu0 %v578_v28, %s4653_s17 }
  0x5c   : > { %402 = vrot.lane.b32.xlu1 %v375_v22, %s4649_s13  ;;  %948 = vrot.lane.b32.xlu0 %v514_v17, %s4653_s17 }
  0x60   : > { %539 = vrot.lane.b32.xlu1 %v506_v25, %s4648_s12  ;;  %404 = vrot.lane.b32.xlu0 %v379_v21, %s4649_s13 }
  0x64   : > { %615 = vrot.lane.b32.xlu1 %v586_v27, %s4647_s11  ;;  %613 = vrot.lane.b32.xlu0 %v582_v24, %s4647_s11 }
  0x68   : > { %831 = vrot.lane.b32.xlu1 %v379_v21, %s4650_s14  ;;  %829 = vrot.lane.b32.xlu0 %v375_v22, %s4650_s14 }
  0x6c   : > { %984 = vrot.lane.b32.xlu1 %v582_v24, %s4654_s18  ;;  %944 = vrot.lane.b32.xlu0 %v506_v25, %s4653_s17 }
  0x70   : > { %438 = vrot.lane.b32.xlu1 %v4814_v20, %s4649_s13  ;;  %986 = vrot.lane.b32.xlu0 %v586_v27, %s4654_s18 }
  0x74   : > { %611 = vrot.lane.b32.xlu1 %v578_v28, %s4647_s11  ;;  %440 = vrot.lane.b32.xlu0 %v4810_v19, %s4649_s13 }
  0x78   : > { %651 = vrot.lane.b32.xlu1 %v514_v17, %s4647_s11  ;;  %649 = vrot.lane.b32.xlu0 %v510_v15, %s4647_s11 }
  0x7c   : > { %870 = vrot.lane.b32.xlu1 %v522_v29, %s4651_s15  ;;  %868 = vrot.lane.b32.xlu0 %v518_v30, %s4651_s15 }
  0x80   : > { %473 = vrot.lane.b32.xlu1 %v375_v22, %s4652_s16  ;;  %982 = vrot.lane.b32.xlu0 %v578_v28, %s4654_s18 }
  0x84   : > { %647 = vrot.lane.b32.xlu1 %v506_v25, %s4647_s11  ;;  %475 = vrot.lane.b32.xlu0 %v379_v21, %s4652_s16  ;;  %v598_v21 = vrot.slane %v4804_v18, %v4824_v23  ;;  %v602_v25 = vrot.slane %v4917_v44, %v4832_v26 }
  0x86   : > { %v4878_v31 = vpop.permute.xlu1 %755  ;;  %v4880_v32 = vpop.permute.xlu0 %720 }
  0x88   : > { %686 = vrot.lane.b32.xlu1 %v586_v27, %s4650_s14  ;;  %684 = vrot.lane.b32.xlu0 %v582_v24, %s4650_s14 }
  0x8a   : > { %v4888_v35 = vpop.permute.xlu1 %757  ;;  %v4890_v36 = vpop.permute.xlu0 %722 }
  0x8b   : > { %v737_v19 = vsel %vm557_vm1, %v4880_v32, %v4890_v36 }
  0x8c   : > { %913 = vrot.lane.b32.xlu1 %v594_v33, %s4653_s17  ;;  %911 = vrot.lane.b32.xlu0 %v590_v34, %s4653_s17 }
  0x8e   : > { %v4894_v37 = vpop.permute.xlu1 %753  ;;  %v4896_v38 = vpop.permute.xlu0 %718 }
  0x90   : > { %547 = vrot.lane.b32.xlu1 %v522_v29, %s4648_s12  ;;  %545 = vrot.lane.b32.xlu0 %v518_v30, %s4648_s12 }
  0x92   : > { %v4900_v39 = vpop.permute.xlu1 %792  ;;  %v4902_v40 = vpop.permute.xlu0 %790 }
  0x94   : > { %950 = vrot.lane.b32.xlu1 %v518_v30, %s4653_s17  ;;  %682 = vrot.lane.b32.xlu0 %v578_v28, %s4650_s14 }
  0x96   : > { %v4906_v41 = vpop.permute.xlu1 %400  ;;  %v4908_v42 = vpop.permute.xlu0 %398 }
  0x98   : > { %617 = vrot.lane.b32.xlu1 %v590_v34, %s4647_s11  ;;  %952 = vrot.lane.b32.xlu0 %v522_v29, %s4653_s17 }
  0x9a   : > { %v4919_v45 = vpop.permute.xlu1 %825  ;;  %v4921_v46 = vpop.permute.xlu0 %788 }
  0x9c   : > { %728 = vrot.lane.b32.xlu1 %v4914_v43, %s4648_s12  ;;  %619 = vrot.lane.b32.xlu0 %v594_v33, %s4647_s11 }
  0x9e   : > { %v4934_v50 = vpop.permute.xlu1 %396  ;;  %v4936_v51 = vpop.permute.xlu0 %827 }
  0x9f   : > { %7628 = vst [vmem:[#allocation7_spill] sm:$0xff] %v4936_v51  ;;  %v842_v11 = vsel %vm700_vm2, %v4919_v45, %v4936_v51 }
  0xa0   : > { %763 = vrot.lane.b32.xlu1 %v383_v47, %s4647_s11  ;;  %730 = vrot.lane.b32.xlu0 %v4930_v48, %s4648_s12 }
  0xa2   : > { %v4943_v53 = vpop.permute.xlu1 %436  ;;  %v4945_v54 = vpop.permute.xlu0 %434 }
  0xa4   : > { %988 = vrot.lane.b32.xlu1 %v590_v34, %s4654_s18  ;;  %765 = vrot.lane.b32.xlu0 %v387_v52, %s4647_s11 }
  0xa6   : > { %v4949_v55 = vpop.permute.xlu1 %864  ;;  %v4951_v56 = vpop.permute.xlu0 %823 }
  0xa8   : > { %653 = vrot.lane.b32.xlu1 %v518_v30, %s4647_s11  ;;  %990 = vrot.lane.b32.xlu0 %v594_v33, %s4654_s18 }
  0xaa   : > { %v4955_v57 = vpop.permute.xlu1 %432  ;;  %v4957_v58 = vpop.permute.xlu0 %866 }
  0xac   : > { %798 = vrot.lane.b32.xlu1 %v4914_v43, %s4647_s11  ;;  %655 = vrot.lane.b32.xlu0 %v522_v29, %s4647_s11 }
  0xae   : > { %v4962_v59 = vpop.permute.xlu1 %471  ;;  %v4964_v60 = vpop.permute.xlu0 %469 }
  0xb0   : > { %406 = vrot.lane.b32.xlu1 %v383_v47, %s4649_s13  ;;  %800 = vrot.lane.b32.xlu0 %v4930_v48, %s4647_s11 }
  0xb2   : > { %v4969_v61 = vpop.permute.xlu1 %726  ;;  %v4971_v62 = vpop.permute.xlu0 %724 }
  0xb4   : > { %688 = vrot.lane.b32.xlu1 %v590_v34, %s4650_s14  ;;  %408 = vrot.lane.b32.xlu0 %v387_v52, %s4649_s13 }
  0xb6   : > { %v4975_v63 = vpop.permute.xlu1 %761  ;;  %v4977_v0 = vpop.permute.xlu0 %759 }
  0xb8   : > { %833 = vrot.lane.b32.xlu1 %v383_v47, %s4650_s14  ;;  %690 = vrot.lane.b32.xlu0 %v594_v33, %s4650_s14 }
  0xba   : > { %v4981_v1 = vpop.permute.xlu1 %907  ;;  %v4983_v6 = vpop.permute.xlu0 %862 }
  0xbc   : > { %442 = vrot.lane.b32.xlu1 %v4914_v43, %s4649_s13  ;;  %835 = vrot.lane.b32.xlu0 %v387_v52, %s4650_s14  ;;  %v807_v43 = vsel %vm629_vm0, %v4902_v40, %v4900_v39 }
  0xbe   : > { %v4990_v8 = vpop.permute.xlu1 %467  ;;  %v4992_v10 = vpop.permute.xlu0 %909 }
  0xbf   : > { %7629 = vst [vmem:[#allocation8_spill] sm:$0xff] %v4992_v10 }
  0xc0   : > { %872 = vrot.lane.b32.xlu1 %v526_v7, %s4651_s15  ;;  %444 = vrot.lane.b32.xlu0 %v4930_v48, %s4649_s13  ;;  %v772_v48 = vsel %vm629_vm0, %v4878_v31, %v4888_v35 }
  0xc1   : > { %v1092_v20 = vsel %vm1021_vm3, %v737_v19, %v772_v48  ;;  %v5073_v48 = vrot.slane %v4917_v44, %v4731_v3 }
  0xc2   : > { %v4999_v15 = vpop.permute.xlu1 %543  ;;  %v5001_v17 = vpop.permute.xlu0 %541 }
  0xc4   : > { %477 = vrot.lane.b32.xlu1 %v383_v47, %s4652_s16  ;;  %874 = vrot.lane.b32.xlu0 %v530_v12, %s4651_s15 }
  0xc6   : > { %v5007_v22 = vpop.permute.xlu1 %796  ;;  %v5009_v24 = vpop.permute.xlu0 %794 }
  0xc8   : > { %915 = vrot.lane.b32.xlu1 %v598_v21, %s4653_s17  ;;  %479 = vrot.lane.b32.xlu0 %v387_v52, %s4652_s16 }
  0xca   : > { %v5015_v27 = vpop.permute.xlu1 %946  ;;  %v5017_v28 = vpop.permute.xlu0 %905 }
  0xcc   : > { %549 = vrot.lane.b32.xlu1 %v526_v7, %s4648_s12  ;;  %917 = vrot.lane.b32.xlu0 %v602_v25, %s4653_s17 }
  0xce   : > { %v5021_v18 = vpop.permute.xlu1 %402  ;;  %v5023_v29 = vpop.permute.xlu0 %948 }
  0xcf   : > { %7630 = vst [vmem:[#allocation9_spill] sm:$0xff] %v5021_v18  ;;  %v884_v18 = vsel %vm7622_vm4, %v4949_v55, %v4957_v58  ;;  %v965_v19 = vsel %vm925_vm6, %v5015_v27, %v5023_v29 }
  0xd0   : > { %954 = vrot.lane.b32.xlu1 %v526_v7, %s4653_s17  ;;  %551 = vrot.lane.b32.xlu0 %v530_v12, %s4648_s12 }
  0xd2   : > { %v5027_v30 = vpop.permute.xlu1 %539  ;;  %v5029_v33 = vpop.permute.xlu0 %404 }
  0xd3   : > { %7631 = vst [vmem:[#allocation10_spill] sm:$0xff] %v5029_v33 }
  0xd4   : > { %621 = vrot.lane.b32.xlu1 %v598_v21, %s4647_s11  ;;  %956 = vrot.lane.b32.xlu0 %v530_v12, %s4653_s17 }
  0xd6   : > { %v5033_v34 = vpop.permute.xlu1 %615  ;;  %v5035_v47 = vpop.permute.xlu0 %613 }
  0xd8   : > { %992 = vrot.lane.b32.xlu1 %v598_v21, %s4654_s18  ;;  %623 = vrot.lane.b32.xlu0 %v602_v25, %s4647_s11 }
  0xda   : > { %v5039_v52 = vpop.permute.xlu1 %831  ;;  %v5041_v49 = vpop.permute.xlu0 %829 }
  0xdb   : > { %7632 = vst [vmem:[#allocation11_spill] sm:$0xff] %v5039_v52  ;;  %7633 = vst [vmem:[#allocation12_spill] sm:$0xff] %v5041_v49  ;;  %v1101_v52 = vsel %vm1031_vm5, %v1092_v20, %v807_v43  ;;  %v5077_v43 = vld [vmem:[%s4736_s10 + $0x20] sm:$0xff]  ;;  %s4658_s10 = smov 91  }
  0xdc   : > { %657 = vrot.lane.b32.xlu1 %v526_v7, %s4647_s11  ;;  %994 = vrot.lane.b32.xlu0 %v602_v25, %s4654_s18  ;;  %v927_v7 = vsel %vm925_vm6, %v4981_v1, %v4992_v10  ;;  %v1110_v51 = vsel %vm1041_vm7, %v1101_v52, %v842_v11 }
  0xdd   : > { %v1119_v20 = vsel %vm1051_vm8, %v1110_v51, %v884_v18  ;;  %v5093_v51 = vrot.slane %v4917_v44, %v4729_v2  ;;  %v5097_v18 = vrot.slane %v5077_v43, %v4740_v5  ;;  %v771_v5 = vsel %vm629_vm0, %v4894_v37, %v4878_v31 }
  0xde   : > { %v985_v33 = vpop.permute.xlu1 %984  ;;  %v945_v49 = vpop.permute.xlu0 %944  ;;  %v1128_v52 = vsel %vm1061_vm9, %v1119_v20, %v927_v7 }
  0xe0   : > { %692 = vrot.lane.b32.xlu1 %v598_v21, %s4650_s14  ;;  %659 = vrot.lane.b32.xlu0 %v530_v12, %s4647_s11  ;;  %v1137_v12 = vsel %vm1071_vm10, %v1128_v52, %v965_v19  ;;  %v736_v52 = vsel %vm557_vm1, %v4896_v38, %v4880_v32  ;;  %v883_v32 = vsel %vm7622_vm4, %v4983_v6, %v4949_v55 }
  0xe1   : > { %v1091_v31 = vsel %vm1021_vm3, %v736_v52, %v771_v5  ;;  %v487_v52 = vsel %vm485_vm14, %v4964_v60, %v4962_v59 }
  0xe2   : > { %v5079_v10 = vpop.permute.xlu1 %438  ;;  %v5081_v11 = vpop.permute.xlu0 %986 }
  0xe3   : > { %v1004_v21 = vsel %vm7619_vm11, %v985_v33, %v5081_v11 }
  0xe4   : > { %732 = vrot.lane.b32.xlu1 %v5073_v48, %s4648_s12  ;;  %694 = vrot.lane.b32.xlu0 %v602_v25, %s4650_s14  ;;  %v1146_v3 = vsel %vm1081_vm12, %v1137_v12, %v1004_v21  ;;  %v5109_v25 = vrot.slane %v5077_v43, %v4738_v4  ;;  %v806_v21 = vsel %vm629_vm0, %v4921_v46, %v4902_v40 }
  0xe5   : > { %1186 = vmatprep.subr.mxu1 %v1146_v3  ;;  %v841_v4 = vsel %vm700_vm2, %v4951_v56, %v4919_v45  ;;  %v1100_v40 = vsel %vm1031_vm5, %v1091_v31, %v806_v21  ;;  %v926_v46 = vsel %vm925_vm6, %v5017_v28, %v4981_v1  ;;  %v964_v45 = vsel %vm925_vm6, %v945_v49, %v5015_v27 }
  0xe6   : > { %v5099_v7 = vpop.permute.xlu1 %611  ;;  %v5101_v20 = vpop.permute.xlu0 %440  ;;  %v1109_v12 = vsel %vm1041_vm7, %v1100_v40, %v841_v4  ;;  %v416_v28 = vsel %vm414_vm13, %v4908_v42, %v4906_v41  ;;  %v451_v3 = vsel %vm414_vm13, %v4945_v54, %v4943_v53  ;;  %v559_v21 = vsel %vm557_vm1, %v5001_v17, %v4999_v15 }
  0xe7   : > { %v1118_v55 = vsel %vm1051_vm8, %v1109_v12, %v883_v32  ;;  %v631_v40 = vsel %vm629_vm0, %v5035_v47, %v5033_v34 }
  0xe8   : > { %767 = vrot.lane.b32.xlu1 %v5093_v51, %s4647_s11  ;;  %734 = vrot.lane.b32.xlu0 %v5097_v18, %s4648_s12  ;;  %v1127_v56 = vsel %vm1061_vm9, %v1118_v55, %v926_v46 }
  0xe9   : > { %v1136_v27 = vsel %vm1071_vm10, %v1127_v56, %v964_v45 }
  0xea   : > { %v5111_v2 = vpop.permute.xlu1 %651  ;;  %v5113_v19 = vpop.permute.xlu0 %649 }
  0xeb   : > { %v666_v12 = vsel %vm629_vm0, %v5113_v19, %v5111_v2 }
  0xec   : > { %802 = vrot.lane.b32.xlu1 %v5073_v48, %s4647_s11  ;;  %769 = vrot.lane.b32.xlu0 %v5109_v25, %s4647_s11 }
  0xee   : > { %v5135_v37 = vpop.permute.xlu1 %870  ;;  %v5137_v38 = vpop.permute.xlu0 %868 }
  0xf0   : > { %410 = vrot.lane.b32.xlu1 %v5093_v51, %s4649_s13  ;;  %804 = vrot.lane.b32.xlu0 %v5097_v18, %s4647_s11 }
  0xf2   : > { %v5152_v6 = vpop.permute.xlu1 %473  ;;  %v983_v1 = vpop.permute.xlu0 %982 }
  0xf3   : > { %v1003_v49 = vsel %vm7619_vm11, %v983_v1, %v985_v33  ;;  %v1023_v33 = vsel %vm1021_vm3, %v4752_v9, %v416_v28  ;;  %v5191_v9 = vrot.slane %v4917_v44, %v4786_v14 }
  0xf4   : > { %837 = vrot.lane.b32.xlu1 %v5093_v51, %s4650_s14  ;;  %412 = vrot.lane.b32.xlu0 %v5109_v25, %s4649_s13  ;;  %v1145_v5 = vsel %vm1081_vm12, %v1136_v27, %v1003_v49  ;;  %v1033_v32 = vsel %vm1031_vm5, %v1023_v33, %v451_v3  ;;  %v5207_v3 = vrot.slane %v5077_v43, %v4794_v16 }
  0xf5   : > { %1187 = vmatpush1.msra.mxu1 %v1145_v5  ;;  %v1043_v46 = vsel %vm1041_vm7, %v1033_v32, %v487_v52  ;;  %v415_v33 = vsel %vm414_vm13, %v4934_v50, %v4908_v42  ;;  %v5225_v16 = vrot.slane %v4917_v44, %v4824_v23  ;;  %v486_v32 = vsel %vm485_vm14, %v4990_v8, %v4964_v60 }
  0xf6   : > { %v648_v4 = vpop.permute.xlu1 %647  ;;  %v5175_v31 = vpop.permute.xlu0 %475  ;;  %v1053_v45 = vsel %vm1051_vm8, %v1043_v46, %v559_v21  ;;  %v450_v21 = vsel %vm414_vm13, %v4955_v57, %v4945_v54  ;;  %v1022_v42 = vsel %vm1021_vm3, %v4770_v13, %v415_v33  ;;  %v558_v50 = vsel %vm557_vm1, %v5027_v30, %v5001_v17 }
  0xf7   : > { %v1063_v55 = vsel %vm1061_vm9, %v1053_v45, %v631_v40  ;;  %v630_v44 = vsel %vm629_vm0, %v5099_v7, %v5035_v47  ;;  %v665_v60 = vsel %vm629_vm0, %v648_v4, %v5113_v19  ;;  %v5252_v13 = vrot.slane %v5077_v43, %v4832_v26  ;;  %v5261_v4 = vld [vmem:[%s7598_s1] sm:$0xff] }
  0xf8   : > { %446 = vrot.lane.b32.xlu1 %v5073_v48, %s4649_s13  ;;  %839 = vrot.lane.b32.xlu0 %v5109_v25, %s4650_s14  ;;  %v1073_v49 = vsel %vm1071_vm10, %v1063_v55, %v666_v12  ;;  %v7634_v12 = vmov 0.0   ;;  %v808_v33 = vsel %vm629_vm0, %v4900_v39, %v5009_v24  ;;  %v7636_v39 = vld [vmem:[#allocation12_spill] sm:$0xff] }
  0xfa   : > { %v5195_v56 = vpop.permute.xlu1 %686  ;;  %v685_v1 = vpop.permute.xlu0 %684 }
  0xfb   : > { %v702_v28 = vsel %vm700_vm2, %v685_v1, %v5195_v56 }
  0xfc   : > { %876 = vrot.lane.b32.xlu1 %v5191_v9, %s4651_s15  ;;  %448 = vrot.lane.b32.xlu0 %v5097_v18, %s4649_s13  ;;  %v1083_v27 = vsel %vm1081_vm12, %v1073_v49, %v702_v28  ;;  %v773_v49 = vsel %vm629_vm0, %v4888_v35, %v4977_v0  ;;  %v738_v35 = vsel %vm557_vm1, %v4890_v36, %v4971_v62 }
  0xfd   : > { %1188 = vmatprep.subr.mxu1 %v1083_v27  ;;  %v774_v27 = vsel %vm629_vm0, %v4977_v0, %v4975_v63  ;;  %v739_v0 = vsel %vm557_vm1, %v4971_v62, %v4969_v61  ;;  %v886_v36 = vsel %vm7622_vm4, %v5137_v38, %v5135_v37 }
  0xfe   : > { %v5209_v5 = vpop.permute.xlu1 %913  ;;  %v5211_v52 = vpop.permute.xlu0 %911 }
 0x100   : > { %481 = vrot.lane.b32.xlu1 %v5093_v51, %s4652_s16  ;;  %878 = vrot.lane.b32.xlu0 %v5207_v3, %s4651_s15  ;;  %v1032_v51 = vsel %vm1031_vm5, %v1022_v42, %v450_v21  ;;  %v809_v21 = vsel %vm629_vm0, %v5009_v24, %v5007_v22  ;;  %v1093_v24 = vsel %vm1021_vm3, %v738_v35, %v773_v49 }
 0x101   : > { %v1042_v40 = vsel %vm1041_vm7, %v1032_v51, %v486_v32  ;;  %v7635_v32 = vld [vmem:[#allocation11_spill] sm:$0xff]  ;;  %v1102_v62 = vsel %vm1031_vm5, %v1093_v24, %v808_v33 }
 0x102   : > { %v5235_v54 = vpop.permute.xlu1 %547  ;;  %v5237_v57 = vpop.permute.xlu0 %545  ;;  %v1052_v8 = vsel %vm1051_vm8, %v1042_v40, %v558_v50  ;;  %v844_v42 = vsel %vm700_vm2, %v7636_v39, %v7635_v32  ;;  %v1094_v50 = vsel %vm1021_vm3, %v739_v0, %v774_v27  ;;  %v7637_v51 = vld [vmem:[#allocation7_spill] sm:$0xff] }
 0x103   : > { %v1062_v17 = vsel %vm1061_vm9, %v1052_v8, %v630_v44  ;;  %v843_v44 = vsel %vm700_vm2, %v7637_v51, %v7636_v39  ;;  %v1103_v8 = vsel %vm1031_vm5, %v1094_v50, %v809_v21 }
 0x104   : > { %919 = vrot.lane.b32.xlu1 %v5225_v16, %s4653_s17  ;;  %483 = vrot.lane.b32.xlu0 %v5109_v25, %s4652_s16  ;;  %v1072_v19 = vsel %vm1071_vm10, %v1062_v17, %v665_v60  ;;  %v885_v17 = vsel %vm7622_vm4, %v4957_v58, %v5137_v38  ;;  %v1111_v58 = vsel %vm1041_vm7, %v1102_v62, %v843_v44  ;;  %v7639_v44 = vld [vmem:[#allocation10_spill] sm:$0xff] }
 0x105   : > { %v1120_v33 = vsel %vm1051_vm8, %v1111_v58, %v885_v17 }
 0x106   : > { %v951_v30 = vpop.permute.xlu1 %950  ;;  %v683_v47 = vpop.permute.xlu0 %682 }
 0x107   : > { %v701_v7 = vsel %vm700_vm2, %v683_v47, %v685_v1  ;;  %v929_v47 = vsel %vm925_vm6, %v5211_v52, %v5209_v5  ;;  %v966_v27 = vsel %vm925_vm6, %v5023_v29, %v951_v30 }
 0x108   : > { %553 = vrot.lane.b32.xlu1 %v5191_v9, %s4648_s12  ;;  %921 = vrot.lane.b32.xlu0 %v5252_v13, %s4653_s17  ;;  %v1082_v26 = vsel %vm1081_vm12, %v1072_v19, %v701_v7  ;;  %v1112_v7 = vsel %vm1041_vm7, %v1103_v8, %v844_v42  ;;  %v7638_v19 = vld [vmem:[#allocation8_spill] sm:$0xff] }
 0x109   : > { %1189 = vmatpush1.msra.mxu1 %v1082_v26  ;;  %v928_v26 = vsel %vm925_vm6, %v7638_v19, %v5211_v52  ;;  %v1121_v38 = vsel %vm1051_vm8, %v1112_v7, %v886_v36  ;;  %v7640_v36 = vld [vmem:[#allocation9_spill] sm:$0xff]  ;;  %v7641_v8 = vld [vmem:[#allocation4_spill] sm:$0xff] }
 0x10a   : > { %v5268_v25 = vpop.permute.xlu1 %617  ;;  %v5270_v46 = vpop.permute.xlu0 %952  ;;  %4035 = vmatmul.mubr.msk.f32.vlgmr.msra.gmra.mxu1 %vm1154_vm15, %v5261_v4  ;;  %v1130_v52 = vsel %vm1061_vm9, %v1121_v38, %v929_v47  ;;  %v417_v62 = vsel %vm414_vm13, %v4906_v41, %v7640_v36  ;;  %v488_v41 = vsel %vm485_vm14, %v4962_v59, %v5152_v6  ;;  %v561_v47 = vsel %vm557_vm1, %v5237_v57, %v5235_v54 }
 0x10b   : > { %1293 = vmatprep.mubr.f32.mxu1 %v7634_v12  ;;  %v967_v49 = vsel %vm925_vm6, %v951_v30, %v5270_v46  ;;  %v861_v30 = vrot.slane %v5077_v43, %v4786_v14  ;;  %v632_v38 = vsel %vm629_vm0, %v5033_v34, %v5268_v25 }
 0x10c   : > { %958 = vrot.lane.b32.xlu1 %v5191_v9, %s4653_s17  ;;  %555 = vrot.lane.b32.xlu0 %v5207_v3, %s4648_s12  ;;  %v1139_v42 = vsel %vm1071_vm10, %v1130_v52, %v967_v49  ;;  %v560_v49 = vsel %vm557_vm1, %v4999_v15, %v5237_v57 }
 0x10e   : > { %v5279_v45 = vpop.permute.xlu1 %728  ;;  %v5281_v55 = vpop.permute.xlu0 %619 }
 0x10f   : > { %v633_v59 = vsel %vm629_vm0, %v5268_v25, %v5281_v55 }
 0x110   : > { %625 = vrot.lane.b32.xlu1 %v5225_v16, %s4647_s11  ;;  %960 = vrot.lane.b32.xlu0 %v5207_v3, %s4653_s17 }
 0x112   : > { %v5287_v1 = vpop.permute.xlu1 %763  ;;  %v5289_v28 = vpop.permute.xlu0 %730 }
 0x114   : > { %996 = vrot.lane.b32.xlu1 %v5225_v16, %s4654_s18  ;;  %627 = vrot.lane.b32.xlu0 %v5252_v13, %s4647_s11 }
 0x116   : > { %v989_v40 = vpop.permute.xlu1 %988  ;;  %v5324_v60 = vpop.permute.xlu0 %765 }
 0x117   : > { %v1005_v21 = vsel %vm7619_vm11, %v5081_v11, %v989_v40 }
 0x118   : > { %661 = vrot.lane.b32.xlu1 %v5191_v9, %s4647_s11  ;;  %998 = vrot.lane.b32.xlu0 %v5252_v13, %s4654_s18  ;;  %v1129_v9 = vsel %vm1061_vm9, %v1120_v33, %v928_v26  ;;  %v7642_v26 = vld [vmem:[#allocation2_spill] sm:$0xff] }
 0x119   : > { %v1138_v11 = vsel %vm1071_vm10, %v1129_v9, %v966_v27 }
 0x11a   : > { %v654_v35 = vpop.permute.xlu1 %653  ;;  %v5352_v0 = vpop.permute.xlu0 %990  ;;  %v1147_v24 = vsel %vm1081_vm12, %v1138_v11, %v1005_v21 }
 0x11b   : > { %v1006_v39 = vsel %vm7619_vm11, %v989_v40, %v5352_v0  ;;  %vm7620_vm11 = vmmov 0   ;;  %v418_v40 = vsel %vm414_vm13, %v7640_v36, %v7639_v44  ;;  %v667_v57 = vsel %vm629_vm0, %v5111_v2, %v654_v35 }
 0x11c   : > { %696 = vrot.lane.b32.xlu1 %v5225_v16, %s4650_s14  ;;  %663 = vrot.lane.b32.xlu0 %v5207_v3, %s4647_s11  ;;  %v1148_v29 = vsel %vm1081_vm12, %v1139_v42, %v1006_v39  ;;  %v904_v3 = vrot.slane %v5077_v43, %v4824_v23  ;;  %v453_v23 = vsel %vm414_vm13, %v5079_v10, %v5101_v20 }
 0x11d   : > { %1257 = vmatprep.subr.mxu1 %v1148_v29  ;;  %4377 = vmatprep.mubr.msk.f32.mxu0 %vm7620_vm11, %v7634_v12  ;;  %v452_v43 = vsel %vm414_vm13, %v4943_v53, %v5079_v10  ;;  %v1025_v17 = vsel %vm1021_vm3, %v7641_v8, %v418_v40  ;;  %v1024_v53 = vsel %vm1021_vm3, %v7642_v26, %v417_v62  ;;  %vm7643_vm11 = vcmask 474112  }
 0x11e   : > { %v5367_v50 = vpop.permute.xlu1 %798  ;;  %1258 = vmatpush1.msra.mxu1 %v1147_v24  ;;  %v5369_v51 = vpop.permute.xlu0 %655  ;;  %v1035_v10 = vsel %vm1031_vm5, %v1025_v17, %v453_v23  ;;  %v775_v26 = vsel %vm629_vm0, %v4975_v63, %v5287_v1 }
 0x11f   : > { %v668_v27 = vsel %vm629_vm0, %v654_v35, %v5369_v51 }
 0x120   : > { %880 = vrot.lane.b32.xlu1 %v861_v30, %s4651_s15  ;;  %698 = vrot.lane.b32.xlu0 %v5252_v13, %s4650_s14  ;;  %v489_v13 = vsel %vm485_vm14, %v5152_v6, %v5175_v31  ;;  %v1034_v6 = vsel %vm1031_vm5, %v1024_v53, %v452_v43  ;;  %s4659_s15 = smov 108  }
 0x121   : > { %v1045_v58 = vsel %vm1041_vm7, %v1035_v10, %v489_v13  ;;  %v1044_v33 = vsel %vm1041_vm7, %v1034_v6, %v488_v41  ;;  %v741_v10 = vsel %vm557_vm1, %v5279_v45, %v5289_v28  ;;  %v740_v6 = vsel %vm557_vm1, %v4969_v61, %v5279_v45 }
 0x122   : > { %v5378_v14 = vpop.permute.xlu1 %406  ;;  %v5380_v16 = vpop.permute.xlu0 %800  ;;  %v1055_v15 = vsel %vm1051_vm8, %v1045_v58, %v561_v47  ;;  %v1054_v52 = vsel %vm1051_vm8, %v1044_v33, %v560_v49  ;;  %v810_v49 = vsel %vm629_vm0, %v5007_v22, %v5367_v50  ;;  %v1095_v22 = vsel %vm1021_vm3, %v740_v6, %v775_v26 }
 0x123   : > { %v1065_v21 = vsel %vm1061_vm9, %v1055_v15, %v633_v59  ;;  %v1064_v39 = vsel %vm1061_vm9, %v1054_v52, %v632_v38  ;;  %v811_v53 = vsel %vm629_vm0, %v5367_v50, %v5380_v16  ;;  %v1104_v45 = vsel %vm1031_vm5, %v1095_v22, %v810_v49 }
 0x124   : > { %962 = vrot.lane.b32.xlu1 %v861_v30, %s4653_s17  ;;  %923 = vrot.lane.b32.xlu0 %v904_v3, %s4653_s17  ;;  %v1075_v29 = vsel %vm1071_vm10, %v1065_v21, %v668_v27  ;;  %v1074_v2 = vsel %vm1071_vm10, %v1064_v39, %v667_v57  ;;  %s4660_s17 = smov 109  }
 0x126   : > { %v689_v7 = vpop.permute.xlu1 %688  ;;  %v5407_v19 = vpop.permute.xlu0 %408 }
 0x127   : > { %v703_v9 = vsel %vm700_vm2, %v5195_v56, %v689_v7 }
 0x128   : > { %1000 = vrot.lane.b32.xlu0 %v904_v3, %s4654_s18  ;;  %v1084_v35 = vsel %vm1081_vm12, %v1074_v2, %v703_v9  ;;  %s4661_s18 = smov 110  }
 0x12a   : > { %v834_v34 = vpop.permute.xlu1 %833  ;;  %v5434_v25 = vpop.permute.xlu0 %690 }
 0x12b   : > { %v704_v42 = vsel %vm700_vm2, %v689_v7, %v5434_v25  ;;  %v776_v7 = vsel %vm629_vm0, %v5287_v1, %v5324_v60  ;;  %v845_v1 = vsel %vm700_vm2, %v7635_v32, %v834_v34 }
 0x12c   : > { %v1085_v11 = vsel %vm1081_vm12, %v1075_v29, %v704_v42  ;;  %v1096_v63 = vsel %vm1021_vm3, %v741_v10, %v776_v7  ;;  %v1113_v52 = vsel %vm1041_vm7, %v1104_v45, %v845_v1 }
 0x12d   : > { %1259 = vmatprep.subr.mxu1 %v1085_v11  ;;  %v1105_v50 = vsel %vm1031_vm5, %v1096_v63, %v811_v53  ;;  %v7645_v53 = vld [vmem:[#allocation5_spill] sm:$0xff] }
 0x12e   : > { %v443_v30 = vpop.permute.xlu1 %442  ;;  %1260 = vmatpush1.msra.mxu1 %v1084_v35  ;;  %v5443_v56 = vpop.permute.xlu0 %835  ;;  %v419_v35 = vsel %vm414_vm13, %v7639_v44, %v5378_v14 }
 0x12f   : > { %4036 = vmatmul.mubr.msk.f32.vlgmr.msra.gmra.mxu1 %vm1154_vm15, %v5261_v4  ;;  %v846_v59 = vsel %vm700_vm2, %v834_v34, %v5443_v56 }
 0x130   : > { %1364 = vmatprep.mubr.f32.mxu1 %v7634_v12  ;;  %v1114_v32 = vsel %vm1041_vm7, %v1105_v50, %v846_v59 }
 0x132   : > { %v873_v24 = vpop.permute.xlu1 %872  ;;  %v5448_v3 = vpop.permute.xlu0 %444 }
 0x133   : > { %v887_v33 = vsel %vm7622_vm4, %v5135_v37, %v873_v24 }
 0x134   : > { %v1122_v9 = vsel %vm1051_vm8, %v1113_v52, %v887_v33 }
 0x136   : > { %v478_v36 = vpop.permute.xlu1 %477  ;;  %v5450_v40 = vpop.permute.xlu0 %874 }
 0x137   : > { %v888_v58 = vsel %vm7622_vm4, %v873_v24, %v5450_v40  ;;  %vm7644_vm4 = vmmov %vm7643_vm11 }
 0x138   : > { %v1123_v21 = vsel %vm1051_vm8, %v1114_v32, %v888_v58 }
 0x13a   : > { %v916_v62 = vpop.permute.xlu1 %915  ;;  %v5452_v23 = vpop.permute.xlu0 %479 }
 0x13b   : > { %v930_v15 = vsel %vm925_vm6, %v5209_v5, %v916_v62  ;;  %v420_v5 = vsel %vm414_vm13, %v5378_v14, %v5407_v19  ;;  %v491_v7 = vsel %vm485_vm14, %v478_v36, %v5452_v23  ;;  %v490_v14 = vsel %vm485_vm14, %v5175_v31, %v478_v36 }
 0x13c   : > { %v1131_v11 = vsel %vm1061_vm9, %v1122_v9, %v930_v15  ;;  %v1027_v10 = vsel %vm1021_vm3, %v7645_v53, %v420_v5 }
 0x13e   : > { %v550_v43 = vpop.permute.xlu1 %549  ;;  %v5454_v13 = vpop.permute.xlu0 %917 }
 0x13f   : > { %v931_v61 = vsel %vm925_vm6, %v916_v62, %v5454_v13  ;;  %v562_v63 = vsel %vm557_vm1, %v5235_v54, %v550_v43 }
 0x140   : > { %v1132_v34 = vsel %vm1061_vm9, %v1123_v21, %v931_v61 }
 0x142   : > { %v955_v8 = vpop.permute.xlu1 %954  ;;  %v5456_v17 = vpop.permute.xlu0 %551 }
 0x143   : > { %v968_v37 = vsel %vm925_vm6, %v5270_v46, %v955_v8  ;;  %v563_v44 = vsel %vm557_vm1, %v550_v43, %v5456_v17 }
 0x144   : > { %v1140_v62 = vsel %vm1071_vm10, %v1131_v11, %v968_v37 }
 0x146   : > { %v622_v41 = vpop.permute.xlu1 %621  ;;  %v5458_v47 = vpop.permute.xlu0 %956 }
 0x147   : > { %v969_v57 = vsel %vm925_vm6, %v955_v8, %v5458_v47  ;;  %v454_v8 = vsel %vm414_vm13, %v5101_v20, %v443_v30  ;;  %v7646_v20 = vld [vmem:[#allocation3_spill] sm:$0xff]  ;;  %v634_v58 = vsel %vm629_vm0, %v5281_v55, %v622_v41 }
 0x148   : > { %v1141_v46 = vsel %vm1071_vm10, %v1132_v34, %v969_v57 }
 0x14a   : > { %v993_v38 = vpop.permute.xlu1 %992  ;;  %v5485_v27 = vpop.permute.xlu0 %623 }
 0x14b   : > { %v1007_v39 = vsel %vm7643_vm11, %v5352_v0, %v993_v38  ;;  %v455_v0 = vsel %vm414_vm13, %v443_v30, %v5448_v3  ;;  %v1026_v30 = vsel %vm1021_vm3, %v7646_v20, %v419_v35  ;;  %v635_v1 = vsel %vm629_vm0, %v622_v41, %v5485_v27 }
 0x14c   : > { %v1149_v26 = vsel %vm1081_vm12, %v1140_v62, %v1007_v39  ;;  %v1037_v6 = vsel %vm1031_vm5, %v1027_v10, %v455_v0  ;;  %v1036_v31 = vsel %vm1031_vm5, %v1026_v30, %v454_v8 }
 0x14d   : > { %v1047_v36 = vsel %vm1041_vm7, %v1037_v6, %v491_v7  ;;  %v1046_v22 = vsel %vm1041_vm7, %v1036_v31, %v490_v14 }
 0x14e   : > { %v658_v42 = vpop.permute.xlu1 %657  ;;  %v5507_v29 = vpop.permute.xlu0 %994  ;;  %v1057_v50 = vsel %vm1051_vm8, %v1047_v36, %v563_v44  ;;  %v1056_v43 = vsel %vm1051_vm8, %v1046_v22, %v562_v63 }
 0x14f   : > { %v1008_v2 = vsel %vm7644_vm4, %v993_v38, %v5507_v29  ;;  %v669_v54 = vsel %vm629_vm0, %v5369_v51, %v658_v42  ;;  %v1067_v33 = vsel %vm1061_vm9, %v1057_v50, %v635_v1  ;;  %v1066_v55 = vsel %vm1061_vm9, %v1056_v43, %v634_v58 }
 0x150   : > { %v1150_v24 = vsel %vm1081_vm12, %v1141_v46, %v1008_v2  ;;  %v1076_v51 = vsel %vm1071_vm10, %v1066_v55, %v669_v54  ;;  %vm7647_vm4 = vcmask 490496  }
 0x151   : > { %1328 = vmatprep.subr.mxu1 %v1150_v24  ;;  %vm7648_vm11 = vmmov %vm7647_vm4 }
 0x152   : > { %v693_v49 = vpop.permute.xlu1 %692  ;;  %1329 = vmatpush1.msra.mxu1 %v1149_v26  ;;  %v5534_v59 = vpop.permute.xlu0 %659 }
 0x153   : > { %v670_v38 = vsel %vm629_vm0, %v658_v42, %v5534_v59  ;;  %v705_v61 = vsel %vm700_vm2, %v5434_v25, %v693_v49 }
 0x154   : > { %v1077_v15 = vsel %vm1071_vm10, %v1067_v33, %v670_v38  ;;  %v1086_v52 = vsel %vm1081_vm12, %v1076_v51, %v705_v61 }
 0x156   : > { %v733_v45 = vpop.permute.xlu1 %732  ;;  %v5557_v32 = vpop.permute.xlu0 %694 }
 0x157   : > { %v706_v41 = vsel %vm700_vm2, %v693_v49, %v5557_v32  ;;  %v742_v31 = vsel %vm557_vm1, %v5289_v28, %v733_v45 }
 0x158   : > { %v1087_v57 = vsel %vm1081_vm12, %v1077_v15, %v706_v41 }
 0x159   : > { %1330 = vmatprep.subr.mxu1 %v1087_v57 }
 0x15a   : > { %v768_v21 = vpop.permute.xlu1 %767  ;;  %1331 = vmatpush1.msra.mxu1 %v1086_v52  ;;  %v5566_v25 = vpop.permute.xlu0 %734 }
 0x15b   : > { %4037 = vmatmul.mubr.msk.f32.vlgmr.msra.gmra.mxu1 %vm1154_vm15, %v5261_v4  ;;  %v777_v20 = vsel %vm629_vm0, %v5324_v60, %v768_v21  ;;  %v743_v6 = vsel %vm557_vm1, %v733_v45, %v5566_v25 }
 0x15c   : > { %1435 = vmatprep.mubr.f32.mxu1 %v7634_v12  ;;  %v1097_v50 = vsel %vm1021_vm3, %v742_v31, %v777_v20 }
 0x15e   : > { %v803_v37 = vpop.permute.xlu1 %802  ;;  %v5571_v9 = vpop.permute.xlu0 %769 }
 0x15f   : > { %v778_v49 = vsel %vm629_vm0, %v768_v21, %v5571_v9  ;;  %v812_v63 = vsel %vm629_vm0, %v5380_v16, %v803_v37 }
 0x160   : > { %v1098_v36 = vsel %vm1021_vm3, %v743_v6, %v778_v49  ;;  %v1106_v43 = vsel %vm1031_vm5, %v1097_v50, %v812_v63 }
 0x162   : > { %v411_v34 = vpop.permute.xlu1 %410  ;;  %v5573_v39 = vpop.permute.xlu0 %804 }
 0x163   : > { %v813_v30 = vsel %vm629_vm0, %v803_v37, %v5573_v39 }
 0x164   : > { %v1107_v16 = vsel %vm1031_vm5, %v1098_v36, %v813_v30 }
 0x166   : > { %v838_v42 = vpop.permute.xlu1 %837  ;;  %v5575_v5 = vpop.permute.xlu0 %412 }
 0x167   : > { %v847_v60 = vsel %vm700_vm2, %v5443_v56, %v838_v42 }
 0x168   : > { %v1115_v45 = vsel %vm1041_vm7, %v1106_v43, %v847_v60 }
 0x16a   : > { %v447_v11 = vpop.permute.xlu1 %446  ;;  %v5577_v2 = vpop.permute.xlu0 %839 }
 0x16b   : > { %v848_v1 = vsel %vm700_vm2, %v838_v42, %v5577_v2  ;;  %v421_v42 = vsel %vm414_vm13, %v5407_v19, %v411_v34 }
 0x16c   : > { %v1116_v56 = vsel %vm1041_vm7, %v1107_v16, %v848_v1  ;;  %v7651_v1 = vld [vmem:[#allocation6_spill] sm:$0xff] }
 0x16e   : > { %v877_v46 = vpop.permute.xlu1 %876  ;;  %v5579_v35 = vpop.permute.xlu0 %448 }
 0x16f   : > { %v889_v54 = vsel %vm7648_vm11, %v5450_v40, %v877_v46 }
 0x170   : > { %v1124_v41 = vsel %vm1051_vm8, %v1115_v45, %v889_v54 }
 0x172   : > { %v482_v0 = vpop.permute.xlu1 %481  ;;  %v5581_v24 = vpop.permute.xlu0 %878 }
 0x173   : > { %v890_v58 = vsel %vm7647_vm4, %v877_v46, %v5581_v24  ;;  %vm7649_vm4 = vcmask 474112   ;;  %v457_v46 = vsel %vm414_vm13, %v447_v11, %v5579_v35  ;;  %v492_v19 = vsel %vm485_vm14, %v5452_v23, %v482_v0 }
 0x174   : > { %v1125_v55 = vsel %vm1051_vm8, %v1116_v56, %v890_v58  ;;  %vm7650_vm11 = vmmov %vm7649_vm4  ;;  %v1099_v56 = vsel %vm1021_vm3, %v5566_v25, %v5571_v9  ;;  %v1584_v25 = vld [vmem:[%s7601_s4 + $0x168] sm:$0xff] }
 0x175   : > { %v1108_v45 = vsel %vm1031_vm5, %v1099_v56, %v5573_v39  ;;  %v1551_v56 = vld [vmem:[%s7601_s4 + $0x60] sm:$0xff] }
 0x176   : > { %v920_v62 = vpop.permute.xlu1 %919  ;;  %v5583_v8 = vpop.permute.xlu0 %483  ;;  %v1117_v9 = vsel %vm1041_vm7, %v1108_v45, %v5577_v2  ;;  %v1581_v2 = vld [vmem:[%s7601_s4 + $0x150] sm:$0xff]  ;;  %v1654_v45 = vld [vmem:[%s7601_s4 + $0x398] sm:$0xff] }
 0x177   : > { %v932_v33 = vsel %vm925_vm6, %v5454_v13, %v920_v62  ;;  %v422_v13 = vsel %vm414_vm13, %v411_v34, %v5575_v5  ;;  %v493_v49 = vsel %vm485_vm14, %v482_v0, %v5583_v8 }
 0x178   : > { %v1133_v21 = vsel %vm1061_vm9, %v1124_v41, %v932_v33  ;;  %v1029_v30 = vsel %vm1021_vm3, %v5073_v48, %v422_v13  ;;  %v1582_v41 = vld [vmem:[%s7601_s4 + $0x158] sm:$0xff] }
 0x17a   : > { %v554_v7 = vpop.permute.xlu1 %553  ;;  %v5585_v26 = vpop.permute.xlu0 %921 }
 0x17b   : > { %v933_v28 = vsel %vm925_vm6, %v920_v62, %v5585_v26  ;;  %v564_v31 = vsel %vm557_vm1, %v5456_v17, %v554_v7 }
 0x17c   : > { %v1134_v15 = vsel %vm1061_vm9, %v1125_v55, %v933_v28 }
 0x17e   : > { %v959_v53 = vpop.permute.xlu1 %958  ;;  %v5587_v10 = vpop.permute.xlu0 %555 }
 0x17f   : > { %v970_v40 = vsel %vm925_vm6, %v5458_v47, %v959_v53  ;;  %v565_v34 = vsel %vm557_vm1, %v554_v7, %v5587_v10 }
 0x180   : > { %v1142_v62 = vsel %vm1071_vm10, %v1133_v21, %v970_v40 }
 0x182   : > { %v626_v14 = vpop.permute.xlu1 %625  ;;  %v5589_v44 = vpop.permute.xlu0 %960 }
 0x183   : > { %v971_v61 = vsel %vm925_vm6, %v959_v53, %v5589_v44  ;;  %v456_v53 = vsel %vm414_vm13, %v5448_v3, %v447_v11  ;;  %v1028_v3 = vsel %vm1021_vm3, %v7651_v1, %v421_v42  ;;  %v1039_v11 = vsel %vm1031_vm5, %v1029_v30, %v457_v46  ;;  %v1575_v46 = vld [vmem:[%s7601_s4 + $0x120] sm:$0xff]  ;;  %v1570_v30 = vld [vmem:[%s7601_s4 + $0xf8] sm:$0xff] }
 0x184   : > { %v1143_v47 = vsel %vm1071_vm10, %v1134_v15, %v971_v61  ;;  %v1038_v36 = vsel %vm1031_vm5, %v1028_v3, %v456_v53  ;;  %v1049_v23 = vsel %vm1041_vm7, %v1039_v11, %v493_v49  ;;  %v636_v0 = vsel %vm629_vm0, %v5485_v27, %v626_v14  ;;  %v1572_v49 = vld [vmem:[%s7601_s4 + $0x108] sm:$0xff]  ;;  %v1566_v1 = vld [vmem:[%s7601_s4 + $0xd8] sm:$0xff] }
 0x185   : > { %v1048_v58 = vsel %vm1041_vm7, %v1038_v36, %v492_v19  ;;  %v1677_v19 = vld [vmem:[%s7601_s4 + $0x450] sm:$0xff]  ;;  %v1672_v3 = vld [vmem:[%s7601_s4 + $0x428] sm:$0xff] }
 0x186   : > { %v997_v38 = vpop.permute.xlu1 %996  ;;  %v5610_v22 = vpop.permute.xlu0 %627  ;;  %v1058_v17 = vsel %vm1051_vm8, %v1048_v58, %v564_v31  ;;  %v1564_v11 = vld [vmem:[%s7601_s4 + $0xc8] sm:$0xff]  ;;  %v1671_v31 = vld [vmem:[%s7601_s4 + $0x420] sm:$0xff]  ;;  %v1669_v36 = vld [vmem:[%s7601_s4 + $0x410] sm:$0xff] }
 0x187   : > { %v1009_v57 = vsel %vm7649_vm4, %v5507_v29, %v997_v38  ;;  %v637_v48 = vsel %vm629_vm0, %v626_v14, %v5610_v22  ;;  %v1068_v27 = vsel %vm1061_vm9, %v1058_v17, %v636_v0  ;;  %vm7652_vm4 = vcmask 490496   ;;  %v1668_v0 = vld [vmem:[%s7601_s4 + $0x408] sm:$0xff]  ;;  %v1666_v58 = vld [vmem:[%s7601_s4 + $0x3f8] sm:$0xff]  ;;  %v1557_v17 = vld [vmem:[%s7601_s4 + $0x90] sm:$0xff] }
 0x188   : > { %v1151_v20 = vsel %vm1081_vm12, %v1142_v62, %v1009_v57  ;;  %v1030_v57 = vsel %vm1021_vm3, %v5097_v18, %v5575_v5  ;;  %vm7653_vm3 = vmmov %vm7650_vm11 }
 0x189   : > { %v1040_v21 = vsel %vm1031_vm5, %v1030_v57, %v5579_v35  ;;  %v1647_v57 = vld [vmem:[%s7601_s4 + $0x360] sm:$0xff] }
 0x18a   : > { %v662_v51 = vpop.permute.xlu1 %661  ;;  %v5632_v52 = vpop.permute.xlu0 %998  ;;  %v1050_v18 = vsel %vm1041_vm7, %v1040_v21, %v5583_v8  ;;  %v1644_v21 = vld [vmem:[%s7601_s4 + $0x348] sm:$0xff] }
 0x18b   : > { %v1010_v37 = vsel %vm7650_vm11, %v997_v38, %v5632_v52  ;;  %v1059_v38 = vsel %vm1051_vm8, %v1049_v23, %v565_v34  ;;  %v671_v50 = vsel %vm629_vm0, %v5534_v59, %v662_v51  ;;  %v1569_v34 = vld [vmem:[%s7601_s4 + $0xf0] sm:$0xff] }
 0x18c   : > { %v1152_v29 = vsel %vm1081_vm12, %v1143_v47, %v1010_v37  ;;  %v1069_v7 = vsel %vm1061_vm9, %v1059_v38, %v637_v48  ;;  %v1078_v61 = vsel %vm1071_vm10, %v1068_v27, %v671_v50  ;;  %v1578_v37 = vld [vmem:[%s7601_s4 + $0x138] sm:$0xff]  ;;  %v1060_v47 = vsel %vm1051_vm8, %v1050_v18, %v5587_v10  ;;  %v1573_v10 = vld [vmem:[%s7601_s4 + $0x110] sm:$0xff]  ;;  %v1563_v48 = vld [vmem:[%s7601_s4 + $0xc0] sm:$0xff] }
 0x18d   : > { %1399 = vmatprep.subr.mxu1 %v1152_v29  ;;  %v1070_v8 = vsel %vm1061_vm9, %v1060_v47, %v5610_v22  ;;  %v1680_v22 = vld [vmem:[%s7601_s4 + $0x468] sm:$0xff]  ;;  %v1561_v23 = vld [vmem:[%s7601_s4 + $0xb0] sm:$0xff]  ;;  %v1558_v38 = vld [vmem:[%s7601_s4 + $0x98] sm:$0xff] }
 0x18e   : > { %v697_v6 = vpop.permute.xlu1 %696  ;;  %1400 = vmatpush1.msra.mxu1 %v1151_v20  ;;  %v664_v63 = vpop.permute.xlu0 %663  ;;  %v1678_v20 = vld [vmem:[%s7601_s4 + $0x458] sm:$0xff]  ;;  %v1665_v50 = vld [vmem:[%s7601_s4 + $0x3f0] sm:$0xff]  ;;  %v1660_v27 = vld [vmem:[%s7601_s4 + $0x3c8] sm:$0xff] }
 0x18f   : > { %v672_v60 = vsel %vm629_vm0, %v662_v51, %v664_v63  ;;  %v707_v16 = vsel %vm700_vm2, %v5557_v32, %v697_v6  ;;  %v1585_v32 = vld [vmem:[%s7601_s4 + $0x170] sm:$0xff]  ;;  %v1080_v62 = vsel %vm1071_vm10, %v1070_v8, %v664_v63  ;;  %v1567_v63 = vld [vmem:[%s7601_s4 + $0xe0] sm:$0xff]  ;;  %v1642_v18 = vld [vmem:[%s7601_s4 + $0x338] sm:$0xff] }
 0x190   : > { %v1079_v43 = vsel %vm1071_vm10, %v1069_v7, %v672_v60  ;;  %v1088_v55 = vsel %vm1081_vm12, %v1078_v61, %v707_v16  ;;  %v1560_v60 = vld [vmem:[%s7601_s4 + $0xa8] sm:$0xff]  ;;  %v1663_v7 = vld [vmem:[%s7601_s4 + $0x3e0] sm:$0xff]  ;;  %v1629_v47 = vld [vmem:[%s7601_s4 + $0x2d0] sm:$0xff] }
 0x191   : > { %v1555_v16 = vld [vmem:[%s7601_s4 + $0x80] sm:$0xff]  ;;  %v1656_v61 = vld [vmem:[%s7601_s4 + $0x3a8] sm:$0xff]  ;;  %v1626_v8 = vld [vmem:[%s7601_s4 + $0x2b8] sm:$0xff] }
 0x192   : > { %v881_v54 = vpop.permute.xlu1 %880  ;;  %v699_v28 = vpop.permute.xlu0 %698 }
 0x193   : > { %v708_v14 = vsel %vm700_vm2, %v697_v6, %v699_v28  ;;  %v891_v59 = vsel %vm7652_vm4, %v5581_v24, %v881_v54  ;;  %v1090_v53 = vsel %vm1081_vm12, %v1080_v62, %v699_v28  ;;  %v1675_v6 = vld [vmem:[%s7601_s4 + $0x440] sm:$0xff]  ;;  %v1662_v54 = vld [vmem:[%s7601_s4 + $0x3d8] sm:$0xff] }
 0x194   : > { %v1089_v33 = vsel %vm1081_vm12, %v1079_v43, %v708_v14  ;;  %v1126_v15 = vsel %vm1051_vm8, %v1117_v9, %v891_v59  ;;  %v1554_v28 = vld [vmem:[%s7601_s4 + $0x78] sm:$0xff]  ;;  %v1552_v14 = vld [vmem:[%s7601_s4 + $0x68] sm:$0xff]  ;;  %v1659_v43 = vld [vmem:[%s7601_s4 + $0x3c0] sm:$0xff] }
 0x195   : > { %1401 = vmatprep.subr.mxu1 %v1089_v33  ;;  %v1657_v59 = vld [vmem:[%s7601_s4 + $0x3b0] sm:$0xff]  ;;  %v1635_v62 = vld [vmem:[%s7601_s4 + $0x300] sm:$0xff] }
 0x196   : > { %v963_v24 = vpop.permute.xlu1 %962  ;;  %1402 = vmatpush1.msra.mxu1 %v1088_v55  ;;  %v924_v40 = vpop.permute.xlu0 %923  ;;  %v1549_v33 = vld [vmem:[%s7601_s4 + $0x50] sm:$0xff]  ;;  %v1546_v55 = vld [vmem:[%s7601_s4 + $0x38] sm:$0xff] }
 0x197   : > { %v934_v39 = vsel %vm925_vm6, %v5585_v26, %v924_v40  ;;  %4038 = vmatmul.mubr.msk.f32.vlgmr.msra.gmra.mxu1 %vm1154_vm15, %v5261_v4  ;;  %2064 = vmatprep.subr.mxu1 %v1585_v32  ;;  %v972_v51 = vsel %vm925_vm6, %v5589_v44, %v963_v24  ;;  %v1579_v26 = vld [vmem:[%s7601_s4 + $0x140] sm:$0xff]  ;;  %v1576_v44 = vld [vmem:[%s7601_s4 + $0x128] sm:$0xff]  ;;  %v1545_v9 = vld [vmem:[%s7601_s4 + $0x30] sm:$0xff] }
 0x198   : > { %v1135_v13 = vsel %vm1061_vm9, %v1126_v15, %v934_v39  ;;  %2065 = vmatpush1.msra.mxu1 %v1584_v25  ;;  %v1548_v32 = vld [vmem:[%s7601_s4 + $0x48] sm:$0xff]  ;;  %v1653_v25 = vld [vmem:[%s7601_s4 + $0x390] sm:$0xff]  ;;  %v1651_v24 = vld [vmem:[%s7601_s4 + $0x380] sm:$0xff] }
 0x199   : > { %2066 = vmatprep.subr.mxu1 %v1582_v41  ;;  %v1144_v42 = vsel %vm1071_vm10, %v1135_v13, %v972_v51  ;;  %v1543_v40 = vld [vmem:[%s7601_s4 + $0x20] sm:$0xff]  ;;  %v1650_v41 = vld [vmem:[%s7601_s4 + $0x378] sm:$0xff]  ;;  %v1648_v39 = vld [vmem:[%s7601_s4 + $0x368] sm:$0xff] }
 0x19a   : > { %v1001_v5 = vpop.permute.xlu0 %1000  ;;  %2067 = vmatpush1.msra.mxu1 %v1581_v2  ;;  %v1542_v15 = vld [vmem:[%s7601_s4 + $0x18] sm:$0xff]  ;;  %v1540_v2 = vld [vmem:[%s7601_s4 + $0x8] sm:$0xff]  ;;  %v1539_v51 = vld [vmem:[%s7601_s4] sm:$0xff] }
 0x19b   : > { %v1011_v35 = vsel %vm7653_vm3, %v5632_v52, %v1001_v5  ;;  %2068 = vmatprep.subr.mxu1 %v1579_v26  ;;  %v1681_v52 = vld [vmem:[%s7601_s4 + $0x470] sm:$0xff]  ;;  %v1630_v5 = vld [vmem:[%s7601_s4 + $0x2d8] sm:$0xff] }
 0x19c   : > { %v1153_v29 = vsel %vm1081_vm12, %v1144_v42, %v1011_v35  ;;  %2069 = vmatpush1.msra.mxu1 %v1578_v37  ;;  %v1645_v13 = vld [vmem:[%s7601_s4 + $0x350] sm:$0xff]  ;;  %v1632_v37 = vld [vmem:[%s7601_s4 + $0x2e8] sm:$0xff]  ;;  %v1639_v35 = vld [vmem:[%s7601_s4 + $0x320] sm:$0xff] }
 0x19d   : > { %4374 = vmatpush3.msra.mxu0 %v1153_v29  ;;  %2070 = vmatprep.subr.mxu1 %v1576_v44  ;;  %v1633_v26 = vld [vmem:[%s7601_s4 + $0x2f0] sm:$0xff]  ;;  %v1627_v42 = vld [vmem:[%s7601_s4 + $0x2c0] sm:$0xff]  ;;  %v1636_v29 = vld [vmem:[%s7601_s4 + $0x308] sm:$0xff] }
 0x19e   : > { %4375 = vmatprep.subr.mxu0 %v7634_v12  ;;  %2071 = vmatpush1.msra.mxu1 %v1575_v46  ;;  %v1641_v44 = vld [vmem:[%s7601_s4 + $0x330] sm:$0xff]  ;;  %v1638_v46 = vld [vmem:[%s7601_s4 + $0x318] sm:$0xff] }
 0x19f   : > { %4376 = vmatpush3.msra.mxu0 %v1090_v53  ;;  %2072 = vmatprep.subr.mxu1 %v1573_v10  ;;  %v1624_v10 = vld [vmem:[%s7601_s4 + $0x2a8] sm:$0xff]  ;;  %v1729_v53 = vld [vmem:[%s7601_s4 + $0x5f0] sm:$0xff] }
 0x1a0   : > { %4378 = vmatmul.mubr.msk.f32.vlgmr.msra.gmra.mxu0 %vm1154_vm15, %v5261_v4  ;;  %2153 = vmatprep.subr.mxu0 %v1681_v52  ;;  %v1674_v4 = vld [vmem:[%s7601_s4 + $0x438] sm:$0xff]  ;;  %v1623_v52 = vld [vmem:[%s7601_s4 + $0x2a0] sm:$0xff] }
 0x1a1   : > { %2154 = vmatpush1.msra.mxu0 %v1680_v22  ;;  %2073 = vmatpush1.msra.mxu1 %v1572_v49  ;;  %v1621_v22 = vld [vmem:[%s7601_s4 + $0x290] sm:$0xff]  ;;  %v1728_v49 = vld [vmem:[%s7601_s4 + $0x5e8] sm:$0xff] }
 0x1a2   : > { %2155 = vmatprep.subr.mxu0 %v1678_v20  ;;  %2074 = vmatprep.subr.mxu1 %v1570_v30  ;;  %v1620_v20 = vld [vmem:[%s7601_s4 + $0x288] sm:$0xff]  ;;  %v1726_v30 = vld [vmem:[%s7601_s4 + $0x5d8] sm:$0xff] }
 0x1a3   : > { %2156 = vmatpush1.msra.mxu0 %v1677_v19  ;;  %2075 = vmatpush1.msra.mxu1 %v1569_v34  ;;  %v1618_v19 = vld [vmem:[%s7601_s4 + $0x278] sm:$0xff]  ;;  %v1725_v34 = vld [vmem:[%s7601_s4 + $0x5d0] sm:$0xff] }
 0x1a4   : > { %2157 = vmatprep.subr.mxu0 %v1675_v6  ;;  %2076 = vmatprep.subr.mxu1 %v1567_v63  ;;  %v1617_v6 = vld [vmem:[%s7601_s4 + $0x270] sm:$0xff]  ;;  %v1723_v63 = vld [vmem:[%s7601_s4 + $0x5c0] sm:$0xff] }
 0x1a5   : > { %2158 = vmatpush1.msra.mxu0 %v1674_v4  ;;  %2077 = vmatpush1.msra.mxu1 %v1566_v1  ;;  %v1615_v4 = vld [vmem:[%s7601_s4 + $0x260] sm:$0xff]  ;;  %v1722_v1 = vld [vmem:[%s7601_s4 + $0x5b8] sm:$0xff] }
 0x1a6   : > { %2159 = vmatprep.subr.mxu0 %v1672_v3  ;;  %2078 = vmatprep.subr.mxu1 %v1564_v11  ;;  %v1614_v3 = vld [vmem:[%s7601_s4 + $0x258] sm:$0xff]  ;;  %v1720_v11 = vld [vmem:[%s7601_s4 + $0x5a8] sm:$0xff] }
 0x1a7   : > { %2160 = vmatpush1.msra.mxu0 %v1671_v31  ;;  %2079 = vmatpush1.msra.mxu1 %v1563_v48  ;;  %v1612_v31 = vld [vmem:[%s7601_s4 + $0x248] sm:$0xff]  ;;  %v1719_v48 = vld [vmem:[%s7601_s4 + $0x5a0] sm:$0xff] }
 0x1a8   : > { %2161 = vmatprep.subr.mxu0 %v1669_v36  ;;  %2080 = vmatprep.subr.mxu1 %v1561_v23  ;;  %v1611_v36 = vld [vmem:[%s7601_s4 + $0x240] sm:$0xff]  ;;  %v1717_v23 = vld [vmem:[%s7601_s4 + $0x590] sm:$0xff] }
 0x1a9   : > { %2162 = vmatpush1.msra.mxu0 %v1668_v0  ;;  %2081 = vmatpush1.msra.mxu1 %v1560_v60  ;;  %v1609_v0 = vld [vmem:[%s7601_s4 + $0x230] sm:$0xff]  ;;  %v1716_v60 = vld [vmem:[%s7601_s4 + $0x588] sm:$0xff] }
 0x1aa   : > { %2163 = vmatprep.subr.mxu0 %v1666_v58  ;;  %2082 = vmatprep.subr.mxu1 %v1558_v38  ;;  %v1608_v58 = vld [vmem:[%s7601_s4 + $0x228] sm:$0xff]  ;;  %v1714_v38 = vld [vmem:[%s7601_s4 + $0x578] sm:$0xff] }
 0x1ab   : > { %2164 = vmatpush1.msra.mxu0 %v1665_v50  ;;  %2083 = vmatpush1.msra.mxu1 %v1557_v17  ;;  %v1606_v50 = vld [vmem:[%s7601_s4 + $0x218] sm:$0xff]  ;;  %v1713_v17 = vld [vmem:[%s7601_s4 + $0x570] sm:$0xff] }
 0x1ac   : > { %2165 = vmatprep.subr.mxu0 %v1663_v7  ;;  %2084 = vmatprep.subr.mxu1 %v1555_v16  ;;  %v1605_v7 = vld [vmem:[%s7601_s4 + $0x210] sm:$0xff]  ;;  %v1711_v16 = vld [vmem:[%s7601_s4 + $0x560] sm:$0xff] }
 0x1ad   : > { %2166 = vmatpush1.msra.mxu0 %v1662_v54  ;;  %2085 = vmatpush1.msra.mxu1 %v1554_v28  ;;  %v1603_v54 = vld [vmem:[%s7601_s4 + $0x200] sm:$0xff]  ;;  %v1710_v28 = vld [vmem:[%s7601_s4 + $0x558] sm:$0xff] }
 0x1ae   : > { %2167 = vmatprep.subr.mxu0 %v1660_v27  ;;  %2086 = vmatprep.subr.mxu1 %v1552_v14  ;;  %v1602_v27 = vld [vmem:[%s7601_s4 + $0x1f8] sm:$0xff]  ;;  %v1708_v14 = vld [vmem:[%s7601_s4 + $0x548] sm:$0xff] }
 0x1af   : > { %2168 = vmatpush1.msra.mxu0 %v1659_v43  ;;  %2087 = vmatpush1.msra.mxu1 %v1551_v56  ;;  %v1600_v43 = vld [vmem:[%s7601_s4 + $0x1e8] sm:$0xff]  ;;  %v1707_v56 = vld [vmem:[%s7601_s4 + $0x540] sm:$0xff] }
 0x1b0   : > { %2169 = vmatprep.subr.mxu0 %v1657_v59  ;;  %2088 = vmatprep.subr.mxu1 %v1549_v33  ;;  %v1599_v59 = vld [vmem:[%s7601_s4 + $0x1e0] sm:$0xff]  ;;  %v1705_v33 = vld [vmem:[%s7601_s4 + $0x530] sm:$0xff] }
 0x1b1   : > { %2170 = vmatpush1.msra.mxu0 %v1656_v61  ;;  %2089 = vmatpush1.msra.mxu1 %v1548_v32  ;;  %v1597_v61 = vld [vmem:[%s7601_s4 + $0x1d0] sm:$0xff] }
 0x1b2   : > { %2171 = vmatprep.subr.mxu0 %v1654_v45  ;;  %2090 = vmatprep.subr.mxu1 %v1546_v55  ;;  %v1704_v45 = vld [vmem:[%s7601_s4 + $0x528] sm:$0xff] }
 0x1b3   : > { %2172 = vmatpush1.msra.mxu0 %v1653_v25  ;;  %2091 = vmatpush1.msra.mxu1 %v1545_v9  ;;  %v1596_v55 = vld [vmem:[%s7601_s4 + $0x1c8] sm:$0xff]  ;;  %v1702_v25 = vld [vmem:[%s7601_s4 + $0x518] sm:$0xff] }
 0x1b4   : > { %2173 = vmatprep.subr.mxu0 %v1651_v24  ;;  %2092 = vmatprep.subr.mxu1 %v1543_v40  ;;  %v1594_v9 = vld [vmem:[%s7601_s4 + $0x1b8] sm:$0xff]  ;;  %v1701_v24 = vld [vmem:[%s7601_s4 + $0x510] sm:$0xff] }
 0x1b5   : > { %2174 = vmatpush1.msra.mxu0 %v1650_v41  ;;  %2093 = vmatpush1.msra.mxu1 %v1542_v15  ;;  %v1593_v40 = vld [vmem:[%s7601_s4 + $0x1b0] sm:$0xff]  ;;  %v1699_v41 = vld [vmem:[%s7601_s4 + $0x500] sm:$0xff] }
 0x1b6   : > { %2175 = vmatprep.subr.mxu0 %v1648_v39  ;;  %2094 = vmatprep.subr.mxu1 %v1540_v2  ;;  %v1591_v15 = vld [vmem:[%s7601_s4 + $0x1a0] sm:$0xff]  ;;  %v1698_v2 = vld [vmem:[%s7601_s4 + $0x4f8] sm:$0xff] }
 0x1b7   : > { %2176 = vmatpush1.msra.mxu0 %v1647_v57  ;;  %2095 = vmatpush1.msra.mxu1 %v1539_v51  ;;  %v1590_v57 = vld [vmem:[%s7601_s4 + $0x198] sm:$0xff] }
 0x1b8   : > { %2177 = vmatprep.subr.mxu0 %v1645_v13  ;;  %2096 = vmatprep.subr.mxu1 %v1633_v26  ;;  %v1696_v13 = vld [vmem:[%s7601_s4 + $0x4e8] sm:$0xff] }
 0x1b9   : > { %2178 = vmatpush1.msra.mxu0 %v1644_v21  ;;  %2097 = vmatpush2.msra.mxu1 %v1632_v37  ;;  %v1588_v26 = vld [vmem:[%s7601_s4 + $0x188] sm:$0xff]  ;;  %v1695_v37 = vld [vmem:[%s7601_s4 + $0x4e0] sm:$0xff] }
 0x1ba   : > { %2179 = vmatprep.subr.mxu0 %v1642_v18  ;;  %2098 = vmatprep.subr.mxu1 %v1630_v5  ;;  %v1587_v18 = vld [vmem:[%s7601_s4 + $0x180] sm:$0xff]  ;;  %v1693_v5 = vld [vmem:[%s7601_s4 + $0x4d0] sm:$0xff] }
 0x1bb   : > { %2180 = vmatpush1.msra.mxu0 %v1641_v44  ;;  %2099 = vmatpush2.msra.mxu1 %v1629_v47  ;;  %v1692_v44 = vld [vmem:[%s7601_s4 + $0x4c8] sm:$0xff] }
 0x1bc   : > { %2181 = vmatprep.subr.mxu0 %v1639_v35  ;;  %2100 = vmatprep.subr.mxu1 %v1627_v42  ;;  %v1690_v35 = vld [vmem:[%s7601_s4 + $0x4b8] sm:$0xff] }
 0x1bd   : > { %2182 = vmatpush1.msra.mxu0 %v1638_v46  ;;  %2101 = vmatpush2.msra.mxu1 %v1626_v8  ;;  %v1689_v46 = vld [vmem:[%s7601_s4 + $0x4b0] sm:$0xff]  ;;  %v1687_v8 = vld [vmem:[%s7601_s4 + $0x4a0] sm:$0xff] }
 0x1be   : > { %2183 = vmatprep.subr.mxu0 %v1636_v29  ;;  %2102 = vmatprep.subr.mxu1 %v1624_v10  ;;  %v1686_v29 = vld [vmem:[%s7601_s4 + $0x498] sm:$0xff]  ;;  %v1684_v10 = vld [vmem:[%s7601_s4 + $0x488] sm:$0xff] }
 0x1bf   : > { %2184 = vmatpush1.msra.mxu0 %v1635_v62  ;;  %2103 = vmatpush2.msra.mxu1 %v1623_v52  ;;  %v1683_v62 = vld [vmem:[%s7601_s4 + $0x480] sm:$0xff]  ;;  %v1777_v52 = vld [vmem:[%s7601_s4 + $0x770] sm:$0xff] }
 0x1c0   : > { %2185 = vmatprep.subr.mxu0 %v1729_v53  ;;  %2104 = vmatprep.subr.mxu1 %v1621_v22  ;;  %v1776_v53 = vld [vmem:[%s7601_s4 + $0x768] sm:$0xff]  ;;  %v1774_v22 = vld [vmem:[%s7601_s4 + $0x758] sm:$0xff] }
 0x1c1   : > { %2186 = vmatpush2.msra.mxu0 %v1728_v49  ;;  %2105 = vmatpush2.msra.mxu1 %v1620_v20  ;;  %v1773_v49 = vld [vmem:[%s7601_s4 + $0x750] sm:$0xff] }
 0x1c2   : > { %2187 = vmatprep.subr.mxu0 %v1726_v30  ;;  %2106 = vmatprep.subr.mxu1 %v1618_v19  ;;  %v1873_v20 = vld [vmem:[%s7601_s4 + $0xa70] sm:$0xff]  ;;  %v1771_v30 = vld [vmem:[%s7601_s4 + $0x740] sm:$0xff]  ;;  %v1770_v19 = vld [vmem:[%s7601_s4 + $0x738] sm:$0xff] }
 0x1c3   : > { %2188 = vmatpush2.msra.mxu0 %v1725_v34  ;;  %2107 = vmatpush2.msra.mxu1 %v1617_v6  ;;  %v1768_v34 = vld [vmem:[%s7601_s4 + $0x728] sm:$0xff]  ;;  %v1767_v6 = vld [vmem:[%s7601_s4 + $0x720] sm:$0xff] }
 0x1c4   : > { %2189 = vmatprep.subr.mxu0 %v1723_v63  ;;  %2108 = vmatprep.subr.mxu1 %v1615_v4  ;;  %v1765_v63 = vld [vmem:[%s7601_s4 + $0x710] sm:$0xff]  ;;  %v1764_v4 = vld [vmem:[%s7601_s4 + $0x708] sm:$0xff] }
 0x1c5   : > { %2190 = vmatpush2.msra.mxu0 %v1722_v1  ;;  %2109 = vmatpush2.msra.mxu1 %v1614_v3  ;;  %v1762_v1 = vld [vmem:[%s7601_s4 + $0x6f8] sm:$0xff]  ;;  %v1761_v3 = vld [vmem:[%s7601_s4 + $0x6f0] sm:$0xff] }
 0x1c6   : > { %2191 = vmatprep.subr.mxu0 %v1720_v11  ;;  %2110 = vmatprep.subr.mxu1 %v1612_v31  ;;  %v1759_v11 = vld [vmem:[%s7601_s4 + $0x6e0] sm:$0xff]  ;;  %v1758_v31 = vld [vmem:[%s7601_s4 + $0x6d8] sm:$0xff] }
 0x1c7   : > { %2192 = vmatpush2.msra.mxu0 %v1719_v48  ;;  %2111 = vmatpush2.msra.mxu1 %v1611_v36  ;;  %v1756_v48 = vld [vmem:[%s7601_s4 + $0x6c8] sm:$0xff]  ;;  %v1755_v36 = vld [vmem:[%s7601_s4 + $0x6c0] sm:$0xff] }
 0x1c8   : > { %2193 = vmatprep.subr.mxu0 %v1717_v23  ;;  %2112 = vmatprep.subr.mxu1 %v1609_v0  ;;  %v1753_v23 = vld [vmem:[%s7601_s4 + $0x6b0] sm:$0xff]  ;;  %v1752_v0 = vld [vmem:[%s7601_s4 + $0x6a8] sm:$0xff] }
 0x1c9   : > { %2194 = vmatpush2.msra.mxu0 %v1716_v60  ;;  %2113 = vmatpush2.msra.mxu1 %v1608_v58  ;;  %v1750_v60 = vld [vmem:[%s7601_s4 + $0x698] sm:$0xff]  ;;  %v1749_v58 = vld [vmem:[%s7601_s4 + $0x690] sm:$0xff] }
 0x1ca   : > { %2195 = vmatprep.subr.mxu0 %v1714_v38  ;;  %2114 = vmatprep.subr.mxu1 %v1606_v50  ;;  %v1224_v32 = vpop.f32.mrf.mxu1  ;;  %v1747_v50 = vld [vmem:[%s7601_s4 + $0x680] sm:$0xff] }
 0x1cb   : > { %2196 = vmatpush2.msra.mxu0 %v1713_v17  ;;  %2115 = vmatpush2.msra.mxu1 %v1605_v7  ;;  %v1521_v21 = vmul.f32 0.2, %v1224_v32  ;;  %vm1512_vm6 = vcmp.gt.f32.partialorder %v1224_v32, 0.0  ;;  %v1746_v17 = vld [vmem:[%s7601_s4 + $0x678] sm:$0xff] }
 0x1cc   : > { %2197 = vmatprep.subr.mxu0 %v1711_v16  ;;  %2116 = vmatprep.subr.mxu1 %v1603_v54  ;;  %v1226_v39 = vpop.f32.mrf.mxu1  ;;  %v1744_v16 = vld [vmem:[%s7601_s4 + $0x668] sm:$0xff] }
 0x1cd   : > { %2198 = vmatpush2.msra.mxu0 %v1710_v28  ;;  %2117 = vmatpush2.msra.mxu1 %v1602_v27  ;;  %v1522_v51 = vmul.f32 0.2, %v1226_v39  ;;  %vm1513_vm5 = vcmp.gt.f32.partialorder %v1226_v39, 0.0  ;;  %v6091_v42 = vsel %vm1512_vm6, %v1224_v32, %v1521_v21  ;;  %v1743_v28 = vld [vmem:[%s7601_s4 + $0x660] sm:$0xff]  ;;  %v1870_v32 = vld [vmem:[%s7601_s4 + $0xa58] sm:$0xff]  ;;  %v1857_v21 = vld [vmem:[%s7601_s4 + $0x9f0] sm:$0xff] }
 0x1ce   : > { %2199 = vmatprep.subr.mxu0 %v1708_v14  ;;  %2118 = vmatprep.subr.mxu1 %v1600_v43  ;;  %vm3089_vm6 = vcmask 744448  }
 0x1cf   : > { %2200 = vmatpush2.msra.mxu0 %v1707_v56  ;;  %2119 = vmatpush2.msra.mxu1 %v1599_v59  ;;  %v6086_v47 = vsel %vm1513_vm5, %v1226_v39, %v1522_v51  ;;  %v1741_v56 = vld [vmem:[%s7601_s4 + $0x650] sm:$0xff]  ;;  %v1735_v39 = vld [vmem:[%s7601_s4 + $0x620] sm:$0xff]  ;;  %v1860_v51 = vld [vmem:[%s7601_s4 + $0xa08] sm:$0xff]  ;;  %vm2046_vm5 = vcmask 228352  }
 0x1d0   : > { %2201 = vmatprep.subr.mxu0 %v1705_v33  ;;  %2120 = vmatprep.subr.mxu1 %v1597_v61  ;;  %v1872_v33 = vld [vmem:[%s7601_s4 + $0xa68] sm:$0xff] }
 0x1d1   : > { %2202 = vmatpush2.msra.mxu0 %v1704_v45  ;;  %2121 = vmatpush2.msra.mxu1 %v1596_v55  ;;  %v1740_v45 = vld [vmem:[%s7601_s4 + $0x648] sm:$0xff]  ;;  %v1869_v55 = vld [vmem:[%s7601_s4 + $0xa50] sm:$0xff] }
 0x1d2   : > { %2203 = vmatprep.subr.mxu0 %v1702_v25  ;;  %2122 = vmatprep.subr.mxu1 %v1594_v9  ;;  %v1867_v25 = vld [vmem:[%s7601_s4 + $0xa40] sm:$0xff]  ;;  %v1738_v9 = vld [vmem:[%s7601_s4 + $0x638] sm:$0xff] }
 0x1d3   : > { %2204 = vmatpush2.msra.mxu0 %v1701_v24  ;;  %2123 = vmatpush2.msra.mxu1 %v1593_v40  ;;  %v1866_v24 = vld [vmem:[%s7601_s4 + $0xa38] sm:$0xff]  ;;  %v1864_v40 = vld [vmem:[%s7601_s4 + $0xa28] sm:$0xff] }
 0x1d4   : > { %2205 = vmatprep.subr.mxu0 %v1699_v41  ;;  %2124 = vmatprep.subr.mxu1 %v1591_v15  ;;  %v1737_v41 = vld [vmem:[%s7601_s4 + $0x630] sm:$0xff]  ;;  %v1863_v15 = vld [vmem:[%s7601_s4 + $0xa20] sm:$0xff] }
 0x1d5   : > { %2206 = vmatpush2.msra.mxu0 %v1698_v2  ;;  %2125 = vmatpush2.msra.mxu1 %v1590_v57  ;;  %v1861_v2 = vld [vmem:[%s7601_s4 + $0xa10] sm:$0xff]  ;;  %v1734_v57 = vld [vmem:[%s7601_s4 + $0x618] sm:$0xff] }
 0x1d6   : > { %2207 = vmatprep.subr.mxu0 %v1696_v13  ;;  %2126 = vmatprep.subr.mxu1 %v1588_v26  ;;  %v1858_v13 = vld [vmem:[%s7601_s4 + $0x9f8] sm:$0xff]  ;;  %v1732_v26 = vld [vmem:[%s7601_s4 + $0x608] sm:$0xff] }
 0x1d7   : > { %2208 = vmatpush2.msra.mxu0 %v1695_v37  ;;  %2127 = vmatpush2.msra.mxu1 %v1587_v18  ;;  %v1731_v37 = vld [vmem:[%s7601_s4 + $0x600] sm:$0xff] }
 0x1d8   : > { %2209 = vmatprep.subr.mxu0 %v1693_v5  ;;  %2128 = vmatprep.mubr.f32.mxu1 %v6086_v47  ;;  %v1855_v18 = vld [vmem:[%s7601_s4 + $0x9e0] sm:$0xff]  ;;  %v1825_v5 = vld [vmem:[%s7601_s4 + $0x8f0] sm:$0xff] }
 0x1d9   : > { %2210 = vmatpush2.msra.mxu0 %v1692_v44  ;;  %2129 = vmatmul.mubr.f32.vlgmr.msra.gmra.mxu1 %v6091_v42  ;;  %v1854_v44 = vld [vmem:[%s7601_s4 + $0x9d8] sm:$0xff] }
 0x1da   : > { %2211 = vmatprep.subr.mxu0 %v1690_v35  ;;  %2242 = vmatprep.subr.mxu1 %v1777_v52  ;;  %v1824_v35 = vld [vmem:[%s7601_s4 + $0x8e8] sm:$0xff]  ;;  %v1819_v52 = vld [vmem:[%s7601_s4 + $0x8c0] sm:$0xff] }
 0x1db   : > { %2212 = vmatpush2.msra.mxu0 %v1689_v46  ;;  %2243 = vmatpush1.msra.mxu1 %v1776_v53  ;;  %v1852_v46 = vld [vmem:[%s7601_s4 + $0x9c8] sm:$0xff] }
 0x1dc   : > { %2213 = vmatprep.subr.mxu0 %v1687_v8  ;;  %2244 = vmatprep.subr.mxu1 %v1774_v22  ;;  %v1822_v8 = vld [vmem:[%s7601_s4 + $0x8d8] sm:$0xff]  ;;  %v1848_v53 = vld [vmem:[%s7601_s4 + $0x9a8] sm:$0xff] }
 0x1dd   : > { %2214 = vmatpush2.msra.mxu0 %v1686_v29  ;;  %2245 = vmatpush1.msra.mxu1 %v1773_v49  ;;  %v1851_v29 = vld [vmem:[%s7601_s4 + $0x9c0] sm:$0xff]  ;;  %v1818_v22 = vld [vmem:[%s7601_s4 + $0x8b8] sm:$0xff] }
 0x1de   : > { %2215 = vmatprep.subr.mxu0 %v1684_v10  ;;  %2246 = vmatprep.subr.mxu1 %v1771_v30  ;;  %v1821_v10 = vld [vmem:[%s7601_s4 + $0x8d0] sm:$0xff]  ;;  %v1846_v49 = vld [vmem:[%s7601_s4 + $0x998] sm:$0xff] }
 0x1df   : > { %2216 = vmatpush2.msra.mxu0 %v1683_v62  ;;  %2247 = vmatpush1.msra.mxu1 %v1770_v19  ;;  %v1849_v62 = vld [vmem:[%s7601_s4 + $0x9b0] sm:$0xff]  ;;  %v1815_v19 = vld [vmem:[%s7601_s4 + $0x8a0] sm:$0xff] }
 0x1e0   : > { %2331 = vmatprep.subr.mxu0 %v1873_v20  ;;  %2248 = vmatprep.subr.mxu1 %v1768_v34  ;;  %v1816_v20 = vld [vmem:[%s7601_s4 + $0x8a8] sm:$0xff]  ;;  %v1845_v30 = vld [vmem:[%s7601_s4 + $0x990] sm:$0xff]  ;;  %v1843_v34 = vld [vmem:[%s7601_s4 + $0x980] sm:$0xff] }
 0x1e1   : > { %2249 = vmatpush1.msra.mxu1 %v1767_v6  ;;  %v1813_v6 = vld [vmem:[%s7601_s4 + $0x890] sm:$0xff] }
 0x1e2   : > { %2250 = vmatprep.subr.mxu1 %v1765_v63  ;;  %v1842_v63 = vld [vmem:[%s7601_s4 + $0x978] sm:$0xff] }
 0x1e3   : > { %2251 = vmatpush1.msra.mxu1 %v1764_v4  ;;  %v1812_v4 = vld [vmem:[%s7601_s4 + $0x888] sm:$0xff] }
 0x1e4   : > { %2252 = vmatprep.subr.mxu1 %v1762_v1  ;;  %v1840_v1 = vld [vmem:[%s7601_s4 + $0x968] sm:$0xff] }
 0x1e5   : > { %2253 = vmatpush1.msra.mxu1 %v1761_v3  ;;  %v1810_v3 = vld [vmem:[%s7601_s4 + $0x878] sm:$0xff] }
 0x1e6   : > { %2254 = vmatprep.subr.mxu1 %v1759_v11  ;;  %v1839_v11 = vld [vmem:[%s7601_s4 + $0x960] sm:$0xff] }
 0x1e7   : > { %2255 = vmatpush1.msra.mxu1 %v1758_v31  ;;  %v1809_v31 = vld [vmem:[%s7601_s4 + $0x870] sm:$0xff] }
 0x1e8   : > { %2256 = vmatprep.subr.mxu1 %v1756_v48  ;;  %v1837_v48 = vld [vmem:[%s7601_s4 + $0x950] sm:$0xff] }
 0x1e9   : > { %2257 = vmatpush1.msra.mxu1 %v1755_v36  ;;  %v1807_v36 = vld [vmem:[%s7601_s4 + $0x860] sm:$0xff] }
 0x1ea   : > { %2258 = vmatprep.subr.mxu1 %v1753_v23  ;;  %v1836_v23 = vld [vmem:[%s7601_s4 + $0x948] sm:$0xff] }
 0x1eb   : > { %2259 = vmatpush1.msra.mxu1 %v1752_v0  ;;  %v1806_v0 = vld [vmem:[%s7601_s4 + $0x858] sm:$0xff] }
 0x1ec   : > { %2260 = vmatprep.subr.mxu1 %v1750_v60  ;;  %v1834_v60 = vld [vmem:[%s7601_s4 + $0x938] sm:$0xff] }
 0x1ed   : > { %2261 = vmatpush1.msra.mxu1 %v1749_v58  ;;  %v1804_v58 = vld [vmem:[%s7601_s4 + $0x848] sm:$0xff] }
 0x1ee   : > { %2262 = vmatprep.subr.mxu1 %v1747_v50  ;;  %v1803_v50 = vld [vmem:[%s7601_s4 + $0x840] sm:$0xff] }
 0x1ef   : > { %v1295_v38 = vpop.f32.mrf.mxu1  ;;  %2263 = vmatpush1.msra.mxu1 %v1746_v17  ;;  %v1831_v17 = vld [vmem:[%s7601_s4 + $0x920] sm:$0xff] }
 0x1f0   : > { %vm1514_vm7 = vcmp.gt.f32.partialorder %v1295_v38, 0.0  ;;  %v1523_v7 = vmul.f32 0.2, %v1295_v38  ;;  %2264 = vmatprep.subr.mxu1 %v1744_v16  ;;  %v1830_v16 = vld [vmem:[%s7601_s4 + $0x918] sm:$0xff] }
 0x1f1   : > { %v1297_v54 = vpop.f32.mrf.mxu1  ;;  %2265 = vmatpush1.msra.mxu1 %v1743_v28  ;;  %v1828_v28 = vld [vmem:[%s7601_s4 + $0x908] sm:$0xff] }
 0x1f2   : > { %v6185_v27 = vsel %vm1514_vm7, %v1295_v38, %v1523_v7  ;;  %vm1515_vm9 = vcmp.gt.f32.partialorder %v1297_v54, 0.0  ;;  %v1524_v14 = vmul.f32 0.2, %v1297_v54  ;;  %2266 = vmatprep.subr.mxu1 %v1741_v56  ;;  %v1833_v38 = vld [vmem:[%s7601_s4 + $0x930] sm:$0xff]  ;;  %vm3022_vm7 = vcmask 883712  }
 0x1f3   : > { %v4577_v43 = vpack.i.bf16 %v6185_v27, %v6086_v47  ;;  %2267 = vmatpush1.msra.mxu1 %v1740_v45  ;;  %v1801_v7 = vld [vmem:[%s7601_s4 + $0x830] sm:$0xff]  ;;  %v1920_v45 = vld [vmem:[%s7601_s4 + $0xbe8] sm:$0xff] }
 0x1f4   : > { %v6192_v59 = vsel %vm1515_vm9, %v1297_v54, %v1524_v14  ;;  %2268 = vmatprep.subr.mxu1 %v1738_v9  ;;  %v1800_v54 = vld [vmem:[%s7601_s4 + $0x828] sm:$0xff]  ;;  %v1798_v14 = vld [vmem:[%s7601_s4 + $0x818] sm:$0xff]  ;;  %v1797_v56 = vld [vmem:[%s7601_s4 + $0x810] sm:$0xff]  ;;  %vm2999_vm9 = vcmask 891904  }
 0x1f5   : > { %4578 = vrot.lane.b32.xlu1 %v4577_v43, %s4649_s13  ;;  %v6200_v61 = vpack.i.bf16 %v6192_v59, %v6091_v42  ;;  %2217 = vmatprep.mubr.f32.mxu0 %v6192_v59  ;;  %v1792_v9 = vld [vmem:[%s7601_s4 + $0x7e8] sm:$0xff] }
 0x1f6   : > { %2218 = vmatmul.mubr.f32.vlgmr.msra.gmra.mxu0 %v6185_v27  ;;  %2269 = vmatpush1.msra.mxu1 %v1737_v41  ;;  %v1915_v41 = vld [vmem:[%s7601_s4 + $0xbc0] sm:$0xff] }
 0x1f7   : > { %4588 = vrot.lane.b32.xlu0 %v6200_v61, %s4649_s13  ;;  %2332 = vmatpush1.msra.mxu0 %v1872_v33  ;;  %v1921_v33 = vld [vmem:[%s7601_s4 + $0xbf0] sm:$0xff] }
 0x1f8   : > { %2333 = vmatprep.subr.mxu0 %v1870_v32  ;;  %2270 = vmatprep.subr.mxu1 %v1735_v39  ;;  %v1795_v32 = vld [vmem:[%s7601_s4 + $0x800] sm:$0xff]  ;;  %v1914_v39 = vld [vmem:[%s7601_s4 + $0xbb8] sm:$0xff] }
 0x1f9   : > { %4583 = vrot.lane.b32.xlu1 %v4577_v43, %s4648_s12  ;;  %2334 = vmatpush1.msra.mxu0 %v1869_v55  ;;  %v1794_v55 = vld [vmem:[%s7601_s4 + $0x7f8] sm:$0xff] }
 0x1fa   : > { %2335 = vmatprep.subr.mxu0 %v1867_v25  ;;  %2271 = vmatpush1.msra.mxu1 %v1734_v57  ;;  %v1918_v25 = vld [vmem:[%s7601_s4 + $0xbd8] sm:$0xff]  ;;  %v1912_v57 = vld [vmem:[%s7601_s4 + $0xba8] sm:$0xff] }
 0x1fb   : > { %4593 = vrot.lane.b32.xlu0 %v6200_v61, %s4648_s12  ;;  %2336 = vmatpush1.msra.mxu0 %v1866_v24  ;;  %v1917_v24 = vld [vmem:[%s7601_s4 + $0xbd0] sm:$0xff] }
 0x1fc   : > { %2337 = vmatprep.subr.mxu0 %v1864_v40  ;;  %2272 = vmatprep.subr.mxu1 %v1732_v26  ;;  %v1791_v40 = vld [vmem:[%s7601_s4 + $0x7e0] sm:$0xff]  ;;  %v1785_v26 = vld [vmem:[%s7601_s4 + $0x7b0] sm:$0xff] }
 0x1fd   : > { %2338 = vmatpush1.msra.mxu0 %v1863_v15  ;;  %2273 = vmatpush1.msra.mxu1 %v1731_v37  ;;  %v1789_v15 = vld [vmem:[%s7601_s4 + $0x7d0] sm:$0xff] }
 0x1fe   : > { %2339 = vmatprep.subr.mxu0 %v1861_v2  ;;  %2274 = vmatprep.subr.mxu1 %v1825_v5  ;;  %v1788_v2 = vld [vmem:[%s7601_s4 + $0x7c8] sm:$0xff]  ;;  %v1909_v37 = vld [vmem:[%s7601_s4 + $0xb90] sm:$0xff] }
 0x1ff   : > { %4598 = vrot.lane.b32.xlu0 %v4577_v43, %s4647_s11  ;;  %2340 = vmatpush1.msra.mxu0 %v1860_v51  ;;  %v1827_v43 = vld [vmem:[%s7601_s4 + $0x900] sm:$0xff]  ;;  %v1786_v51 = vld [vmem:[%s7601_s4 + $0x7b8] sm:$0xff] }
 0x200   : > { %2341 = vmatprep.subr.mxu0 %v1858_v13  ;;  %2275 = vmatpush2.msra.mxu1 %v1824_v35  ;;  %v1911_v13 = vld [vmem:[%s7601_s4 + $0xba0] sm:$0xff]  ;;  %v1782_v35 = vld [vmem:[%s7601_s4 + $0x798] sm:$0xff] }
 0x201   : > { %2342 = vmatpush1.msra.mxu0 %v1857_v21  ;;  %2276 = vmatprep.subr.mxu1 %v1822_v8  ;;  %v1906_v8 = vld [vmem:[%s7601_s4 + $0xb78] sm:$0xff] }
 0x202   : > { %2343 = vmatprep.subr.mxu0 %v1855_v18  ;;  %2277 = vmatpush2.msra.mxu1 %v1821_v10  ;;  %v1783_v18 = vld [vmem:[%s7601_s4 + $0x7a0] sm:$0xff]  ;;  %v1905_v10 = vld [vmem:[%s7601_s4 + $0xb70] sm:$0xff] }
 0x203   : > { %2344 = vmatpush1.msra.mxu0 %v1854_v44  ;;  %2278 = vmatprep.subr.mxu1 %v1819_v52  ;;  %v1908_v44 = vld [vmem:[%s7601_s4 + $0xb88] sm:$0xff]  ;;  %v1903_v52 = vld [vmem:[%s7601_s4 + $0xb60] sm:$0xff] }
 0x204   : > { %2345 = vmatprep.subr.mxu0 %v1852_v46  ;;  %2279 = vmatpush2.msra.mxu1 %v1818_v22  ;;  %v1900_v22 = vld [vmem:[%s7601_s4 + $0xb48] sm:$0xff] }
 0x205   : > { %2346 = vmatpush1.msra.mxu0 %v1851_v29  ;;  %2280 = vmatprep.subr.mxu1 %v1816_v20  ;;  %v1780_v29 = vld [vmem:[%s7601_s4 + $0x788] sm:$0xff]  ;;  %v1897_v20 = vld [vmem:[%s7601_s4 + $0xb30] sm:$0xff] }
 0x206   : > { %2347 = vmatprep.subr.mxu0 %v1849_v62  ;;  %2281 = vmatpush2.msra.mxu1 %v1815_v19  ;;  %v1779_v62 = vld [vmem:[%s7601_s4 + $0x780] sm:$0xff]  ;;  %v1893_v19 = vld [vmem:[%s7601_s4 + $0xb10] sm:$0xff] }
 0x207   : > { %2348 = vmatpush1.msra.mxu0 %v1848_v53  ;;  %2282 = vmatprep.subr.mxu1 %v1813_v6  ;;  %v1902_v53 = vld [vmem:[%s7601_s4 + $0xb58] sm:$0xff] }
 0x208   : > { %2349 = vmatprep.subr.mxu0 %v1846_v49  ;;  %2283 = vmatpush2.msra.mxu1 %v1812_v4  ;;  %v1899_v49 = vld [vmem:[%s7601_s4 + $0xb40] sm:$0xff]  ;;  %v1890_v6 = vld [vmem:[%s7601_s4 + $0xaf8] sm:$0xff] }
 0x209   : > { %2350 = vmatpush1.msra.mxu0 %v1845_v30  ;;  %2284 = vmatprep.subr.mxu1 %v1810_v3  ;;  %v1896_v30 = vld [vmem:[%s7601_s4 + $0xb28] sm:$0xff]  ;;  %v1887_v4 = vld [vmem:[%s7601_s4 + $0xae0] sm:$0xff] }
 0x20a   : > { %2351 = vmatprep.subr.mxu0 %v1843_v34  ;;  %2285 = vmatpush2.msra.mxu1 %v1809_v31  ;;  %v1891_v34 = vld [vmem:[%s7601_s4 + $0xb00] sm:$0xff]  ;;  %v1884_v3 = vld [vmem:[%s7601_s4 + $0xac8] sm:$0xff]  ;;  %v1881_v31 = vld [vmem:[%s7601_s4 + $0xab0] sm:$0xff] }
 0x20b   : > { %2352 = vmatpush1.msra.mxu0 %v1842_v63  ;;  %2286 = vmatprep.subr.mxu1 %v1807_v36  ;;  %v1888_v63 = vld [vmem:[%s7601_s4 + $0xae8] sm:$0xff]  ;;  %v1878_v36 = vld [vmem:[%s7601_s4 + $0xa98] sm:$0xff] }
 0x20c   : > { %2353 = vmatprep.subr.mxu0 %v1840_v1  ;;  %2287 = vmatpush2.msra.mxu1 %v1806_v0  ;;  %v1885_v1 = vld [vmem:[%s7601_s4 + $0xad0] sm:$0xff]  ;;  %v1875_v0 = vld [vmem:[%s7601_s4 + $0xa80] sm:$0xff] }
 0x20d   : > { %2354 = vmatpush1.msra.mxu0 %v1839_v11  ;;  %2288 = vmatprep.subr.mxu1 %v1804_v58  ;;  %v1882_v11 = vld [vmem:[%s7601_s4 + $0xab8] sm:$0xff]  ;;  %v1933_v58 = vld [vmem:[%s7601_s4 + $0xc50] sm:$0xf] }
 0x20e   : > { %2355 = vmatprep.subr.mxu0 %v1837_v48  ;;  %2289 = vmatpush2.msra.mxu1 %v1803_v50  ;;  %v1879_v48 = vld [vmem:[%s7601_s4 + $0xaa0] sm:$0xff] }
 0x20f   : > { %2356 = vmatpush1.msra.mxu0 %v1836_v23  ;;  %2290 = vmatprep.subr.mxu1 %v1801_v7  ;;  %v1876_v23 = vld [vmem:[%s7601_s4 + $0xa88] sm:$0xff] }
 0x210   : > { %2357 = vmatprep.subr.mxu0 %v1834_v60  ;;  %2291 = vmatpush2.msra.mxu1 %v1800_v54  ;;  %v1634_v60 = vld [vmem:[%s7601_s4 + $0x2f8] sm:$0xff] }
 0x211   : > { %2358 = vmatpush1.msra.mxu0 %v1833_v38  ;;  %2292 = vmatprep.subr.mxu1 %v1798_v14 }
 0x212   : > { %2359 = vmatprep.subr.mxu0 %v1831_v17  ;;  %2293 = vmatpush2.msra.mxu1 %v1797_v56 }
 0x213   : > { %2360 = vmatpush1.msra.mxu0 %v1830_v16  ;;  %2294 = vmatprep.subr.mxu1 %v1795_v32 }
 0x214   : > { %2361 = vmatprep.subr.mxu0 %v1828_v28  ;;  %2295 = vmatpush2.msra.mxu1 %v1794_v55 }
 0x215   : > { %2362 = vmatpush1.msra.mxu0 %v1827_v43  ;;  %2296 = vmatprep.subr.mxu1 %v1792_v9 }
 0x216   : > { %2363 = vmatprep.subr.mxu0 %v1921_v33  ;;  %2297 = vmatpush2.msra.mxu1 %v1791_v40 }
 0x217   : > { %2364 = vmatpush2.msra.mxu0 %v1920_v45  ;;  %2298 = vmatprep.subr.mxu1 %v1789_v15 }
 0x218   : > { %2365 = vmatprep.subr.mxu0 %v1918_v25  ;;  %2299 = vmatpush2.msra.mxu1 %v1788_v2 }
 0x219   : > { %2366 = vmatpush2.msra.mxu0 %v1917_v24  ;;  %2300 = vmatprep.subr.mxu1 %v1786_v51 }
 0x21a   : > { %2367 = vmatprep.subr.mxu0 %v1915_v41  ;;  %2301 = vmatpush2.msra.mxu1 %v1785_v26 }
 0x21b   : > { %v1366_v21 = vpop.f32.mrf.mxu1  ;;  %2368 = vmatpush2.msra.mxu0 %v1914_v39  ;;  %2302 = vmatprep.subr.mxu1 %v1783_v18 }
 0x21c   : > { %vm1516_vm10 = vcmp.gt.f32.partialorder %v1366_v21, 0.0  ;;  %v1525_v5 = vmul.f32 0.2, %v1366_v21  ;;  %2369 = vmatprep.subr.mxu0 %v1912_v57  ;;  %2303 = vmatpush2.msra.mxu1 %v1782_v35 }
 0x21d   : > { %2370 = vmatpush2.msra.mxu0 %v1911_v13  ;;  %2304 = vmatprep.subr.mxu1 %v1780_v29  ;;  %v1368_v38 = vpop.f32.mrf.mxu1 }
 0x21e   : > { %v6441_v46 = vsel %vm1516_vm10, %v1366_v21, %v1525_v5  ;;  %2371 = vmatprep.subr.mxu0 %v1909_v37  ;;  %2305 = vmatpush2.msra.mxu1 %v1779_v62  ;;  %v1526_v50 = vmul.f32 0.2, %v1368_v38  ;;  %vm1517_vm12 = vcmp.gt.f32.partialorder %v1368_v38, 0.0  ;;  %vm3340_vm10 = vcmask 97280  }
 0x21f   : > { %1952 = vrot.lane.b32.xlu1 %v6441_v46, %s4649_s13  ;;  %1986 = vrot.lane.b32.xlu0 %v6441_v46, %s4648_s12 }
 0x220   : > { %2372 = vmatpush2.msra.mxu0 %v1908_v44  ;;  %4040 = vmatprep.subr.msk.mxu1 %vm1051_vm8, %v1933_v58  ;;  %v6530_v54 = vsel %vm1517_vm12, %v1368_v38, %v1526_v50  ;;  %v1923_v58 = vld [vmem:[%s7601_s4 + $0xc00] sm:$0xff]  ;;  %v1580_v38 = vld [vmem:[%s7601_s4 + $0x148] sm:$0xff]  ;;  %v1730_v50 = vld [vmem:[%s7601_s4 + $0x5f8] sm:$0xff] }
 0x221   : > { %2373 = vmatprep.subr.mxu0 %v1906_v8 }
 0x222   : > { %2374 = vmatpush2.msra.mxu0 %v1905_v10 }
 0x223   : > { %4603 = vrot.lane.b32.xlu1 %v6200_v61, %s4647_s11  ;;  %2375 = vmatprep.subr.mxu0 %v1903_v52  ;;  %v1894_v61 = vld [vmem:[%s7601_s4 + $0xb18] sm:$0xff] }
 0x224   : > { %2376 = vmatpush2.msra.mxu0 %v1902_v53 }
 0x225   : > { %2377 = vmatprep.subr.mxu0 %v1900_v22 }
 0x226   : > { %2378 = vmatpush2.msra.mxu0 %v1899_v49 }
 0x227   : > { %2020 = vrot.lane.b32.xlu1 %v6441_v46, %s4647_s11  ;;  %2379 = vmatprep.subr.mxu0 %v1897_v20 }
 0x228   : > { %2380 = vmatpush2.msra.mxu0 %v1896_v30 }
 0x229   : > { %2381 = vmatprep.subr.mxu0 %v1894_v61 }
 0x22a   : > { %2382 = vmatpush2.msra.mxu0 %v1893_v19 }
 0x22b   : > { %2383 = vmatprep.subr.mxu0 %v1891_v34 }
 0x22c   : > { %2384 = vmatpush2.msra.mxu0 %v1890_v6 }
 0x22d   : > { %2385 = vmatprep.subr.mxu0 %v1888_v63 }
 0x22e   : > { %2386 = vmatpush2.msra.mxu0 %v1887_v4  ;;  %v1932_v4 = vld [vmem:[%s7601_s4 + $0xc48] sm:$0xf] }
 0x22f   : > { %2387 = vmatprep.subr.mxu0 %v1885_v1  ;;  %v1930_v1 = vld [vmem:[%s7601_s4 + $0xc38] sm:$0xff] }
 0x230   : > { %2388 = vmatpush2.msra.mxu0 %v1884_v3  ;;  %v1929_v3 = vld [vmem:[%s7601_s4 + $0xc30] sm:$0xff] }
 0x231   : > { %2389 = vmatprep.subr.mxu0 %v1882_v11  ;;  %v1586_v11 = vld [vmem:[%s7601_s4 + $0x178] sm:$0xff] }
 0x232   : > { %2390 = vmatpush2.msra.mxu0 %v1881_v31  ;;  %v1927_v31 = vld [vmem:[%s7601_s4 + $0xc20] sm:$0xff] }
 0x233   : > { %2391 = vmatprep.subr.mxu0 %v1879_v48  ;;  %v1631_v48 = vld [vmem:[%s7601_s4 + $0x2e0] sm:$0xff] }
 0x234   : > { %2392 = vmatpush2.msra.mxu0 %v1878_v36  ;;  %v1926_v36 = vld [vmem:[%s7601_s4 + $0xc18] sm:$0xff] }
 0x235   : > { %2393 = vmatprep.subr.mxu0 %v1876_v23  ;;  %v1583_v23 = vld [vmem:[%s7601_s4 + $0x160] sm:$0xff] }
 0x236   : > { %2394 = vmatpush2.msra.mxu0 %v1875_v0  ;;  %v1924_v0 = vld [vmem:[%s7601_s4 + $0xc08] sm:$0xff] }
 0x237   : > { %4071 = vmatprep.subr.mxu0 %v1634_v60  ;;  %v1628_v60 = vld [vmem:[%s7601_s4 + $0x2c8] sm:$0xff] }
 0x257   : > { %v1437_v17 = vpop.f32.mrf.mxu1 }
 0x258   : > { %vm1518_vm11 = vcmp.gt.f32.partialorder %v1437_v17, 0.0  ;;  %v1527_v7 = vmul.f32 0.2, %v1437_v17 }
 0x259   : > { %v1439_v16 = vpop.f32.mrf.mxu1 }
 0x25a   : > { %v6532_v28 = vsel %vm1518_vm11, %v1437_v17, %v1527_v7  ;;  %v1528_v43 = vmul.f32 0.2, %v1439_v16  ;;  %vm1519_vm4 = vcmp.gt.f32.partialorder %v1439_v16, 0.0  ;;  %v1625_v17 = vld [vmem:[%s7601_s4 + $0x2b0] sm:$0xff] }
 0x25b   : > { %v4612_v14 = vpack.i.bf16 %v6532_v28, %v6530_v54  ;;  %v1577_v7 = vld [vmem:[%s7601_s4 + $0x130] sm:$0xff] }
 0x25c   : > { %v6538_v56 = vsel %vm1519_vm4, %v1439_v16, %v1528_v43  ;;  %v1622_v16 = vld [vmem:[%s7601_s4 + $0x298] sm:$0xff]  ;;  %v1619_v43 = vld [vmem:[%s7601_s4 + $0x280] sm:$0xff] }
 0x25d   : > { %4613 = vrot.lane.b32.xlu1 %v4612_v14, %s4648_s12  ;;  %4608 = vrot.lane.b32.xlu0 %v4612_v14, %s4649_s13 }
 0x260   : > { %v1508_v33 = vpop.f32.mrf.mxu0 }
 0x261   : > { %4618 = vrot.lane.b32.xlu0 %v4612_v14, %s4647_s11  ;;  %1958 = vrot.lane.b32.xlu1 %v6538_v56, %s4649_s13  ;;  %vm1520_vm3 = vcmp.gt.f32.partialorder %v1508_v33, 0.0  ;;  %v1529_v32 = vmul.f32 0.2, %v1508_v33  ;;  %v1574_v14 = vld [vmem:[%s7601_s4 + $0x118] sm:$0xff] }
 0x262   : > { %v4379_v45 = vpop.f32.mrf.mxu0 }
 0x263   : > { %v6543_v55 = vsel %vm1520_vm3, %v1508_v33, %v1529_v32  ;;  %v1571_v33 = vld [vmem:[%s7601_s4 + $0x100] sm:$0xff]  ;;  %v1616_v32 = vld [vmem:[%s7601_s4 + $0x268] sm:$0xff]  ;;  %vm3900_vm3 = vcmask 195584  }
 0x264   : > { %v1568_v45 = vld [vmem:[%s7601_s4 + $0xe8] sm:$0xff] }
 0x265   : > { %1992 = vrot.lane.b32.xlu1 %v6538_v56, %s4648_s12  ;;  %1960 = vrot.lane.b32.xlu0 %v6543_v55, %s4649_s13 }
 0x267   : > { %v4579_v25 = vpop.permute.xlu1 %4578 }
 0x268   : > { %v4581_v9 = vunpack.i.h.bf16 %v4579_v25  ;;  %v4580_v24 = vunpack.i.l.bf16 %v4579_v25  ;;  %v1613_v25 = vld [vmem:[%s7601_s4 + $0x250] sm:$0xff] }
 0x269   : > { %2026 = vrot.lane.b32.xlu1 %v6538_v56, %s4647_s11  ;;  %1994 = vrot.lane.b32.xlu0 %v6543_v55, %s4648_s12  ;;  %v4589_v40 = vpop.permute.xlu0 %4588 }
 0x26a   : > { %v4590_v41 = vunpack.i.l.bf16 %v4589_v40  ;;  %v6554_v15 = vsel %vm414_vm13, %v4580_v24, %v4581_v9  ;;  %v4591_v8 = vunpack.i.h.bf16 %v4589_v40  ;;  %v1562_v40 = vld [vmem:[%s7601_s4 + $0xb8] sm:$0xff] }
 0x26b   : > { %v4584_v39 = vpop.permute.xlu1 %4583  ;;  %2134 = vmatprep.mubr.f32.mxu1 %v6554_v15 }
 0x26c   : > { %v4586_v2 = vunpack.i.h.bf16 %v4584_v39  ;;  %v4585_v57 = vunpack.i.l.bf16 %v4584_v39  ;;  %v6558_v51 = vsel %vm414_vm13, %v4590_v41, %v4580_v24  ;;  %v6578_v62 = vsel %vm414_vm13, %v4581_v9, %v4591_v8  ;;  %v1565_v9 = vld [vmem:[%s7601_s4 + $0xd0] sm:$0xff]  ;;  %v1610_v24 = vld [vmem:[%s7601_s4 + $0x238] sm:$0xff]  ;;  %v1607_v41 = vld [vmem:[%s7601_s4 + $0x220] sm:$0xff] }
 0x26d   : > { %2028 = vrot.lane.b32.xlu0 %v6543_v55, %s4647_s11  ;;  %v4594_v13 = vpop.permute.xlu0 %4593  ;;  %2135 = vmatmul.mubr.f32.gmra.mxu1 %v6558_v51  ;;  %v1559_v39 = vld [vmem:[%s7601_s4 + $0xa0] sm:$0xff] }
 0x26e   : > { %v4595_v26 = vunpack.i.l.bf16 %v4594_v13  ;;  %v6564_v21 = vsel %vm557_vm1, %v4585_v57, %v4586_v2  ;;  %v4596_v29 = vunpack.i.h.bf16 %v4594_v13  ;;  %v1601_v13 = vld [vmem:[%s7601_s4 + $0x1f0] sm:$0xff] }
 0x26f   : > { %2140 = vmatprep.mubr.f32.mxu1 %v6564_v21 }
 0x270   : > { %v6568_v37 = vsel %vm557_vm1, %v4595_v26, %v4585_v57  ;;  %v6594_v20 = vsel %vm557_vm1, %v4586_v2, %v4596_v29  ;;  %v1604_v2 = vld [vmem:[%s7601_s4 + $0x208] sm:$0xff]  ;;  %v1553_v26 = vld [vmem:[%s7601_s4 + $0x70] sm:$0xff] }
 0x271   : > { %v4599_v18 = vpop.permute.xlu0 %4598  ;;  %2141 = vmatmul.mubr.f32.gmra.mxu1 %v6568_v37  ;;  %v1556_v57 = vld [vmem:[%s7601_s4 + $0x88] sm:$0xff] }
 0x272   : > { %v4601_v5 = vunpack.i.h.bf16 %v4599_v18  ;;  %v4600_v44 = vunpack.i.l.bf16 %v4599_v18  ;;  %v1598_v18 = vld [vmem:[%s7601_s4 + $0x1d8] sm:$0xff] }
 0x274   : > { %v6572_v35 = vsel %vm629_vm0, %v4600_v44, %v4601_v5 }
 0x275   : > { %2146 = vmatprep.mubr.f32.mxu1 %v6572_v35 }
 0x291   : > { %v6575_v10 = vpop.permute.xlu1 %1952  ;;  %v6580_v52 = vpop.permute.xlu0 %1986 }
 0x292   : > { %v6584_v53 = vsel %vm414_vm13, %v4591_v8, %v6575_v10  ;;  %v6588_v22 = vsel %vm557_vm1, %v4596_v29, %v6580_v52  ;;  %v1547_v8 = vld [vmem:[%s7601_s4 + $0x40] sm:$0xff]  ;;  %v1592_v29 = vld [vmem:[%s7601_s4 + $0x1a8] sm:$0xff] }
 0x293   : > { %2223 = vmatprep.mubr.f32.mxu0 %v6584_v53 }
 0x294   : > { %2224 = vmatmul.mubr.f32.gmra.mxu0 %v6578_v62 }
 0x295   : > { %v4604_v49 = vpop.permute.xlu1 %4603  ;;  %2229 = vmatprep.mubr.f32.mxu0 %v6588_v22 }
 0x296   : > { %v4606_v30 = vunpack.i.h.bf16 %v4604_v49  ;;  %v4605_v61 = vunpack.i.l.bf16 %v4604_v49  ;;  %v1544_v49 = vld [vmem:[%s7601_s4 + $0x28] sm:$0xff] }
 0x298   : > { %2230 = vmatmul.mubr.f32.gmra.mxu0 %v6594_v20  ;;  %v6598_v19 = vsel %vm629_vm0, %v4605_v61, %v4600_v44  ;;  %v6604_v6 = vsel %vm629_vm0, %v4601_v5, %v4606_v30  ;;  %v1550_v5 = vld [vmem:[%s7601_s4 + $0x58] sm:$0xff]  ;;  %v1595_v44 = vld [vmem:[%s7601_s4 + $0x1c0] sm:$0xff]  ;;  %v1541_v61 = vld [vmem:[%s7601_s4 + $0x10] sm:$0xff] }
 0x299   : > { %v6600_v34 = vpop.permute.xlu1 %2020  ;;  %2147 = vmatmul.mubr.f32.gmra.mxu1 %v6598_v19 }
 0x29a   : > { %2306 = vmatprep.mubr.f32.mxu1 %v6530_v54  ;;  %v6609_v63 = vsel %vm629_vm0, %v4606_v30, %v6600_v34  ;;  %v1589_v30 = vld [vmem:[%s7601_s4 + $0x190] sm:$0xff] }
 0x29b   : > { %2235 = vmatprep.mubr.f32.mxu0 %v6609_v63 }
 0x29c   : > { %2236 = vmatmul.mubr.f32.gmra.mxu0 %v6604_v6 }
 0x29d   : > { %2307 = vmatmul.mubr.f32.vlgmr.msra.gmra.mxu1 %v6441_v46  ;;  %2395 = vmatprep.mubr.f32.mxu0 %v6538_v56 }
 0x29e   : > { %4041 = vmatpush1.msk.msra.mxu1 %vm1051_vm8, %v1932_v4  ;;  %v1826_v4 = vld [vmem:[%s7601_s4 + $0x8f8] sm:$0xff] }
 0x29f   : > { %2446 = vmatprep.subr.mxu1 %v1930_v1 }
 0x2a0   : > { %2396 = vmatmul.mubr.f32.vlgmr.msra.gmra.mxu0 %v6532_v28  ;;  %2447 = vmatpush1.msra.mxu1 %v1929_v3 }
 0x2a1   : > { %4072 = vmatpush3.msra.mxu0 %v1586_v11  ;;  %2448 = vmatprep.subr.mxu1 %v1927_v31 }
 0x2a2   : > { %4073 = vmatprep.subr.mxu0 %v1631_v48  ;;  %2449 = vmatpush1.msra.mxu1 %v1926_v36 }
 0x2a3   : > { %4074 = vmatpush3.msra.mxu0 %v1583_v23  ;;  %2450 = vmatprep.subr.mxu1 %v1924_v0 }
 0x2a4   : > { %4075 = vmatprep.subr.mxu0 %v1628_v60  ;;  %2451 = vmatpush1.msra.mxu1 %v1923_v58 }
 0x2a5   : > { %4076 = vmatpush3.msra.mxu0 %v1580_v38  ;;  %4115 = vmatprep.subr.mxu1 %v1730_v50 }
 0x2a6   : > { %4077 = vmatprep.subr.mxu0 %v1625_v17 }
 0x2a7   : > { %4078 = vmatpush3.msra.mxu0 %v1577_v7 }
 0x2a8   : > { %4079 = vmatprep.subr.mxu0 %v1622_v16 }
 0x2a9   : > { %4080 = vmatpush3.msra.mxu0 %v1574_v14 }
 0x2aa   : > { %4081 = vmatprep.subr.mxu0 %v1619_v43 }
 0x2ab   : > { %4082 = vmatpush3.msra.mxu0 %v1571_v33 }
 0x2ac   : > { %4083 = vmatprep.subr.mxu0 %v1616_v32 }
 0x2ad   : > { %4084 = vmatpush3.msra.mxu0 %v1568_v45 }
 0x2ae   : > { %4085 = vmatprep.subr.mxu0 %v1613_v25 }
 0x2af   : > { %4086 = vmatpush3.msra.mxu0 %v1565_v9 }
 0x2b0   : > { %4087 = vmatprep.subr.mxu0 %v1610_v24 }
 0x2b1   : > { %4088 = vmatpush3.msra.mxu0 %v1562_v40  ;;  %v1727_v40 = vld [vmem:[%s7601_s4 + $0x5e0] sm:$0xff] }
 0x2b2   : > { %4089 = vmatprep.subr.mxu0 %v1607_v41 }
 0x2b3   : > { %4090 = vmatpush3.msra.mxu0 %v1559_v39  ;;  %v1679_v39 = vld [vmem:[%s7601_s4 + $0x460] sm:$0xff] }
 0x2b4   : > { %4091 = vmatprep.subr.mxu0 %v1604_v2 }
 0x2b5   : > { %4092 = vmatpush3.msra.mxu0 %v1556_v57  ;;  %v1724_v57 = vld [vmem:[%s7601_s4 + $0x5c8] sm:$0xff] }
 0x2b6   : > { %4093 = vmatprep.subr.mxu0 %v1601_v13  ;;  %v1676_v13 = vld [vmem:[%s7601_s4 + $0x448] sm:$0xff] }
 0x2b7   : > { %4094 = vmatpush3.msra.mxu0 %v1553_v26  ;;  %v1721_v26 = vld [vmem:[%s7601_s4 + $0x5b0] sm:$0xff] }
 0x2b8   : > { %4095 = vmatprep.subr.mxu0 %v1598_v18  ;;  %v1778_v18 = vld [vmem:[%s7601_s4 + $0x778] sm:$0xff] }
 0x2b9   : > { %4096 = vmatpush3.msra.mxu0 %v1550_v5  ;;  %v1673_v5 = vld [vmem:[%s7601_s4 + $0x430] sm:$0xff] }
 0x2ba   : > { %4097 = vmatprep.subr.mxu0 %v1595_v44  ;;  %v1823_v44 = vld [vmem:[%s7601_s4 + $0x8e0] sm:$0xff] }
 0x2bb   : > { %4098 = vmatpush3.msra.mxu0 %v1547_v8  ;;  %v1670_v8 = vld [vmem:[%s7601_s4 + $0x418] sm:$0xff] }
 0x2bc   : > { %4099 = vmatprep.subr.mxu0 %v1592_v29  ;;  %v1715_v29 = vld [vmem:[%s7601_s4 + $0x580] sm:$0xff] }
 0x2bd   : > { %4100 = vmatpush3.msra.mxu0 %v1544_v49  ;;  %v1820_v49 = vld [vmem:[%s7601_s4 + $0x8c8] sm:$0xff] }
 0x2be   : > { %4101 = vmatprep.subr.mxu0 %v1589_v30  ;;  %v1667_v30 = vld [vmem:[%s7601_s4 + $0x400] sm:$0xff] }
 0x2bf   : > { %4102 = vmatpush3.msra.mxu0 %v1541_v61  ;;  %v1712_v61 = vld [vmem:[%s7601_s4 + $0x568] sm:$0xff] }
 0x2c0   : > { %4159 = vmatprep.subr.mxu0 %v1826_v4  ;;  %v1817_v4 = vld [vmem:[%s7601_s4 + $0x8b0] sm:$0xff] }
 0x2cf   : > { %v4614_v1 = vpop.permute.xlu1 %4613  ;;  %v4609_v3 = vpop.permute.xlu0 %4608 }
 0x2d0   : > { %v4616_v11 = vunpack.i.h.bf16 %v4614_v1  ;;  %v4615_v31 = vunpack.i.l.bf16 %v4614_v1  ;;  %v4611_v48 = vunpack.i.h.bf16 %v4609_v3  ;;  %v4610_v36 = vunpack.i.l.bf16 %v4609_v3  ;;  %v1664_v1 = vld [vmem:[%s7601_s4 + $0x3e8] sm:$0xff]  ;;  %v1769_v3 = vld [vmem:[%s7601_s4 + $0x730] sm:$0xff] }
 0x2d2   : > { %v6738_v23 = vsel %vm414_vm13, %v4610_v36, %v4611_v48  ;;  %v6742_v0 = vsel %vm414_vm13, %v6575_v10, %v4610_v36  ;;  %v6747_v17 = vsel %vm557_vm1, %v4615_v31, %v4616_v11  ;;  %v6754_v16 = vsel %vm557_vm1, %v6580_v52, %v4615_v31  ;;  %v1661_v31 = vld [vmem:[%s7601_s4 + $0x3d0] sm:$0xff]  ;;  %v1811_v36 = vld [vmem:[%s7601_s4 + $0x880] sm:$0xff] }
 0x2d3   : > { %v1959_v60 = vpop.permute.xlu1 %1958  ;;  %v4619_v58 = vpop.permute.xlu0 %4618  ;;  %2312 = vmatprep.mubr.f32.mxu1 %v6738_v23 }
 0x2d4   : > { %v4621_v38 = vunpack.i.h.bf16 %v4619_v58  ;;  %v4620_v50 = vunpack.i.l.bf16 %v4619_v58  ;;  %2313 = vmatmul.mubr.f32.gmra.mxu1 %v6742_v0  ;;  %v6767_v33 = vsel %vm414_vm13, %v4611_v48, %v1959_v60  ;;  %v1706_v48 = vld [vmem:[%s7601_s4 + $0x538] sm:$0xff]  ;;  %v1703_v58 = vld [vmem:[%s7601_s4 + $0x520] sm:$0xff] }
 0x2d5   : > { %2318 = vmatprep.mubr.f32.mxu1 %v6747_v17 }
 0x2d6   : > { %v6758_v14 = vsel %vm629_vm0, %v4620_v50, %v4621_v38  ;;  %v6774_v32 = vsel %vm629_vm0, %v6600_v34, %v4620_v50  ;;  %v1682_v34 = vld [vmem:[%s7601_s4 + $0x478] sm:$0xff]  ;;  %v1760_v50 = vld [vmem:[%s7601_s4 + $0x6e8] sm:$0xff] }
 0x2d7   : > { %v6750_v7 = vpop.permute.xlu0 %1960  ;;  %v1993_v10 = vpop.permute.xlu1 %1992 }
 0x2d8   : > { %2319 = vmatmul.mubr.f32.gmra.mxu1 %v6754_v16  ;;  %v6762_v43 = vsel %vm414_vm13, %v1959_v60, %v6750_v7  ;;  %v6783_v25 = vsel %vm557_vm1, %v4616_v11, %v1993_v10  ;;  %v1814_v11 = vld [vmem:[%s7601_s4 + $0x898] sm:$0xff] }
 0x2d9   : > { %2324 = vmatprep.mubr.f32.mxu1 %v6758_v14  ;;  %2401 = vmatprep.mubr.f32.mxu0 %v6762_v43  ;;  %v1658_v60 = vld [vmem:[%s7601_s4 + $0x3b8] sm:$0xff] }
 0x2da   : > { %2402 = vmatmul.mubr.f32.gmra.mxu0 %v6767_v33 }
 0x2db   : > { %v6770_v52 = vpop.permute.xlu0 %1994  ;;  %v2027_v9 = vpop.permute.xlu1 %2026 }
 0x2dc   : > { %2325 = vmatmul.mubr.f32.gmra.mxu1 %v6774_v32  ;;  %v6779_v45 = vsel %vm557_vm1, %v1993_v10, %v6770_v52  ;;  %v6806_v2 = vsel %vm629_vm0, %v4621_v38, %v2027_v9  ;;  %v1655_v38 = vld [vmem:[%s7601_s4 + $0x3a0] sm:$0xff]  ;;  %v1805_v10 = vld [vmem:[%s7601_s4 + $0x850] sm:$0xff]  ;;  %vm3112_vm1 = vcmask 736256  }
 0x2dd   : > { %2407 = vmatprep.mubr.f32.mxu0 %v6779_v45  ;;  %2484 = vmatprep.mubr.f32.mxu1 %v7634_v12 }
 0x2de   : > { %2408 = vmatmul.mubr.f32.gmra.mxu0 %v6783_v25 }
 0x2df   : > { %v6790_v24 = vpop.permute.xlu0 %2028 }
 0x2e0   : > { %4042 = vmatmul.mubr.msk.f32.vlgmr.msra.gmra.mxu1 %vm2046_vm5, %v6543_v55  ;;  %v6799_v41 = vsel %vm629_vm0, %v2027_v9, %v6790_v24  ;;  %v1652_v9 = vld [vmem:[%s7601_s4 + $0x388] sm:$0xff]  ;;  %vm7654_vm0 = vmmov 0  }
 0x2e1   : > { %4116 = vmatpush3.msra.mxu1 %v1682_v34  ;;  %2413 = vmatprep.mubr.f32.mxu0 %v6799_v41  ;;  %v1757_v34 = vld [vmem:[%s7601_s4 + $0x6d0] sm:$0xff] }
 0x2e2   : > { %4117 = vmatprep.subr.mxu1 %v1727_v40  ;;  %2414 = vmatmul.mubr.f32.gmra.mxu0 %v6806_v2  ;;  %v1697_v40 = vld [vmem:[%s7601_s4 + $0x4f0] sm:$0xff] }
 0x2e3   : > { %4118 = vmatpush3.msra.mxu1 %v1679_v39  ;;  %2490 = vmatprep.mubr.f32.mxu1 %v7634_v12  ;;  %v1649_v39 = vld [vmem:[%s7601_s4 + $0x370] sm:$0xff] }
 0x2e4   : > { %2573 = vmatprep.mubr.f32.mxu0 %v6086_v47  ;;  %4119 = vmatprep.subr.mxu1 %v1724_v57  ;;  %v1718_v47 = vld [vmem:[%s7601_s4 + $0x598] sm:$0xff] }
 0x2e5   : > { %4043 = vmatmul.mubr.msk.f32.gmra.mxu1 %vm2046_vm5, %v6750_v7  ;;  %v1754_v57 = vld [vmem:[%s7601_s4 + $0x6b8] sm:$0xff] }
 0x2e6   : > { %4120 = vmatpush3.msra.mxu1 %v1676_v13  ;;  %2574 = vmatmul.mubr.f32.vlgmr.msra.gmra.mxu0 %v6091_v42  ;;  %v1775_v42 = vld [vmem:[%s7601_s4 + $0x760] sm:$0xff]  ;;  %v1694_v13 = vld [vmem:[%s7601_s4 + $0x4d8] sm:$0xff] }
 0x2e7   : > { %4121 = vmatprep.subr.mxu1 %v1721_v26  ;;  %4160 = vmatpush3.msra.mxu0 %v1778_v18  ;;  %v1799_v26 = vld [vmem:[%s7601_s4 + $0x820] sm:$0xff]  ;;  %v1646_v18 = vld [vmem:[%s7601_s4 + $0x358] sm:$0xff] }
 0x2e8   : > { %4122 = vmatpush3.msra.mxu1 %v1673_v5  ;;  %2496 = vmatprep.mubr.f32.mxu1 %v7634_v12  ;;  %v1691_v5 = vld [vmem:[%s7601_s4 + $0x4c0] sm:$0xff] }
 0x2e9   : > { %2578 = vmatprep.mubr.f32.mxu0 %v6554_v15  ;;  %4123 = vmatprep.subr.mxu1 %v1718_v47  ;;  %v1772_v15 = vld [vmem:[%s7601_s4 + $0x748] sm:$0xff] }
 0x2ea   : > { %4161 = vmatprep.subr.mxu0 %v1823_v44  ;;  %4044 = vmatmul.mubr.msk.f32.gmra.mxu1 %vm2046_vm5, %v6770_v52  ;;  %v1796_v47 = vld [vmem:[%s7601_s4 + $0x808] sm:$0xff]  ;;  %v1643_v44 = vld [vmem:[%s7601_s4 + $0x340] sm:$0xff] }
 0x2eb   : > { %4124 = vmatpush3.msra.mxu1 %v1670_v8  ;;  %4162 = vmatpush3.msra.mxu0 %v1775_v42  ;;  %v1748_v8 = vld [vmem:[%s7601_s4 + $0x688] sm:$0xff] }
 0x2ec   : > { %4125 = vmatprep.subr.mxu1 %v1715_v29  ;;  %4163 = vmatprep.subr.mxu0 %v1820_v49  ;;  %v1688_v42 = vld [vmem:[%s7601_s4 + $0x4a8] sm:$0xff]  ;;  %v1793_v29 = vld [vmem:[%s7601_s4 + $0x7f0] sm:$0xff] }
 0x2ed   : > { %2579 = vmatmul.mubr.f32.gmra.mxu0 %v6558_v51  ;;  %4126 = vmatpush3.msra.mxu1 %v1667_v30  ;;  %v1709_v51 = vld [vmem:[%s7601_s4 + $0x550] sm:$0xff]  ;;  %v1640_v49 = vld [vmem:[%s7601_s4 + $0x328] sm:$0xff] }
 0x2ee   : > { %4164 = vmatpush3.msra.mxu0 %v1772_v15  ;;  %2502 = vmatprep.mubr.f32.mxu1 %v7634_v12  ;;  %v1745_v30 = vld [vmem:[%s7601_s4 + $0x670] sm:$0xff] }
 0x2ef   : > { %2583 = vmatprep.mubr.f32.mxu0 %v6564_v21  ;;  %4127 = vmatprep.subr.mxu1 %v1712_v61  ;;  %v1766_v21 = vld [vmem:[%s7601_s4 + $0x718] sm:$0xff]  ;;  %v1685_v15 = vld [vmem:[%s7601_s4 + $0x490] sm:$0xff] }
 0x2f0   : > { %4165 = vmatprep.subr.mxu0 %v1817_v4  ;;  %4045 = vmatmul.mubr.msk.f32.gmra.mxu1 %vm2046_vm5, %v6790_v24  ;;  %v1790_v61 = vld [vmem:[%s7601_s4 + $0x7d8] sm:$0xff]  ;;  %v1637_v4 = vld [vmem:[%s7601_s4 + $0x310] sm:$0xff] }
 0x2f1   : > { %4128 = vmatpush3.msra.mxu1 %v1664_v1  ;;  %4166 = vmatpush3.msra.mxu0 %v1769_v3  ;;  %v1742_v1 = vld [vmem:[%s7601_s4 + $0x658] sm:$0xff]  ;;  %v1787_v3 = vld [vmem:[%s7601_s4 + $0x7c0] sm:$0xff] }
 0x2f2   : > { %4129 = vmatprep.subr.mxu1 %v1709_v51  ;;  %2658 = vmatprep.mubr.f32.mxu1 %v6192_v59  ;;  %v1763_v59 = vld [vmem:[%s7601_s4 + $0x700] sm:$0xff]  ;;  %v1922_v51 = vld [vmem:[%s7601_s4 + $0xbf8] sm:$0xff] }
 0x2f3   : > { %4167 = vmatprep.subr.mxu0 %v1814_v11  ;;  %2584 = vmatmul.mubr.f32.gmra.mxu0 %v6568_v37  ;;  %v1808_v37 = vld [vmem:[%s7601_s4 + $0x868] sm:$0xff]  ;;  %v1739_v11 = vld [vmem:[%s7601_s4 + $0x640] sm:$0xff] }
 0x2f4   : > { %4130 = vmatpush3.msra.mxu1 %v1661_v31  ;;  %4168 = vmatpush3.msra.mxu0 %v1766_v21  ;;  %v1874_v31 = vld [vmem:[%s7601_s4 + $0xa78] sm:$0xff]  ;;  %v1784_v21 = vld [vmem:[%s7601_s4 + $0x7a8] sm:$0xff] }
 0x2f5   : > { %2588 = vmatprep.mubr.f32.mxu0 %v6572_v35  ;;  %4131 = vmatprep.subr.mxu1 %v1706_v48  ;;  %v1700_v35 = vld [vmem:[%s7601_s4 + $0x508] sm:$0xff]  ;;  %v1919_v48 = vld [vmem:[%s7601_s4 + $0xbe0] sm:$0xff] }
 0x2f6   : > { %4169 = vmatprep.subr.mxu0 %v1811_v36  ;;  %4132 = vmatpush3.msra.mxu1 %v1658_v60  ;;  %v1736_v36 = vld [vmem:[%s7601_s4 + $0x628] sm:$0xff]  ;;  %v1781_v60 = vld [vmem:[%s7601_s4 + $0x790] sm:$0xff] }
 0x2f7   : > { %4170 = vmatpush3.msra.mxu0 %v1763_v59  ;;  %4133 = vmatprep.subr.mxu1 %v1703_v58  ;;  %v1916_v59 = vld [vmem:[%s7601_s4 + $0xbc8] sm:$0xff] }
 0x2f8   : > { %4171 = vmatprep.subr.mxu0 %v1808_v37  ;;  %2589 = vmatmul.mubr.f32.gmra.mxu0 %v6598_v19  ;;  %v1802_v19 = vld [vmem:[%s7601_s4 + $0x838] sm:$0xff]  ;;  %v1868_v58 = vld [vmem:[%s7601_s4 + $0xa48] sm:$0xff]  ;;  %v1913_v37 = vld [vmem:[%s7601_s4 + $0xbb0] sm:$0xff] }
 0x2f9   : > { %4134 = vmatpush3.msra.mxu1 %v1655_v38  ;;  %4172 = vmatpush3.msra.mxu0 %v1760_v50  ;;  %v1865_v38 = vld [vmem:[%s7601_s4 + $0xa30] sm:$0xff]  ;;  %v1934_v50 = vld [vmem:[%s7601_s4 + $0xc58] sm:$0xf] }
 0x2fa   : > { %4135 = vmatprep.subr.mxu1 %v1700_v35  ;;  %4173 = vmatprep.subr.mxu0 %v1805_v10  ;;  %v1907_v35 = vld [vmem:[%s7601_s4 + $0xb80] sm:$0xff]  ;;  %v1856_v10 = vld [vmem:[%s7601_s4 + $0x9e8] sm:$0xff] }
 0x2fb   : > { %2743 = vmatprep.mubr.f32.mxu0 %v6530_v54  ;;  %4136 = vmatpush3.msra.mxu1 %v1652_v9  ;;  %v1751_v54 = vld [vmem:[%s7601_s4 + $0x6a0] sm:$0xff] }
 0x2fc   : > { %4174 = vmatpush3.msra.mxu0 %v1757_v34  ;;  %4137 = vmatprep.subr.mxu1 %v1697_v40  ;;  %v1847_v9 = vld [vmem:[%s7601_s4 + $0x9a0] sm:$0xff]  ;;  %v1925_v34 = vld [vmem:[%s7601_s4 + $0xc10] sm:$0xff]  ;;  %v1844_v40 = vld [vmem:[%s7601_s4 + $0x988] sm:$0xff] }
 0x2fd   : > { %4175 = vmatprep.subr.mxu0 %v1802_v19  ;;  %4138 = vmatpush3.msra.mxu1 %v1649_v39  ;;  %v1889_v19 = vld [vmem:[%s7601_s4 + $0xaf0] sm:$0xff]  ;;  %v1886_v39 = vld [vmem:[%s7601_s4 + $0xad8] sm:$0xff] }
 0x2fe   : > { %4176 = vmatpush3.msra.mxu0 %v1754_v57  ;;  %4139 = vmatprep.subr.mxu1 %v1694_v13  ;;  %v1838_v57 = vld [vmem:[%s7601_s4 + $0x958] sm:$0xff]  ;;  %v1835_v13 = vld [vmem:[%s7601_s4 + $0x940] sm:$0xff] }
 0x2ff   : > { %4177 = vmatprep.subr.mxu0 %v1799_v26  ;;  %4140 = vmatpush3.msra.mxu1 %v1646_v18  ;;  %v1880_v26 = vld [vmem:[%s7601_s4 + $0xaa8] sm:$0xff]  ;;  %v1829_v18 = vld [vmem:[%s7601_s4 + $0x910] sm:$0xff] }
 0x300   : > { %4178 = vmatpush3.msra.mxu0 %v1751_v54  ;;  %4141 = vmatprep.subr.mxu1 %v1691_v5  ;;  %v2219_v5 = vpop.f32.mrf.mxu0 }
 0x301   : > { %4179 = vmatprep.subr.mxu0 %v1796_v47  ;;  %4142 = vmatpush3.msra.mxu1 %v1643_v44 }
 0x302   : > { %4180 = vmatpush3.msra.mxu0 %v1748_v8  ;;  %4143 = vmatprep.subr.mxu1 %v1688_v42  ;;  %v2221_v44 = vpop.f32.mrf.mxu0 }
 0x303   : > { %4181 = vmatprep.subr.mxu0 %v1793_v29  ;;  %4144 = vmatpush3.msra.mxu1 %v1640_v49 }
 0x304   : > { %4182 = vmatpush3.msra.mxu0 %v1745_v30  ;;  %4145 = vmatprep.subr.mxu1 %v1685_v15 }
 0x305   : > { %4183 = vmatprep.subr.mxu0 %v1790_v61  ;;  %4146 = vmatpush3.msra.mxu1 %v1637_v4 }
 0x306   : > { %4184 = vmatpush3.msra.mxu0 %v1742_v1  ;;  %2659 = vmatmul.mubr.f32.vlgmr.msra.gmra.mxu1 %v6185_v27  ;;  %v1871_v27 = vld [vmem:[%s7601_s4 + $0xa60] sm:$0xff] }
 0x307   : > { %4185 = vmatprep.subr.mxu0 %v1787_v3  ;;  %4203 = vmatprep.subr.mxu1 %v1922_v51 }
 0x308   : > { %2663 = vmatprep.mubr.f32.mxu1 %v6584_v53  ;;  %4186 = vmatpush3.msra.mxu0 %v1739_v11  ;;  %v1733_v53 = vld [vmem:[%s7601_s4 + $0x610] sm:$0xff] }
 0x309   : > { %4204 = vmatpush3.msra.mxu1 %v1874_v31  ;;  %4187 = vmatprep.subr.mxu0 %v1784_v21 }
 0x30a   : > { %4205 = vmatprep.subr.mxu1 %v1919_v48  ;;  %4188 = vmatpush3.msra.mxu0 %v1736_v36 }
 0x30b   : > { %4206 = vmatpush3.msra.mxu1 %v1871_v27  ;;  %4189 = vmatprep.subr.mxu0 %v1781_v60 }
 0x30c   : > { %2664 = vmatmul.mubr.f32.gmra.mxu1 %v6578_v62  ;;  %4207 = vmatprep.subr.mxu1 %v1916_v59  ;;  %v1910_v62 = vld [vmem:[%s7601_s4 + $0xb98] sm:$0xff] }
 0x30d   : > { %2668 = vmatprep.mubr.f32.mxu1 %v6588_v22  ;;  %4190 = vmatpush3.msra.mxu0 %v1733_v53  ;;  %v1862_v22 = vld [vmem:[%s7601_s4 + $0xa18] sm:$0xff] }
 0x30e   : > { %4208 = vmatpush3.msra.mxu1 %v1868_v58  ;;  %2744 = vmatmul.mubr.f32.vlgmr.msra.gmra.mxu0 %v6441_v46  ;;  %v1859_v46 = vld [vmem:[%s7601_s4 + $0xa00] sm:$0xff] }
 0x30f   : > { %4209 = vmatprep.subr.mxu1 %v1913_v37  ;;  %2748 = vmatprep.mubr.f32.mxu0 %v6738_v23  ;;  %v1904_v23 = vld [vmem:[%s7601_s4 + $0xb68] sm:$0xff] }
 0x310   : > { %4210 = vmatpush3.msra.mxu1 %v1865_v38  ;;  %4380 = vmatprep.subr.msk.mxu0 %vm1051_vm8, %v1934_v50 }
 0x311   : > { %2669 = vmatmul.mubr.f32.gmra.mxu1 %v6594_v20  ;;  %4211 = vmatprep.subr.mxu1 %v1910_v62  ;;  %v1901_v20 = vld [vmem:[%s7601_s4 + $0xb50] sm:$0xff] }
 0x312   : > { %2673 = vmatprep.mubr.f32.mxu1 %v6609_v63  ;;  %4212 = vmatpush3.msra.mxu1 %v1862_v22  ;;  %v1853_v63 = vld [vmem:[%s7601_s4 + $0x9d0] sm:$0xff] }
 0x313   : > { %2749 = vmatmul.mubr.f32.gmra.mxu0 %v6742_v0  ;;  %4213 = vmatprep.subr.mxu1 %v1907_v35  ;;  %v1898_v0 = vld [vmem:[%s7601_s4 + $0xb38] sm:$0xff] }
 0x314   : > { %2753 = vmatprep.mubr.f32.mxu0 %v6747_v17  ;;  %4214 = vmatpush3.msra.mxu1 %v1859_v46  ;;  %v1931_v17 = vld [vmem:[%s7601_s4 + $0xc40] sm:$0xff] }
 0x315   : > { %2674 = vmatmul.mubr.f32.gmra.mxu1 %v6604_v6  ;;  %4215 = vmatprep.subr.mxu1 %v1904_v23  ;;  %v1850_v6 = vld [vmem:[%s7601_s4 + $0x9b8] sm:$0xff] }
 0x316   : > { %4216 = vmatpush3.msra.mxu1 %v1856_v10  ;;  %2828 = vmatprep.mubr.f32.mxu1 %v6538_v56  ;;  %v1895_v56 = vld [vmem:[%s7601_s4 + $0xb20] sm:$0xff] }
 0x317   : > { %2754 = vmatmul.mubr.f32.gmra.mxu0 %v6754_v16  ;;  %4217 = vmatprep.subr.mxu1 %v1901_v20  ;;  %v1928_v16 = vld [vmem:[%s7601_s4 + $0xc28] sm:$0xff] }
 0x318   : > { %2758 = vmatprep.mubr.f32.mxu0 %v6758_v14  ;;  %4218 = vmatpush3.msra.mxu1 %v1853_v63  ;;  %v1892_v14 = vld [vmem:[%s7601_s4 + $0xb08] sm:$0xff] }
 0x319   : > { %4381 = vmatpush3.msk.msra.mxu0 %vm1051_vm8, %v1934_v50  ;;  %4219 = vmatprep.subr.mxu1 %v1898_v0 }
 0x31a   : > { %4382 = vmatprep.subr.mxu0 %v1931_v17  ;;  %4220 = vmatpush3.msra.mxu1 %v1850_v6 }
 0x31b   : > { %4383 = vmatpush3.msra.mxu0 %v1931_v17  ;;  %4221 = vmatprep.subr.mxu1 %v1895_v56 }
 0x31c   : > { %2759 = vmatmul.mubr.f32.gmra.mxu0 %v6774_v32  ;;  %4384 = vmatprep.subr.mxu0 %v1928_v16  ;;  %v1841_v32 = vld [vmem:[%s7601_s4 + $0x970] sm:$0xff] }
 0x31d   : > { %4222 = vmatpush3.msra.mxu1 %v1847_v9  ;;  %4385 = vmatpush3.msra.mxu0 %v1928_v16 }
 0x31e   : > { %4388 = vmatprep.mubr.msk.f32.mxu0 %vm2046_vm5, %v6543_v55  ;;  %4223 = vmatprep.subr.mxu1 %v1892_v14  ;;  %v1883_v55 = vld [vmem:[%s7601_s4 + $0xac0] sm:$0xff] }
 0x31f   : > { %4386 = vmatprep.subr.mxu0 %v1925_v34  ;;  %4224 = vmatpush3.msra.mxu1 %v1844_v40 }
 0x320   : > { %4387 = vmatpush3.msra.mxu0 %v1925_v34  ;;  %4225 = vmatprep.subr.mxu1 %v1889_v19 }
 0x321   : > { %4389 = vmatmul.mubr.msk.f32.vlgmr.msra.gmra.mxu0 %vm2046_vm5, %v6750_v7  ;;  %4226 = vmatpush3.msra.mxu1 %v1841_v32  ;;  %v1832_v7 = vld [vmem:[%s7601_s4 + $0x928] sm:$0xff] }
 0x322   : > { %4391 = vmatprep.mubr.msk.f32.mxu0 %vm2046_vm5, %v6770_v52  ;;  %4227 = vmatprep.subr.mxu1 %v1886_v39  ;;  %v1877_v52 = vld [vmem:[%s7601_s4 + $0xa90] sm:$0xff] }
 0x323   : > { %4228 = vmatpush3.msra.mxu1 %v1838_v57  ;;  %4394 = vmatprep.subr.mxu0 %v7634_v12 }
 0x324   : > { %4229 = vmatprep.subr.mxu1 %v1883_v55 }
 0x325   : > { %4392 = vmatmul.mubr.msk.f32.gmra.mxu0 %vm2046_vm5, %v6790_v24  ;;  %4230 = vmatpush3.msra.mxu1 %v1835_v13  ;;  %v2130_v24 = vpop.f32.mrf.mxu1 }
 0x326   : > { %4231 = vmatprep.subr.mxu1 %v1880_v26  ;;  %4426 = vmatprep.mubr.msk.f32.mxu0 %vm7654_vm0, %v7634_v12  ;;  %v2220_v11 = vadd.f32 %v2219_v5, %v2130_v24 }
 0x327   : > { %4232 = vmatpush3.msra.mxu1 %v1832_v7  ;;  %v2132_v54 = vpop.f32.mrf.mxu1 }
 0x328   : > { %4233 = vmatprep.subr.mxu1 %v1877_v52  ;;  %v2222_v20 = vadd.f32 %v2221_v44, %v2132_v54 }
 0x329   : > { %4234 = vmatpush3.msra.mxu1 %v1829_v18 }
 0x32a   : > { %2829 = vmatmul.mubr.f32.vlgmr.msra.gmra.mxu1 %v6532_v28 }
 0x32b   : > { %2833 = vmatprep.mubr.f32.mxu1 %v6762_v43 }
 0x32d   : > { %v2136_v47 = vpop.f32.mrf.mxu1 }
 0x32e   : > { %2834 = vmatmul.mubr.f32.gmra.mxu1 %v6767_v33 }
 0x32f   : > { %2838 = vmatprep.mubr.f32.mxu1 %v6779_v45  ;;  %v2138_v28 = vpop.f32.mrf.mxu1 }
 0x331   : > { %v7149_v43 = vpop.f32.mrf.mxu1 }
 0x332   : > { %2839 = vmatmul.mubr.f32.gmra.mxu1 %v6783_v25 }
 0x333   : > { %2843 = vmatprep.mubr.f32.mxu1 %v6799_v41  ;;  %v7151_v42 = vpop.f32.mrf.mxu1 }
 0x336   : > { %2844 = vmatmul.mubr.f32.gmra.mxu1 %v6806_v2 }
 0x337   : > { %3187 = vmatprep.mubr.f32.mxu1 %v7634_v12 }
 0x354   : > { %v2225_v8 = vpop.f32.mrf.mxu0 }
 0x355   : > { %v2226_v53 = vadd.f32 %v2225_v8, %v2136_v47 }
 0x356   : > { %v2227_v33 = vpop.f32.mrf.mxu0 }
 0x357   : > { %v2228_v6 = vadd.f32 %v2227_v33, %v2138_v28 }
 0x358   : > { %v2231_v45 = vpop.f32.mrf.mxu0 }
 0x359   : > { %v7153_v25 = vpop.f32.mrf.mxu1  ;;  %v2232_v39 = vadd.f32 %v2231_v45, %v7149_v43 }
 0x35a   : > { %v7155_v41 = vpop.f32.mrf.mxu0 }
 0x35b   : > { %v7157_v2 = vpop.f32.mrf.mxu1  ;;  %v2234_v5 = vadd.f32 %v7155_v41, %v7151_v42 }
 0x35c   : > { %v7159_v29 = vpop.f32.mrf.mxu0 }
 0x35d   : > { %v2308_v49 = vpop.f32.mrf.mxu1  ;;  %v2238_v52 = vadd.f32 %v7159_v29, %v7153_v25 }
 0x35e   : > { %v7161_v30 = vpop.f32.mrf.mxu0  ;;  %v2309_v48 = vadd.f32 %v2308_v49, %v2220_v11 }
 0x35f   : > { %v2310_v15 = vpop.f32.mrf.mxu1  ;;  %v2240_v42 = vadd.f32 %v7161_v30, %v7157_v2 }
 0x360   : > { %v2397_v61 = vpop.f32.mrf.mxu0  ;;  %v2311_v63 = vadd.f32 %v2310_v15, %v2222_v20 }
 0x361   : > { %v2398_v59 = vadd.f32 %v2397_v61, %v2309_v48 }
 0x362   : > { %v2399_v3 = vpop.f32.mrf.mxu0 }
 0x363   : > { %v2400_v17 = vadd.f32 %v2399_v3, %v2311_v63 }
 0x394   : > { %v2314_v4 = vpop.f32.mrf.mxu1 }
 0x395   : > { %v2315_v50 = vadd.f32 %v2314_v4, %v2226_v53 }
 0x396   : > { %v2316_v1 = vpop.f32.mrf.mxu1 }
 0x397   : > { %v2317_v9 = vadd.f32 %v2316_v1, %v2228_v6 }
 0x398   : > { %v2320_v51 = vpop.f32.mrf.mxu1 }
 0x399   : > { %v2321_v13 = vadd.f32 %v2320_v51, %v2232_v39 }
 0x39a   : > { %v7163_v31 = vpop.f32.mrf.mxu1  ;;  %v2403_v21 = vpop.f32.mrf.mxu0 }
 0x39b   : > { %v2404_v22 = vadd.f32 %v2403_v21, %v2315_v50  ;;  %v2323_v8 = vadd.f32 %v7163_v31, %v2234_v5 }
 0x39c   : > { %v2326_v36 = vpop.f32.mrf.mxu1  ;;  %v2405_v27 = vpop.f32.mrf.mxu0 }
 0x39d   : > { %v2406_v34 = vadd.f32 %v2405_v27, %v2317_v9  ;;  %v2327_v54 = vadd.f32 %v2326_v36, %v2238_v52 }
 0x39e   : > { %v7165_v60 = vpop.f32.mrf.mxu1  ;;  %v2409_v58 = vpop.f32.mrf.mxu0 }
 0x39f   : > { %v2410_v26 = vadd.f32 %v2409_v58, %v2321_v13  ;;  %v2329_v41 = vadd.f32 %v7165_v60, %v2240_v42 }
 0x3a0   : > { %v2486_v37 = vpop.f32.mrf.mxu1  ;;  %v2411_v35 = vpop.f32.mrf.mxu0 }
 0x3a1   : > { %v2487_v38 = vadd.f32 %v2486_v37, %v2398_v59  ;;  %v2412_v33 = vadd.f32 %v2411_v35, %v2323_v8 }
 0x3a2   : > { %v2488_v62 = vpop.f32.mrf.mxu1  ;;  %v2415_v10 = vpop.f32.mrf.mxu0 }
 0x3a3   : > { %3106 = vrot.lane.b32.xlu1 %v2487_v38, %s4657_s9  ;;  %v2489_v16 = vadd.f32 %v2488_v62, %v2400_v17  ;;  %v2416_v44 = vadd.f32 %v2415_v10, %v2327_v54 }
 0x3a4   : > { %v2417_v0 = vpop.f32.mrf.mxu0 }
 0x3a5   : > { %v2492_v46 = vpop.f32.mrf.mxu1  ;;  %v2418_v49 = vadd.f32 %v2417_v0, %v2329_v41 }
 0x3a6   : > { %v2493_v23 = vadd.f32 %v2492_v46, %v2404_v22  ;;  %v7173_v56 = vpop.f32.mrf.mxu0 }
 0x3a7   : > { %3083 = vrot.lane.b32.xlu1 %v2487_v38, %s4658_s10  ;;  %v2494_v14 = vpop.f32.mrf.mxu1 }
 0x3a8   : > { %3095 = vrot.lane.b32.xlu0 %v2493_v23, %s4658_s10  ;;  %v7177_v40 = vpop.f32.mrf.mxu0  ;;  %v2495_v19 = vadd.f32 %v2494_v14, %v2406_v34 }
 0x3aa   : > { %v2498_v57 = vpop.f32.mrf.mxu1 }
 0x3ab   : > { %3016 = vrot.lane.b32.xlu1 %v2487_v38, %s4659_s15  ;;  %v7193_v24 = vadd.f32 %v2498_v57, %v2410_v26 }
 0x3ac   : > { %3072 = vrot.lane.b32.xlu0 %v2493_v23, %s4650_s14  ;;  %v2500_v7 = vpop.f32.mrf.mxu1 }
 0x3ad   : > { %v7181_v32 = vpop.f32.mrf.mxu0  ;;  %v7213_v25 = vadd.f32 %v2500_v7, %v2412_v33 }
 0x3af   : > { %2993 = vrot.lane.b32.xlu1 %v2487_v38, %s4660_s17  ;;  %v4107_v55 = vpop.f32.mrf.mxu0  ;;  %v4105_v38 = vadd.f32 %v7177_v40, %v7173_v56 }
 0x3b0   : > { %3005 = vrot.lane.b32.xlu0 %v2493_v23, %s4660_s17  ;;  %v2504_v47 = vpop.f32.mrf.mxu1  ;;  %v4108_v10 = vadd.f32 %v4107_v55, %v7181_v32 }
 0x3b1   : > { %v7203_v43 = vadd.f32 %v2504_v47, %v2416_v44 }
 0x3b2   : > { %v2506_v29 = vpop.f32.mrf.mxu1 }
 0x3b3   : > { %3108 = vrot.lane.b32.xlu1 %v2489_v16, %s4657_s9  ;;  %v7190_v18 = vpop.f32.mrf.mxu0  ;;  %v7220_v2 = vadd.f32 %v2506_v29, %v2418_v49 }
 0x3b4   : > { %2978 = vrot.lane.b32.xlu0 %v2493_v23, %s4661_s18 }
 0x3b5   : > { %v7199_v28 = vpop.f32.mrf.mxu0 }
 0x3b6   : > { %v4111_v32 = vadd.f32 %v7199_v28, %v7190_v18 }
 0x3b7   : > { %3085 = vrot.lane.b32.xlu1 %v2489_v16, %s4658_s10 }
 0x3b8   : > { %3097 = vrot.lane.b32.xlu0 %v2495_v19, %s4658_s10  ;;  %v7209_v45 = vpop.f32.mrf.mxu0 }
 0x3ba   : > { %v4113_v15 = vpop.f32.mrf.mxu0 }
 0x3bb   : > { %3018 = vrot.lane.b32.xlu1 %v2489_v16, %s4659_s15  ;;  %v4114_v44 = vadd.f32 %v4113_v15, %v7209_v45  ;;  %v4662_v15 = vmov 0  }
 0x3bc   : > { %3074 = vrot.lane.b32.xlu0 %v2495_v19, %s4650_s14  ;;  %4638 = vset.pattern.permute.xlu1 %v4662_v15 }
 0x3bd   : > { %4622 = vset.pattern.permute.xlu0 %v4662_v15 }
 0x3bf   : > { %2995 = vrot.lane.b32.xlu1 %v2489_v16, %s4660_s17 }
 0x3c0   : > { %3007 = vrot.lane.b32.xlu0 %v2495_v19, %s4660_s17 }
 0x3c3   : > { %3061 = vrot.lane.b32.xlu1 %v7193_v24, %s4659_s15 }
 0x3c4   : > { %2980 = vrot.lane.b32.xlu0 %v2495_v19, %s4661_s18 }
 0x3c6   : > { %v4147_v61 = vpop.f32.mrf.mxu1 }
 0x3c7   : > { %3039 = vrot.lane.b32.xlu1 %v7193_v24, %s4660_s17 }
 0x3c8   : > { %3050 = vrot.lane.b32.xlu0 %v7203_v43, %s4660_s17  ;;  %v4148_v4 = vpop.f32.mrf.mxu1 }
 0x3c9   : > { %v4149_v53 = vadd.f32 %v4148_v4, %v4147_v61  ;;  %v2935_v4 = vld [vmem:[%s7600_s3] sm:$0xff] }
 0x3cb   : > { %3063 = vrot.lane.b32.xlu1 %v7213_v25, %s4659_s15  ;;  %v2661_v22 = vadd.f32 %v4149_v53, %v4105_v38 }
 0x3cc   : > { %3028 = vrot.lane.b32.xlu0 %v7203_v43, %s4661_s18  ;;  %v4150_v3 = vpop.f32.mrf.mxu1 }
 0x3ce   : > { %v4191_v30 = vpop.f32.mrf.mxu0  ;;  %v4151_v11 = vpop.f32.mrf.mxu1 }
 0x3cf   : > { %3041 = vrot.lane.b32.xlu1 %v7213_v25, %s4660_s17  ;;  %v4152_v35 = vadd.f32 %v4151_v11, %v4150_v3 }
 0x3d0   : > { %v4192_v1 = vpop.f32.mrf.mxu0  ;;  %3052 = vrot.lane.b32.xlu0 %v7220_v2, %s4660_s17 }
 0x3d1   : > { %v4153_v21 = vpop.f32.mrf.mxu1  ;;  %v4193_v50 = vadd.f32 %v4192_v1, %v4191_v30  ;;  %v2666_v6 = vadd.f32 %v4152_v35, %v4108_v10 }
 0x3d3   : > { %2966 = vrot.lane.b32.xlu1 %v7213_v25, %s4652_s16  ;;  %v4194_v51 = vpop.f32.mrf.mxu0  ;;  %v4154_v36 = vpop.f32.mrf.mxu1  ;;  %v2746_v20 = vadd.f32 %v4193_v50, %v2661_v22 }
 0x3d4   : > { %3030 = vrot.lane.b32.xlu0 %v7220_v2, %s4661_s18  ;;  %v4155_v13 = vadd.f32 %v4154_v36, %v4153_v21 }
 0x3d5   : > { %v4195_v31 = vpop.f32.mrf.mxu0  ;;  %v4156_v60 = vpop.f32.mrf.mxu1 }
 0x3d6   : > { %v4196_v63 = vadd.f32 %v4195_v31, %v4194_v51  ;;  %v2671_v52 = vadd.f32 %v4155_v13, %v4111_v32 }
 0x3d7   : > { %v4197_v48 = vpop.f32.mrf.mxu0  ;;  %v4157_v58 = vpop.f32.mrf.mxu1 }
 0x3d8   : > { %v2751_v34 = vadd.f32 %v4196_v63, %v2666_v6  ;;  %v4158_v54 = vadd.f32 %v4157_v58, %v4156_v60 }
 0x3d9   : > { %v4198_v27 = vpop.f32.mrf.mxu0 }
 0x3da   : > { %v4199_v55 = vadd.f32 %v4198_v27, %v4197_v48  ;;  %v2676_v41 = vadd.f32 %v4158_v54, %v4114_v44 }
 0x3dc   : > { %v4200_v59 = vpop.f32.mrf.mxu0  ;;  %v2756_v8 = vadd.f32 %v4199_v55, %v2671_v52 }
 0x3de   : > { %v4201_v37 = vpop.f32.mrf.mxu0 }
 0x3df   : > { %v4202_v33 = vadd.f32 %v4201_v37, %v4200_v59 }
 0x3e1   : > { %v4390_v46 = vpop.f32.mrf.mxu0  ;;  %v2761_v29 = vadd.f32 %v4202_v33, %v2676_v41 }
 0x3e3   : > { %v2915_v9 = vpop.f32.mrf.mxu0 }
 0x3e5   : > { %v4393_v42 = vpop.f32.mrf.mxu0 }
 0x3e7   : > { %v2925_v49 = vpop.f32.mrf.mxu0 }
 0x3ea   : > { %v4235_v62 = vpop.f32.mrf.mxu1 }
 0x3ec   : > { %v4236_v23 = vpop.f32.mrf.mxu1 }
 0x3ed   : > { %v4237_v0 = vadd.f32 %v4236_v23, %v4235_v62 }
 0x3ee   : > { %v4238_v17 = vpop.f32.mrf.mxu1 }
 0x3ef   : > { %v2831_v16 = vadd.f32 %v4237_v0, %v2746_v20 }
 0x3f0   : > { %v4239_v14 = vpop.f32.mrf.mxu1 }
 0x3f1   : > { %v2916_v19 = vadd.f32 %v2915_v9, %v2831_v16  ;;  %v4240_v39 = vadd.f32 %v4239_v14, %v4238_v17 }
 0x3f2   : > { %v4241_v56 = vpop.f32.mrf.mxu1 }
 0x3f3   : > { %v2836_v40 = vadd.f32 %v4240_v39, %v2751_v34  ;;  %3110 = vrot.lane.b32.xlu0 %v2916_v19, %s4657_s9  ;;  %s4666_s9 = smov 117  }
 0x3f4   : > { %v4242_v57 = vpop.f32.mrf.mxu1 }
 0x3f5   : > { %v2921_v26 = vadd.f32 %v4390_v46, %v2836_v40  ;;  %v4243_v5 = vadd.f32 %v4242_v57, %v4241_v56 }
 0x3f6   : > { %v4244_v7 = vpop.f32.mrf.mxu1 }
 0x3f7   : > { %3099 = vrot.lane.b32.xlu1 %v2921_v26, %s4658_s10  ;;  %3087 = vrot.lane.b32.xlu0 %v2916_v19, %s4658_s10  ;;  %v2841_v18 = vadd.f32 %v4243_v5, %v2756_v8  ;;  %s4667_s10 = smov 118  }
 0x3f8   : > { %v4245_v47 = vpop.f32.mrf.mxu1 }
 0x3f9   : > { %v4246_v28 = vadd.f32 %v4245_v47, %v4244_v7  ;;  %v2926_v61 = vadd.f32 %v2925_v49, %v2841_v18 }
 0x3fb   : > { %3076 = vrot.lane.b32.xlu1 %v2921_v26, %s4650_s14  ;;  %3020 = vrot.lane.b32.xlu0 %v2916_v19, %s4659_s15  ;;  %v2846_v30 = vadd.f32 %v4246_v28, %v2761_v29 }
 0x3fd   : > { %v7245_v45 = vadd.f32 %v4393_v42, %v2846_v30 }
 0x3ff   : > { %3009 = vrot.lane.b32.xlu1 %v2921_v26, %s4660_s17  ;;  %2997 = vrot.lane.b32.xlu0 %v2916_v19, %s4660_s17 }
 0x403   : > { %2982 = vrot.lane.b32.xlu1 %v2921_v26, %s4661_s18  ;;  %3065 = vrot.lane.b32.xlu0 %v2926_v61, %s4659_s15 }
 0x407   : > { %3054 = vrot.lane.b32.xlu1 %v7245_v45, %s4660_s17  ;;  %3043 = vrot.lane.b32.xlu0 %v2926_v61, %s4660_s17 }
 0x40b   : > { %3032 = vrot.lane.b32.xlu1 %v7245_v45, %s4661_s18  ;;  %2968 = vrot.lane.b32.xlu0 %v2926_v61, %s4652_s16 }
 0x40f   : > { %2964 = vrot.lane.b32.xlu1 %v7193_v24, %s4652_s16  ;;  %2955 = vrot.lane.b32.xlu0 %v7220_v2, %s4649_s13 }
 0x413   : > { %2941 = vrot.lane.b32.xlu1 %v7213_v25, %s4649_s13  ;;  %2953 = vrot.lane.b32.xlu0 %v7203_v43, %s4649_s13 }
 0x415   : > { %v3107_v25 = vpop.permute.xlu1 %3106 }
 0x417   : > { %2957 = vrot.lane.b32.xlu1 %v7245_v45, %s4649_s13  ;;  %2943 = vrot.lane.b32.xlu0 %v2926_v61, %s4649_s13 }
 0x419   : > { %v3084_v3 = vpop.permute.xlu1 %3083 }
 0x41a   : > { %v3096_v1 = vpop.permute.xlu0 %3095 }
 0x41b   : > { %2939 = vrot.lane.b32.xlu1 %v7193_v24, %s4649_s13  ;;  %3120 = vperm.xlu0 %4622, %v2935_v4  }
 0x41d   : > { %v7269_v11 = vpop.permute.xlu1 %3016 }
 0x41e   : > { %v3073_v51 = vpop.permute.xlu0 %3072 }
 0x421   : > { %v7273_v21 = vpop.permute.xlu1 %2993 }
 0x422   : > { %v7271_v31 = vpop.permute.xlu0 %3005 }
 0x425   : > { %v3109_v36 = vpop.permute.xlu1 %3108 }
 0x426   : > { %v7275_v48 = vpop.permute.xlu0 %2978  ;;  %v3113_v17 = vsel %vm3112_vm1, %v3107_v25, %v3109_v36 }
 0x429   : > { %v3086_v60 = vpop.permute.xlu1 %3085 }
 0x42a   : > { %v3098_v27 = vpop.permute.xlu0 %3097  ;;  %v3090_v19 = vsel %vm3089_vm6, %v3084_v3, %v3086_v60 }
 0x42b   : > { %v3101_v14 = vsel %vm3089_vm6, %v3096_v1, %v3098_v27 }
 0x42d   : > { %v7277_v53 = vpop.permute.xlu1 %3018 }
 0x42e   : > { %v3075_v59 = vpop.permute.xlu0 %3074  ;;  %v3023_v49 = vsel %vm3022_vm7, %v7269_v11, %v7277_v53 }
 0x42f   : > { %v3078_v57 = vsel %vm700_vm2, %v3073_v51, %v3075_v59 }
 0x431   : > { %v7281_v58 = vpop.permute.xlu1 %2995 }
 0x432   : > { %v7279_v24 = vpop.permute.xlu0 %3007  ;;  %v3000_v1 = vsel %vm2999_vm9, %v7273_v21, %v7281_v58 }
 0x433   : > { %v3011_v4 = vsel %vm2999_vm9, %v7271_v31, %v7279_v24 }
 0x435   : > { %v3062_v38 = vpop.permute.xlu1 %3061 }
 0x436   : > { %v7283_v37 = vpop.permute.xlu0 %2980 }
 0x439   : > { %v3040_v62 = vpop.permute.xlu1 %3039 }
 0x43a   : > { %v3051_v50 = vpop.permute.xlu0 %3050 }
 0x43d   : > { %v3064_v35 = vpop.permute.xlu1 %3063 }
 0x43e   : > { %v7285_v22 = vpop.permute.xlu0 %3028  ;;  %v3067_v52 = vsel %vm3022_vm7, %v3062_v38, %v3064_v35  ;;  %v3304_v38 = vld [vmem:[%s7602_s5 + $0xf8] sm:$0xff] }
 0x441   : > { %v3042_v23 = vpop.permute.xlu1 %3041 }
 0x442   : > { %v3053_v46 = vpop.permute.xlu0 %3052  ;;  %v3045_v33 = vsel %vm2999_vm9, %v3040_v62, %v3042_v23  ;;  %v3303_v62 = vld [vmem:[%s7602_s5 + $0xf0] sm:$0xff] }
 0x443   : > { %v3056_v44 = vsel %vm2999_vm9, %v3051_v50, %v3053_v46  ;;  %v3288_v50 = vld [vmem:[%s7602_s5 + $0x78] sm:$0xff] }
 0x445   : > { %v7289_v20 = vpop.permute.xlu1 %2966 }
 0x446   : > { %v7287_v10 = vpop.permute.xlu0 %3030 }
 0x465   : > { %v3111_v63 = vpop.permute.xlu0 %3110 }
 0x466   : > { %4395 = vmatpush3.msra.mxu0 %v3111_v63  ;;  %v3114_v0 = vsel %vm3112_vm1, %v3109_v36, %v3111_v63  ;;  %v3298_v63 = vld [vmem:[%s7602_s5 + $0xc8] sm:$0xff] }
 0x467   : > { %3123 = vmatprep.subr.mxu1 %v3114_v0  ;;  %4396 = vmatprep.subr.mxu0 %v7634_v12  ;;  %v3282_v0 = vld [vmem:[%s7602_s5 + $0x48] sm:$0xff] }
 0x468   : > { %3124 = vmatpush1.msra.mxu1 %v3113_v17  ;;  %v3297_v17 = vld [vmem:[%s7602_s5 + $0xc0] sm:$0xff] }
 0x469   : > { %v3100_v6 = vpop.permute.xlu1 %3099  ;;  %v3088_v16 = vpop.permute.xlu0 %3087 }
 0x46a   : > { %4397 = vmatpush3.msra.mxu0 %v3100_v6  ;;  %v3102_v9 = vsel %vm3089_vm6, %v3098_v27, %v3100_v6  ;;  %v3091_v34 = vsel %vm3089_vm6, %v3086_v60, %v3088_v16  ;;  %v3281_v6 = vld [vmem:[%s7602_s5 + $0x40] sm:$0xff] }
 0x46b   : > { %3125 = vmatprep.subr.mxu1 %v3102_v9  ;;  %4398 = vmatprep.subr.mxu0 %v7634_v12  ;;  %v3280_v9 = vld [vmem:[%s7602_s5 + $0x38] sm:$0xff] }
 0x46c   : > { %3126 = vmatpush1.msra.mxu1 %v3101_v14  ;;  %4399 = vmatpush3.msra.mxu0 %v3088_v16  ;;  %v3296_v16 = vld [vmem:[%s7602_s5 + $0xb8] sm:$0xff]  ;;  %v3295_v14 = vld [vmem:[%s7602_s5 + $0xb0] sm:$0xff] }
 0x46d   : > { %v3077_v39 = vpop.permute.xlu1 %3076  ;;  %3127 = vmatprep.subr.mxu1 %v3091_v34  ;;  %4400 = vmatprep.subr.mxu0 %v7634_v12  ;;  %v3021_v56 = vpop.permute.xlu0 %3020  ;;  %v3279_v34 = vld [vmem:[%s7602_s5 + $0x30] sm:$0xff] }
 0x46e   : > { %3128 = vmatpush1.msra.mxu1 %v3090_v19  ;;  %4401 = vmatpush3.msra.mxu0 %v3077_v39  ;;  %v3079_v40 = vsel %vm700_vm2, %v3075_v59, %v3077_v39  ;;  %vm2984_vm2 = vcmask 900096   ;;  %v3024_v29 = vsel %vm3022_vm7, %v7277_v53, %v3021_v56  ;;  %v3294_v19 = vld [vmem:[%s7602_s5 + $0xa8] sm:$0xff] }
 0x46f   : > { %3129 = vmatprep.subr.mxu1 %v3079_v40  ;;  %4402 = vmatprep.subr.mxu0 %v7634_v12  ;;  %v3034_v28 = vsel %vm2984_vm2, %v7285_v22, %v7287_v10  ;;  %v2985_v31 = vsel %vm2984_vm2, %v7275_v48, %v7283_v37  ;;  %v3301_v22 = vld [vmem:[%s7602_s5 + $0xe0] sm:$0xff]  ;;  %v3278_v39 = vld [vmem:[%s7602_s5 + $0x28] sm:$0xff] }
 0x470   : > { %3130 = vmatpush1.msra.mxu1 %v3078_v57  ;;  %v3277_v40 = vld [vmem:[%s7602_s5 + $0x20] sm:$0xff]  ;;  %v3292_v57 = vld [vmem:[%s7602_s5 + $0x98] sm:$0xff] }
 0x471   : > { %v3010_v13 = vpop.permute.xlu1 %3009  ;;  %v2998_v26 = vpop.permute.xlu0 %2997 }
 0x472   : > { %v3012_v15 = vsel %vm2999_vm9, %v7279_v24, %v3010_v13  ;;  %v3001_v25 = vsel %vm2999_vm9, %v7281_v58, %v2998_v26  ;;  %v2934_v24 = vld [vmem:[%s7599_s2] sm:$0xff] }
 0x475   : > { %v2983_v7 = vpop.permute.xlu1 %2982  ;;  %v3066_v32 = vpop.permute.xlu0 %3065 }
 0x476   : > { %4403 = vmatpush3.msra.mxu0 %v3066_v32  ;;  %v3068_v55 = vsel %vm3022_vm7, %v3064_v35, %v3066_v32  ;;  %v2986_v11 = vsel %vm2984_vm2, %v7283_v37, %v2983_v7  ;;  %v3285_v35 = vld [vmem:[%s7602_s5 + $0x60] sm:$0xff]  ;;  %v3290_v32 = vld [vmem:[%s7602_s5 + $0x88] sm:$0xff] }
 0x477   : > { %3131 = vmatprep.subr.mxu1 %v3068_v55  ;;  %4404 = vmatprep.subr.mxu0 %v7634_v12  ;;  %v3274_v55 = vld [vmem:[%s7602_s5 + $0x8] sm:$0xff] }
 0x478   : > { %3132 = vmatpush1.msra.mxu1 %v3067_v52  ;;  %v3289_v52 = vld [vmem:[%s7602_s5 + $0x80] sm:$0xff] }
 0x479   : > { %v3055_v54 = vpop.permute.xlu1 %3054  ;;  %v3044_v5 = vpop.permute.xlu0 %3043 }
 0x47a   : > { %4405 = vmatpush3.msra.mxu0 %v3055_v54  ;;  %v3057_v47 = vsel %vm2999_vm9, %v3053_v46, %v3055_v54  ;;  %v3046_v8 = vsel %vm2999_vm9, %v3042_v23, %v3044_v5  ;;  %v3300_v46 = vld [vmem:[%s7602_s5 + $0xd8] sm:$0xff]  ;;  %v3273_v54 = vld [vmem:[%s7602_s5] sm:$0xff] }
 0x47b   : > { %3133 = vmatprep.subr.mxu1 %v3057_v47  ;;  %4406 = vmatprep.subr.mxu0 %v7634_v12  ;;  %v3284_v23 = vld [vmem:[%s7602_s5 + $0x58] sm:$0xff]  ;;  %v3305_v47 = vld [vmem:[%s7602_s5 + $0x100] sm:$0xff] }
 0x47c   : > { %3134 = vmatpush1.msra.mxu1 %v3056_v44  ;;  %4407 = vmatpush3.msra.mxu0 %v3044_v5  ;;  %v3306_v5 = vld [vmem:[%s7602_s5 + $0x108] sm:$0xf] }
 0x47d   : > { %v3033_v42 = vpop.permute.xlu1 %3032  ;;  %3135 = vmatprep.subr.mxu1 %v3046_v8  ;;  %4408 = vmatprep.subr.mxu0 %v7634_v12  ;;  %v2969_v41 = vpop.permute.xlu0 %2968 }
 0x47e   : > { %3136 = vmatpush1.msra.mxu1 %v3045_v33  ;;  %4409 = vmatpush3.msra.mxu0 %v3033_v42  ;;  %v3035_v18 = vsel %vm2984_vm2, %v7287_v10, %v3033_v42  ;;  %v2971_v21 = vsel %vm485_vm14, %v7289_v20, %v2969_v41  ;;  %v3299_v10 = vld [vmem:[%s7602_s5 + $0xd0] sm:$0xff] }
 0x47f   : > { %3137 = vmatprep.subr.mxu1 %v3035_v18  ;;  %4410 = vmatprep.subr.mxu0 %v7634_v12 }
 0x480   : > { %3138 = vmatpush1.msra.mxu1 %v3034_v28  ;;  %4411 = vmatpush3.msra.mxu0 %v3021_v56  ;;  %v3293_v56 = vld [vmem:[%s7602_s5 + $0xa0] sm:$0xff] }
 0x481   : > { %v2965_v61 = vpop.permute.xlu1 %2964  ;;  %3139 = vmatprep.subr.mxu1 %v3024_v29  ;;  %4412 = vmatprep.subr.mxu0 %v7634_v12  ;;  %v2956_v30 = vpop.permute.xlu0 %2955 }
 0x482   : > { %3140 = vmatpush1.msra.mxu1 %v3023_v49  ;;  %4413 = vmatpush3.msra.mxu0 %v3010_v13  ;;  %v2970_v36 = vsel %vm485_vm14, %v2965_v61, %v7289_v20  ;;  %v3283_v20 = vld [vmem:[%s7602_s5 + $0x50] sm:$0xff]  ;;  %v3276_v13 = vld [vmem:[%s7602_s5 + $0x18] sm:$0xff] }
 0x483   : > { %3141 = vmatprep.subr.mxu1 %v3012_v15  ;;  %4414 = vmatprep.subr.mxu0 %v7634_v12 }
 0x484   : > { %3142 = vmatpush1.msra.mxu1 %v3011_v4  ;;  %4415 = vmatpush3.msra.mxu0 %v2998_v26  ;;  %v3291_v26 = vld [vmem:[%s7602_s5 + $0x90] sm:$0xff] }
 0x485   : > { %v2942_v3 = vpop.permute.xlu1 %2941  ;;  %3143 = vmatprep.subr.mxu1 %v3001_v25  ;;  %4416 = vmatprep.subr.mxu0 %v7634_v12  ;;  %v2954_v51 = vpop.permute.xlu0 %2953 }
 0x486   : > { %3144 = vmatpush1.msra.mxu1 %v3000_v1  ;;  %4417 = vmatpush3.msra.mxu0 %v2983_v7  ;;  %v2959_v59 = vsel %vm414_vm13, %v2954_v51, %v2956_v30  ;;  %v3275_v7 = vld [vmem:[%s7602_s5 + $0x10] sm:$0xff] }
 0x487   : > { %3145 = vmatprep.subr.mxu1 %v2986_v11  ;;  %4418 = vmatprep.subr.mxu0 %v7634_v12 }
 0x488   : > { %3146 = vmatpush1.msra.mxu1 %v2985_v31  ;;  %4419 = vmatpush3.msra.mxu0 %v2969_v41 }
 0x489   : > { %v2958_v27 = vpop.permute.xlu1 %2957  ;;  %3147 = vmatprep.subr.mxu1 %v2971_v21  ;;  %4420 = vmatprep.subr.mxu0 %v7634_v12  ;;  %v2944_v60 = vpop.permute.xlu0 %2943 }
 0x48a   : > { %3148 = vmatpush1.msra.mxu1 %v2970_v36  ;;  %4421 = vmatpush3.msra.mxu0 %v2958_v27  ;;  %v2960_v48 = vsel %vm414_vm13, %v2956_v30, %v2958_v27  ;;  %v2946_v53 = vsel %vm414_vm13, %v2942_v3, %v2944_v60 }
 0x48b   : > { %3149 = vmatprep.subr.mxu1 %v2960_v48  ;;  %4422 = vmatprep.subr.mxu0 %v7634_v12 }
 0x48c   : > { %3150 = vmatpush1.msra.mxu1 %v2959_v59  ;;  %4423 = vmatpush3.msra.mxu0 %v2944_v60 }
 0x48d   : > { %v2940_v58 = vpop.permute.xlu1 %2939  ;;  %3151 = vmatprep.subr.mxu1 %v2946_v53  ;;  %4424 = vmatprep.subr.mxu0 %v7634_v12 }
 0x48e   : > { %v2945_v37 = vsel %vm414_vm13, %v2940_v58, %v2942_v3  ;;  %4425 = vmatpush3.msra.mxu0 %v7245_v45  ;;  %v3287_v45 = vld [vmem:[%s7602_s5 + $0x70] sm:$0xff] }
 0x48f   : > { %3152 = vmatpush1.msra.mxu1 %v2945_v37  ;;  %4427 = vmatmul.mubr.f32.vlgmr.msra.gmra.mxu0 %v2934_v24 }
 0x490   : > { %3153 = vmatprep.subr.mxu1 %v7220_v2  ;;  %v3302_v2 = vld [vmem:[%s7602_s5 + $0xe8] sm:$0xff]  ;;  %4429 = vmatprep.subr.msk.mxu0 %vm1051_vm8, %v3306_v5 }
 0x491   : > { %3154 = vmatpush1.msra.mxu1 %v7203_v43  ;;  %v3286_v43 = vld [vmem:[%s7602_s5 + $0x68] sm:$0xff]  ;;  %4430 = vmatpush3.msk.msra.mxu0 %vm1051_vm8, %v3306_v5 }
 0x492   : > { %3188 = vmatmul.mubr.f32.vlgmr.msra.gmra.mxu1 %v2934_v24  ;;  %4272 = vmatprep.subr.mxu1 %v3304_v38 }
 0x493   : > { %4273 = vmatpush3.msra.mxu1 %v3288_v50  ;;  %4431 = vmatprep.subr.mxu0 %v3305_v47 }
 0x494   : > { %4274 = vmatprep.subr.mxu1 %v3303_v62  ;;  %4432 = vmatpush3.msra.mxu0 %v3305_v47 }
 0x495   : > { %4275 = vmatpush3.msra.mxu1 %v3287_v45  ;;  %4439 = vmatprep.subr.mxu0 %v7634_v12 }
 0x496   : > { %4276 = vmatprep.subr.mxu1 %v3302_v2  ;;  %v3121_v44 = vpop.permute.xlu0 %3120 }
 0x497   : > { %4277 = vmatpush3.msra.mxu1 %v3286_v43 }
 0x498   : > { %4278 = vmatprep.subr.mxu1 %v3301_v22 }
 0x499   : > { %4279 = vmatpush3.msra.mxu1 %v3285_v35 }
 0x49a   : > { %4280 = vmatprep.subr.mxu1 %v3300_v46 }
 0x49b   : > { %4281 = vmatpush3.msra.mxu1 %v3284_v23 }
 0x49c   : > { %4282 = vmatprep.subr.mxu1 %v3299_v10 }
 0x49d   : > { %4283 = vmatpush3.msra.mxu1 %v3283_v20 }
 0x49e   : > { %4284 = vmatprep.subr.mxu1 %v3298_v63 }
 0x49f   : > { %4285 = vmatpush3.msra.mxu1 %v3282_v0 }
 0x4a0   : > { %4286 = vmatprep.subr.mxu1 %v3297_v17 }
 0x4a1   : > { %4287 = vmatpush3.msra.mxu1 %v3281_v6 }
 0x4a2   : > { %4288 = vmatprep.subr.mxu1 %v3296_v16 }
 0x4a3   : > { %4289 = vmatpush3.msra.mxu1 %v3280_v9 }
 0x4a4   : > { %4290 = vmatprep.subr.mxu1 %v3295_v14 }
 0x4a5   : > { %4291 = vmatpush3.msra.mxu1 %v3279_v34 }
 0x4a6   : > { %4292 = vmatprep.subr.mxu1 %v3294_v19 }
 0x4a7   : > { %4293 = vmatpush3.msra.mxu1 %v3278_v39 }
 0x4a8   : > { %4294 = vmatprep.subr.mxu1 %v3293_v56 }
 0x4a9   : > { %4295 = vmatpush3.msra.mxu1 %v3277_v40 }
 0x4aa   : > { %4296 = vmatprep.subr.mxu1 %v3292_v57  ;;  %v4057_v57 = vld [vmem:[%s7600_s3 + $0x8] sm:$0xff] }
 0x4ab   : > { %4297 = vmatpush3.msra.mxu1 %v3276_v13 }
 0x4ac   : > { %4298 = vmatprep.subr.mxu1 %v3291_v26 }
 0x4ad   : > { %4299 = vmatpush3.msra.mxu1 %v3275_v7 }
 0x4ae   : > { %4300 = vmatprep.subr.mxu1 %v3290_v32 }
 0x4af   : > { %4301 = vmatpush3.msra.mxu1 %v3274_v55 }
 0x4b0   : > { %4302 = vmatprep.subr.mxu1 %v3289_v52 }
 0x4b1   : > { %4303 = vmatpush3.msra.mxu1 %v3273_v54 }
 0x54f   : > { %v3260_v8 = vpop.f32.mrf.mxu0 }
 0x550   : > { %v3261_v33 = vadd.f32 %v3260_v8, %v3121_v44 }
 0x551   : > { %v4428_v42 = vpop.f32.mrf.mxu0 }
 0x552   : > { %v3189_v41 = vpop.f32.mrf.mxu1  ;;  %vm3266_vm14 = vcmp.gt.f32.partialorder %v3261_v33, 0.0  ;;  %v3269_v18 = vmul.f32 0.2, %v3261_v33 }
 0x553   : > { %v3190_v28 = vadd.f32 %v3189_v41, %v3121_v44 }
 0x554   : > { %v3191_v29 = vpop.f32.mrf.mxu1  ;;  %v3272_v49 = vsel %vm3266_vm14, %v3261_v33, %v3269_v18 }
 0x555   : > { %v3267_v61 = vmul.f32 0.2, %v3190_v28  ;;  %v3192_v30 = vadd.f32 %v3191_v29, %v3121_v44  ;;  %3314 = vrot.lane.b32.xlu1 %v3272_v49, %s4649_s13  ;;  %4433 = vmatprep.mubr.msk.f32.mxu0 %vm3340_vm10, %v3272_v49  ;;  %vm3264_vm12 = vcmp.gt.f32.partialorder %v3190_v28, 0.0  ;;  %v3661_v29 = vld [vmem:[%s7603_s6 + $0x40] sm:$0xf] }
 0x556   : > { %4474 = vmatprep.subr.msk.mxu1 %vm1051_vm8, %v3661_v29 }
 0x557   : > { %vm3265_vm11 = vcmp.gt.f32.partialorder %v3192_v30, 0.0  ;;  %v3268_v15 = vmul.f32 0.2, %v3192_v30  ;;  %v3270_v25 = vsel %vm3264_vm12, %v3190_v28, %v3267_v61  ;;  %v4056_v28 = vld [vmem:[%s7599_s2 + $0x8] sm:$0xff]  ;;  %v3659_v61 = vld [vmem:[%s7603_s6 + $0x30] sm:$0xff] }
 0x559   : > { %v3271_v4 = vsel %vm3265_vm11, %v3192_v30, %v3268_v15  ;;  %v3658_v30 = vld [vmem:[%s7603_s6 + $0x28] sm:$0xff]  ;;  %v3657_v15 = vld [vmem:[%s7603_s6 + $0x20] sm:$0xff] }
 0x55a   : > { %3416 = vmatprep.mubr.f32.mxu1 %v3271_v4  ;;  %v4628_v1 = vpack.i.bf16 %v3270_v25, %v3271_v4  ;;  %v3656_v4 = vld [vmem:[%s7603_s6 + $0x18] sm:$0xff] }
 0x55b   : > { %3417 = vmatmul.mubr.f32.vlgmr.msra.gmra.mxu1 %v3270_v25  ;;  %v3655_v25 = vld [vmem:[%s7603_s6 + $0x10] sm:$0xff] }
 0x55c   : > { %4629 = vrot.lane.b32.xlu0 %v4628_v1, %s4661_s18  ;;  %4624 = vrot.lane.b32.xlu1 %v4628_v1, %s4649_s13 }
 0x55d   : > { %4475 = vmatpush3.msk.msra.mxu1 %vm1051_vm8, %v3661_v29 }
 0x560   : > { %4634 = vrot.lane.b32.xlu0 %v4628_v1, %s4660_s17  ;;  %3324 = vrot.lane.b32.xlu1 %v3272_v49, %s4661_s18  ;;  %s4664_s18 = smov 107   ;;  %v3654_v1 = vld [vmem:[%s7603_s6 + $0x8] sm:$0xff] }
 0x564   : > { %3334 = vrot.lane.b32.xlu1 %v3272_v49, %s4660_s17  ;;  %s4663_s17 = smov 106   ;;  %v3660_v49 = vld [vmem:[%s7603_s6 + $0x38] sm:$0xff] }
 0x565   : > { %4476 = vmatprep.subr.mxu1 %v3660_v49 }
 0x566   : > { %4477 = vmatpush3.msra.mxu1 %v3660_v49 }
 0x567   : > { %4478 = vmatprep.subr.mxu1 %v3659_v61 }
 0x568   : > { %4479 = vmatpush3.msra.mxu1 %v3659_v61 }
 0x569   : > { %4480 = vmatprep.subr.mxu1 %v3658_v30 }
 0x56a   : > { %4481 = vmatpush3.msra.mxu1 %v3658_v30 }
 0x56b   : > { %4482 = vmatprep.subr.mxu1 %v3657_v15 }
 0x56c   : > { %4483 = vmatpush3.msra.mxu1 %v3657_v15 }
 0x56d   : > { %4484 = vmatprep.subr.mxu1 %v3656_v4 }
 0x56e   : > { %4485 = vmatpush3.msra.mxu1 %v3656_v4 }
 0x56f   : > { %4486 = vmatprep.subr.mxu1 %v3655_v25 }
 0x570   : > { %4487 = vmatpush3.msra.mxu1 %v3655_v25 }
 0x571   : > { %4488 = vmatprep.subr.mxu1 %v3654_v1 }
 0x572   : > { %4489 = vmatpush3.msra.mxu1 %v3654_v1 }
 0x5c7   : > { %v3315_v3 = vpop.permute.xlu1 %3314 }
 0x5c8   : > { %4434 = vmatmul.mubr.msk.f32.vlgmr.msra.gmra.mxu0 %vm3340_vm10, %v3315_v3 }
 0x5ce   : > { %v4630_v51 = vpop.permute.xlu0 %4629  ;;  %v4625_v11 = vpop.permute.xlu1 %4624 }
 0x5cf   : > { %v4627_v31 = vunpack.i.h.bf16 %v4625_v11  ;;  %v4626_v21 = vunpack.i.l.bf16 %v4625_v11  ;;  %v4631_v36 = vunpack.i.l.bf16 %v4630_v51  ;;  %v4632_v48 = vunpack.i.h.bf16 %v4630_v51 }
 0x5d1   : > { %v3317_v27 = vsel %vm414_vm13, %v4626_v21, %v3315_v3  ;;  %v3316_v60 = vsel %vm414_vm13, %v4627_v31, %v4626_v21  ;;  %v3326_v50 = vsel %vm2984_vm2, %v4632_v48, %v4631_v36  ;;  %v3653_v3 = vld [vmem:[%s7603_s6] sm:$0xff]  ;;  %vm3669_vm13 = vcmask 556032  }
 0x5d2   : > { %v4635_v59 = vpop.permute.xlu0 %4634  ;;  %v3325_v53 = vpop.permute.xlu1 %3324  ;;  %3421 = vmatprep.mubr.f32.mxu1 %v3317_v27  ;;  %4490 = vmatprep.subr.mxu1 %v3653_v3 }
 0x5d3   : > { %3422 = vmatmul.mubr.f32.gmra.mxu1 %v3316_v60  ;;  %4436 = vmatprep.mubr.msk.f32.mxu0 %vm3340_vm10, %v3325_v53  ;;  %v3327_v24 = vsel %vm2984_vm2, %v4631_v36, %v3325_v53  ;;  %v4636_v58 = vunpack.i.l.bf16 %v4635_v59  ;;  %v4637_v37 = vunpack.i.h.bf16 %v4635_v59 }
 0x5d4   : > { %3426 = vmatprep.mubr.f32.mxu1 %v3327_v24  ;;  %4491 = vmatpush3.msra.mxu1 %v3653_v3 }
 0x5d5   : > { %v3336_v45 = vsel %vm2999_vm9, %v4637_v37, %v4636_v58  ;;  %4533 = vmatprep.subr.mxu1 %v7634_v12 }
 0x5d6   : > { %v3335_v38 = vpop.permute.xlu1 %3334 }
 0x5d7   : > { %3427 = vmatmul.mubr.f32.gmra.mxu1 %v3326_v50  ;;  %4437 = vmatmul.mubr.msk.f32.gmra.mxu0 %vm3340_vm10, %v3335_v38  ;;  %v3337_v62 = vsel %vm2999_vm9, %v4636_v58, %v3335_v38  ;;  %v3899_v38 = vld [vmem:[%s7604_s7 + $0x10] sm:$0xff] }
 0x5d8   : > { %3431 = vmatprep.mubr.f32.mxu1 %v3337_v62  ;;  %4471 = vmatprep.mubr.msk.f32.mxu0 %vm7654_vm0, %v7634_v12  ;;  %v4064_v50 = vld [vmem:[%s7600_s3 + $0x10] sm:$0xff] }
 0x5db   : > { %3432 = vmatmul.mubr.f32.gmra.mxu1 %v3336_v45 }
 0x61b   : > { %v4304_v2 = vpop.f32.mrf.mxu1 }
 0x61d   : > { %v4305_v43 = vpop.f32.mrf.mxu1 }
 0x61e   : > { %v4306_v35 = vadd.f32 %v4305_v43, %v4304_v2 }
 0x688   : > { %v4435_v22 = vpop.f32.mrf.mxu0 }
 0x68a   : > { %v3503_v46 = vpop.f32.mrf.mxu0 }
 0x68b   : > { %v3504_v23 = vadd.f32 %v4306_v35, %v3503_v46 }
 0x68d   : > { %3572 = vrot.lane.b32.xlu0 %v3504_v23, %s4663_s17 }
 0x691   : > { %3566 = vrot.lane.b32.xlu0 %v3504_v23, %s4664_s18 }
 0x693   : > { %v4307_v10 = vpop.f32.mrf.mxu1 }
 0x695   : > { %v4308_v20 = vpop.f32.mrf.mxu1 }
 0x696   : > { %v4309_v63 = vadd.f32 %v4308_v20, %v4307_v10 }
 0x697   : > { %v4310_v0 = vpop.f32.mrf.mxu1  ;;  %v4438_v17 = vpop.f32.mrf.mxu0 }
 0x698   : > { %v3509_v6 = vadd.f32 %v4435_v22, %v4309_v63 }
 0x699   : > { %v4311_v16 = vpop.f32.mrf.mxu1  ;;  %v3513_v14 = vpop.f32.mrf.mxu0 }
 0x69a   : > { %v4312_v9 = vadd.f32 %v4311_v16, %v4310_v0  ;;  %3569 = vrot.lane.b32.xlu1 %v3509_v6, %s4664_s18 }
 0x69b   : > { %v4313_v34 = vpop.f32.mrf.mxu1 }
 0x69c   : > { %v3514_v19 = vadd.f32 %v4312_v9, %v3513_v14  ;;  %v4063_v9 = vld [vmem:[%s7599_s2 + $0x10] sm:$0xff]  ;;  %v3898_v14 = vld [vmem:[%s7604_s7 + $0x8] sm:$0xff] }
 0x69d   : > { %v4314_v39 = vpop.f32.mrf.mxu1 }
 0x69e   : > { %v4315_v56 = vadd.f32 %v4314_v39, %v4313_v34  ;;  %3563 = vrot.lane.b32.xlu1 %v3509_v6, %s4659_s15  ;;  %3560 = vrot.lane.b32.xlu0 %v3514_v19, %s4665_s30  ;;  %v3897_v34 = vld [vmem:[%s7604_s7] sm:$0xff] }
 0x6a0   : > { %v3519_v40 = vadd.f32 %v4438_v17, %v4315_v56 }
 0x6a2   : > { %3557 = vrot.lane.b32.xlu1 %v3519_v40, %s4666_s9  ;;  %3554 = vrot.lane.b32.xlu0 %v3514_v19, %s4666_s9 }
 0x6a6   : > { %3551 = vrot.lane.b32.xlu1 %v3519_v40, %s4667_s10  ;;  %3548 = vrot.lane.b32.xlu0 %v3504_v23, %s4665_s30 }
 0x6aa   : > { %3545 = vrot.lane.b32.xlu1 %v3509_v6, %s4666_s9  ;;  %3542 = vrot.lane.b32.xlu0 %v3504_v23, %s4666_s9 }
 0x6ae   : > { %3538 = vrot.lane.b32.xlu1 %v3509_v6, %s4667_s10  ;;  %3534 = vrot.lane.b32.xlu0 %v3514_v19, %s4652_s16 }
 0x6b2   : > { %3531 = vrot.lane.b32.xlu1 %v3519_v40, %s4649_s13  ;;  %3527 = vrot.lane.b32.xlu0 %v3514_v19, %s4649_s13 }
 0x6b6   : > { %3577 = vperm.xlu1 %4638, %v4057_v57  }
 0x6ff   : > { %v3573_v13 = vpop.permute.xlu0 %3572 }
 0x700   : > { %4440 = vmatpush3.msra.mxu0 %v3573_v13 }
 0x701   : > { %4441 = vmatprep.subr.mxu0 %v7634_v12 }
 0x703   : > { %v3567_v26 = vpop.permute.xlu0 %3566 }
 0x70c   : > { %v3570_v7 = vpop.permute.xlu1 %3569 }
 0x70d   : > { %4442 = vmatpush3.msra.mxu0 %v3570_v7 }
 0x70e   : > { %4443 = vmatprep.subr.mxu0 %v7634_v12 }
 0x70f   : > { %4444 = vmatpush3.msra.mxu0 %v3567_v26 }
 0x710   : > { %v3564_v32 = vpop.permute.xlu1 %3563  ;;  %4445 = vmatprep.subr.mxu0 %v7634_v12  ;;  %v3561_v55 = vpop.permute.xlu0 %3560 }
 0x711   : > { %4446 = vmatpush3.msra.mxu0 %v3564_v32 }
 0x712   : > { %4447 = vmatprep.subr.mxu0 %v7634_v12 }
 0x713   : > { %4448 = vmatpush3.msra.mxu0 %v3561_v55 }
 0x714   : > { %v3558_v52 = vpop.permute.xlu1 %3557  ;;  %4449 = vmatprep.subr.mxu0 %v7634_v12  ;;  %v3555_v54 = vpop.permute.xlu0 %3554 }
 0x715   : > { %4450 = vmatpush3.msra.mxu0 %v3558_v52 }
 0x716   : > { %4451 = vmatprep.subr.mxu0 %v7634_v12 }
 0x717   : > { %4452 = vmatpush3.msra.mxu0 %v3555_v54 }
 0x718   : > { %v3552_v5 = vpop.permute.xlu1 %3551  ;;  %4453 = vmatprep.subr.mxu0 %v7634_v12  ;;  %v3549_v47 = vpop.permute.xlu0 %3548 }
 0x719   : > { %4454 = vmatpush3.msra.mxu0 %v3552_v5 }
 0x71a   : > { %4455 = vmatprep.subr.mxu0 %v7634_v12 }
 0x71b   : > { %4456 = vmatpush3.msra.mxu0 %v3549_v47 }
 0x71c   : > { %v3546_v44 = vpop.permute.xlu1 %3545  ;;  %4457 = vmatprep.subr.mxu0 %v7634_v12  ;;  %v3543_v8 = vpop.permute.xlu0 %3542 }
 0x71d   : > { %4458 = vmatpush3.msra.mxu0 %v3546_v44 }
 0x71e   : > { %4459 = vmatprep.subr.mxu0 %v7634_v12 }
 0x71f   : > { %4460 = vmatpush3.msra.mxu0 %v3543_v8 }
 0x720   : > { %v3539_v33 = vpop.permute.xlu1 %3538  ;;  %4461 = vmatprep.subr.mxu0 %v7634_v12  ;;  %v3535_v42 = vpop.permute.xlu0 %3534 }
 0x721   : > { %4462 = vmatpush3.msra.mxu0 %v3539_v33 }
 0x722   : > { %4463 = vmatprep.subr.mxu0 %v7634_v12 }
 0x723   : > { %4464 = vmatpush3.msra.mxu0 %v3535_v42 }
 0x724   : > { %v3532_v41 = vpop.permute.xlu1 %3531  ;;  %4465 = vmatprep.subr.mxu0 %v7634_v12  ;;  %v3528_v18 = vpop.permute.xlu0 %3527 }
 0x725   : > { %4466 = vmatpush3.msra.mxu0 %v3532_v41 }
 0x726   : > { %4467 = vmatprep.subr.mxu0 %v7634_v12 }
 0x727   : > { %4468 = vmatpush3.msra.mxu0 %v3528_v18 }
 0x728   : > { %4469 = vmatprep.subr.mxu0 %v7634_v12 }
 0x729   : > { %4470 = vmatpush3.msra.mxu0 %v3519_v40 }
 0x72a   : > { %4472 = vmatmul.mubr.f32.vlgmr.msra.gmra.mxu0 %v4056_v28  ;;  %4498 = vmatprep.subr.mxu0 %v7634_v12 }
 0x72b   : > { %4530 = vmatprep.mubr.msk.f32.mxu0 %vm7654_vm0, %v7634_v12 }
 0x731   : > { %v3578_v51 = vpop.permute.xlu1 %3577 }
 0x7ea   : > { %v3646_v11 = vpop.f32.mrf.mxu0 }
 0x7eb   : > { %v3647_v31 = vadd.f32 %v3646_v11, %v3578_v51 }
 0x7ec   : > { %v4473_v21 = vpop.f32.mrf.mxu0 }
 0x7ed   : > { %vm3650_vm8 = vcmp.gt.f32.partialorder %v3647_v31, 0.0  ;;  %v3651_v36 = vmul.f32 0.2, %v3647_v31 }
 0x7ef   : > { %v3652_v27 = vsel %vm3650_vm8, %v3647_v31, %v3651_v36 }
 0x7f0   : > { %3665 = vrot.lane.b32.xlu1 %v3652_v27, %s4667_s10  ;;  %3663 = vrot.lane.b32.xlu0 %v3652_v27, %s4649_s13  ;;  %s4671_s10 = smov 120  }
 0x7f1   : > { %4492 = vmatprep.mubr.msk.f32.mxu1 %vm3669_vm13, %v3652_v27 }
 0x7f4   : > { %3667 = vrot.lane.b32.xlu0 %v3652_v27, %s4666_s9  ;;  %s4670_s9 = smov 121  }
 0x862   : > { %v3666_v60 = vpop.permute.xlu1 %3665  ;;  %v3664_v48 = vpop.permute.xlu0 %3663 }
 0x863   : > { %4493 = vmatmul.mubr.msk.f32.vlgmr.msra.gmra.mxu1 %vm3669_vm13, %v3664_v48 }
 0x864   : > { %4495 = vmatprep.mubr.msk.f32.mxu1 %vm3669_vm13, %v3666_v60  ;;  %4534 = vmatpush3.msra.mxu1 %v3899_v38 }
 0x865   : > { %4535 = vmatprep.subr.mxu1 %v7634_v12 }
 0x866   : > { %v3668_v59 = vpop.permute.xlu0 %3667  ;;  %4536 = vmatpush3.msra.mxu1 %v3898_v14 }
 0x867   : > { %4496 = vmatmul.mubr.msk.f32.gmra.mxu1 %vm3669_vm13, %v3668_v59  ;;  %4537 = vmatprep.subr.mxu1 %v7634_v12 }
 0x868   : > { %4539 = vmatprep.mubr.msk.f32.mxu1 %vm7654_vm0, %v7634_v12  ;;  %4538 = vmatpush3.msra.mxu1 %v3897_v34 }
 0x923   : > { %v4494_v53 = vpop.f32.mrf.mxu1 }
 0x924   : > { %3813 = vrot.lane.b32.xlu0 %v4494_v53, %s4668_s24 }
 0x925   : > { %v3747_v24 = vpop.f32.mrf.mxu1 }
 0x926   : > { %3816 = vrot.lane.b32.xlu1 %v3747_v24, %s4669_s25 }
 0x927   : > { %v7548_v58 = vpop.f32.mrf.mxu1 }
 0x928   : > { %3807 = vrot.lane.b32.xlu0 %v4494_v53, %s4665_s30 }
 0x929   : > { %v3757_v37 = vpop.f32.mrf.mxu1 }
 0x92a   : > { %3810 = vrot.lane.b32.xlu1 %v3747_v24, %s4668_s24 }
 0x92c   : > { %3801 = vrot.lane.b32.xlu0 %v7548_v58, %s4670_s9 }
 0x92e   : > { %3804 = vrot.lane.b32.xlu1 %v3757_v37, %s4671_s10 }
 0x930   : > { %3795 = vrot.lane.b32.xlu0 %v7548_v58, %s4672_s26 }
 0x932   : > { %3798 = vrot.lane.b32.xlu1 %v3757_v37, %s4670_s9 }
 0x934   : > { %3789 = vrot.lane.b32.xlu0 %v4494_v53, %s4670_s9 }
 0x936   : > { %3792 = vrot.lane.b32.xlu1 %v3747_v24, %s4671_s10 }
 0x938   : > { %3782 = vrot.lane.b32.xlu0 %v4494_v53, %s4672_s26 }
 0x93a   : > { %3786 = vrot.lane.b32.xlu1 %v3747_v24, %s4670_s9 }
 0x93c   : > { %3775 = vrot.lane.b32.xlu0 %v7548_v58, %s4649_s13 }
 0x93e   : > { %3778 = vrot.lane.b32.xlu1 %v3757_v37, %s4652_s16 }
 0x940   : > { %3821 = vperm.xlu0 %4622, %v4064_v50  }
 0x942   : > { %3771 = vrot.lane.b32.xlu1 %v3757_v37, %s4649_s13 }
 0x996   : > { %v3814_v62 = vpop.permute.xlu0 %3813 }
 0x998   : > { %v3817_v45 = vpop.permute.xlu1 %3816 }
 0x999   : > { %4499 = vmatpush3.msra.mxu0 %v3817_v45 }
 0x99a   : > { %v3808_v2 = vpop.permute.xlu0 %3807  ;;  %4500 = vmatprep.subr.mxu0 %v7634_v12 }
 0x99b   : > { %4501 = vmatpush3.msra.mxu0 %v3814_v62 }
 0x99c   : > { %4502 = vmatprep.subr.mxu0 %v7634_v12  ;;  %v3811_v43 = vpop.permute.xlu1 %3810 }
 0x99d   : > { %4503 = vmatpush3.msra.mxu0 %v3811_v43 }
 0x99e   : > { %4504 = vmatprep.subr.mxu0 %v7634_v12  ;;  %v3802_v22 = vpop.permute.xlu0 %3801 }
 0x99f   : > { %4505 = vmatpush3.msra.mxu0 %v3808_v2 }
 0x9a0   : > { %4506 = vmatprep.subr.mxu0 %v7634_v12  ;;  %v3805_v35 = vpop.permute.xlu1 %3804 }
 0x9a1   : > { %4507 = vmatpush3.msra.mxu0 %v3805_v35 }
 0x9a2   : > { %v3796_v46 = vpop.permute.xlu0 %3795  ;;  %4508 = vmatprep.subr.mxu0 %v7634_v12 }
 0x9a3   : > { %4509 = vmatpush3.msra.mxu0 %v3802_v22 }
 0x9a4   : > { %4510 = vmatprep.subr.mxu0 %v7634_v12  ;;  %v3799_v23 = vpop.permute.xlu1 %3798 }
 0x9a5   : > { %4511 = vmatpush3.msra.mxu0 %v3799_v23 }
 0x9a6   : > { %v3790_v10 = vpop.permute.xlu0 %3789  ;;  %4512 = vmatprep.subr.mxu0 %v7634_v12 }
 0x9a7   : > { %4513 = vmatpush3.msra.mxu0 %v3796_v46 }
 0x9a8   : > { %4514 = vmatprep.subr.mxu0 %v7634_v12  ;;  %v3793_v20 = vpop.permute.xlu1 %3792 }
 0x9a9   : > { %4515 = vmatpush3.msra.mxu0 %v3793_v20 }
 0x9aa   : > { %4516 = vmatprep.subr.mxu0 %v7634_v12  ;;  %v3783_v63 = vpop.permute.xlu0 %3782 }
 0x9ab   : > { %4517 = vmatpush3.msra.mxu0 %v3790_v10 }
 0x9ac   : > { %4518 = vmatprep.subr.mxu0 %v7634_v12  ;;  %v3787_v0 = vpop.permute.xlu1 %3786 }
 0x9ad   : > { %4519 = vmatpush3.msra.mxu0 %v3787_v0 }
 0x9ae   : > { %4520 = vmatprep.subr.mxu0 %v7634_v12  ;;  %v3776_v6 = vpop.permute.xlu0 %3775 }
 0x9af   : > { %4521 = vmatpush3.msra.mxu0 %v3783_v63 }
 0x9b0   : > { %4522 = vmatprep.subr.mxu0 %v7634_v12  ;;  %v3779_v17 = vpop.permute.xlu1 %3778 }
 0x9b1   : > { %4523 = vmatpush3.msra.mxu0 %v3779_v17 }
 0x9b2   : > { %4524 = vmatprep.subr.mxu0 %v7634_v12 }
 0x9b3   : > { %4525 = vmatpush3.msra.mxu0 %v3776_v6 }
 0x9b4   : > { %4526 = vmatprep.subr.mxu0 %v7634_v12  ;;  %v3772_v16 = vpop.permute.xlu1 %3771 }
 0x9b5   : > { %4527 = vmatpush3.msra.mxu0 %v3772_v16 }
 0x9b6   : > { %4528 = vmatprep.subr.mxu0 %v7634_v12 }
 0x9b7   : > { %4529 = vmatpush3.msra.mxu0 %v7548_v58 }
 0x9b8   : > { %4531 = vmatmul.mubr.f32.vlgmr.msra.gmra.mxu0 %v4063_v9 }
 0x9bb   : > { %v3822_v19 = vpop.permute.xlu0 %3821 }
 0xa78   : > { %v3890_v39 = vpop.f32.mrf.mxu0 }
 0xa79   : > { %v3891_v56 = vadd.f32 %v3890_v39, %v3822_v19 }
 0xa7a   : > { %v4532_v40 = vpop.f32.mrf.mxu0 }
 0xa7b   : > { %vm3894_vm4 = vcmp.gt.f32.partialorder %v3891_v56, 0.0  ;;  %v3895_v57 = vmul.f32 0.2, %v3891_v56 }
 0xa7d   : > { %v3896_v13 = vsel %vm3894_vm4, %v3891_v56, %v3895_v57 }
 0xa7e   : > { %4540 = vmatmul.mubr.msk.f32.vlgmr.msra.gmra.mxu1 %vm3900_vm3, %v3896_v13 }
 0xb3e   : > { %v3970_v12 = vpop.f32.mrf.mxu1 }
 0xb3f   : > { %3974 = vst.msk [vmem:[%s303_s22] sm:$0xff] %vm1154_vm15, %v3970_v12 }
 0xb40   : > { %v4541_v26 = vpop.f32.mrf.mxu1 }
 0xb41 PF: > { %s18_s27 = sadd.s32 1, %s4645_s27  }
 0xb42   : > { %p15_p4 = scmp.ge.s32.totalorder %s18_s27, 4  }
 0xb44   :  { %17 = sbr.rel (!%p15_p4) target bundleno = 1 (0x1), region = 86 }

</bundles_post_ra>
